<compile_context>
chip_gen: v7x
topology: tpu7x:2x2x1
jax: 0.10.0
libtpu: 0.0.40
codegen_flags: <defaults>
</compile_context>

<pallas_src>
import functools

import numpy as np
import jax
import jax.numpy as jnp
from jax import lax
from jax.experimental import pallas as pl
from jax.experimental.pallas import tpu as pltpu

EPS = 1e-5
GROUPS = 2


# ------------------------------------------------------------------
# Host-side constant 0/1 operators (tiny, built once per shape).
# ------------------------------------------------------------------

def _upsample_scatter(h, w):
    """(4, h*w, 4*h*w): tap t = ki*2+kj scatters input pixel (i, j) onto
    output pixel (2i+ki, 2j+kj) of the 2x-upsampled (flattened) image."""
    p_in = h * w
    w2 = 2 * w
    p_out = 4 * p_in
    scat = np.zeros((4, p_in, p_out), np.float32)
    i, j = np.divmod(np.arange(p_in), w)
    for t in range(4):
        ki, kj = divmod(t, 2)
        q = (2 * i + ki) * w2 + (2 * j + kj)
        scat[t, np.arange(p_in), q] = 1.0
    return scat


def _conv3x3_shifts(h, w):
    """(9, h*w, h*w): tap t = di*3+dj shift operator with zero padding baked
    in, i.e. (x @ T[t])[:, (oh, ow)] == xpad[:, oh+di, ow+dj]."""
    p = h * w
    oh, ow = np.divmod(np.arange(p), w)
    shifts = np.zeros((9, p, p), np.float32)
    for t in range(9):
        di, dj = divmod(t, 3)
        ih, iw = oh + di - 1, ow + dj - 1
        valid = (ih >= 0) & (ih < h) & (iw >= 0) & (iw < w)
        shifts[t, (ih * w + iw)[valid], np.arange(p)[valid]] = 1.0
    return shifts


# ------------------------------------------------------------------
# The fused kernel: one grid step == one batch element; all intermediates
# live in VMEM. Internal layout is channel-major (C, H*W) -> lane-dense.
# ------------------------------------------------------------------

def _upblock_kernel(x_ref, skip_ref, wup_ref, bup_ref, scat_ref, shift_ref,
                    wc1_ref, bc1_ref, g1w_ref, g1b_ref,
                    wc2_ref, bc2_ref, g2w_ref, g2b_ref,
                    wh_ref, wr_ref, badj_ref, o_ref, *, groups):
    f32 = jnp.float32
    c = o_ref.shape[1]

    # ---- cat([x, skip], channel) -> (2C, Hin*Win) -------------------------
    xin = jnp.concatenate([x_ref[0], skip_ref[0]], axis=0).astype(f32)

    # ---- ConvTranspose2d(2C -> C, k=2, s=2) --------------------------------
    # Per tap: tiny weight matmul, then an MXU scatter matmul that interleaves
    # the tap onto the 2x-upsampled flattened grid. Accumulate on the bias.
    h = bup_ref[...].astype(f32)                                  # (C, 1)
    for t in range(4):
        yt = jnp.dot(wup_ref[t], xin, preferred_element_type=f32)     # (C, Pin)
        h = h + jnp.dot(yt, scat_ref[t], preferred_element_type=f32)  # (C, Pout)

    # ---- Conv3x3 (padding=1) as im2col with precomputed shift operators ---
    def conv3x3(a, w_ref, b_ref):
        x9 = jnp.concatenate(
            [jnp.dot(a, shift_ref[t], preferred_element_type=f32)
             for t in range(9)], axis=0)                          # (9C, Pout)
        return jnp.dot(w_ref[...], x9, preferred_element_type=f32) + b_ref[...]

    # ---- GroupNorm(groups) + SiLU: mask-free one-pass statistics ----------
    cg = c // groups

    def gn_silu(a, gw_ref, gb_ref):
        parts = []
        for g in range(groups):
            xg = a[g * cg:(g + 1) * cg, :]
            mean = jnp.mean(xg, keepdims=True)                    # (1, 1)
            var = jnp.mean(jnp.square(xg), keepdims=True) - jnp.square(mean)
            parts.append((xg - mean) * lax.rsqrt(var + EPS))
        y = jnp.concatenate(parts, axis=0) * gw_ref[...] + gb_ref[...]
        # SiLU; sigmoid via tanh is numerically stable and runs on the EUP.
        return y * (0.5 * (jnp.tanh(0.5 * y) + 1.0))

    # ---- "ResidualBlock": conv3x3 -> GN/SiLU -> conv3x3 -> GN/SiLU --------
    r = gn_silu(conv3x3(h, wc1_ref, bc1_ref), g1w_ref, g1b_ref)
    r = gn_silu(conv3x3(r, wc2_ref, bc2_ref), g2w_ref, g2b_ref)

    # ---- Conv2d(2C -> C, k=1) on cat([h, r]) without materializing cat ----
    out = (jnp.dot(wh_ref[...], h, preferred_element_type=f32)
           + jnp.dot(wr_ref[...], r, preferred_element_type=f32)
           + badj_ref[...])
    o_ref[0] = out.astype(o_ref.dtype)


# ------------------------------------------------------------------
# Wrapper: weight repacking (tiny, trace-time) + single pallas_call.
# ------------------------------------------------------------------

def upblock_forward(params, x_nchw, skip_nchw):
    p = params
    n, c, h, w = x_nchw.shape
    h2, w2 = 2 * h, 2 * w
    p_in, p_out = h * w, h2 * w2

    # ConvTranspose2d weight (2C, C, 2, 2)[ci, co, ki, kj] -> (tap, C, 2C)
    wup = jnp.transpose(p['up_w'], (2, 3, 1, 0)).reshape(4, c, 2 * c)
    bup = p['up_b'].reshape(c, 1)
    # Conv3x3 weights stored HWIO (di, dj, ci, co) -> (co, tap*C + ci)
    wc1 = jnp.transpose(p['c1_w'], (3, 0, 1, 2)).reshape(c, 9 * c)
    wc2 = jnp.transpose(p['c2_w'], (3, 0, 1, 2)).reshape(c, 9 * c)
    bc1, bc2 = p['c1_b'].reshape(c, 1), p['c2_b'].reshape(c, 1)
    g1w, g1b = p['g1_w'].reshape(c, 1), p['g1_b'].reshape(c, 1)
    g2w, g2b = p['g2_w'].reshape(c, 1), p['g2_b'].reshape(c, 1)
    # 1x1 adjust conv split into the part consuming h and the part for r.
    wadj = p['adj_w'].reshape(c, 2 * c)
    wh, wr = wadj[:, :c], wadj[:, c:]
    badj = p['adj_b'].reshape(c, 1)

    scat = jnp.asarray(_upsample_scatter(h, w))        # (4, Pin, Pout)
    shifts = jnp.asarray(_conv3x3_shifts(h2, w2))      # (9, Pout, Pout)

    xf = x_nchw.reshape(n, c, p_in)
    sf = skip_nchw.reshape(n, c, p_in)

    def bcast(arr):
        nd = arr.ndim
        return pl.BlockSpec(arr.shape, lambda i, _nd=nd: (0,) * _nd)

    out = pl.pallas_call(
        functools.partial(_upblock_kernel, groups=GROUPS),
        out_shape=jax.ShapeDtypeStruct((n, c, p_out), jnp.float32),
        grid=(n,),
        in_specs=[
            pl.BlockSpec((1, c, p_in), lambda i: (i, 0, 0)),
            pl.BlockSpec((1, c, p_in), lambda i: (i, 0, 0)),
            bcast(wup), bcast(bup), bcast(scat), bcast(shifts),
            bcast(wc1), bcast(bc1), bcast(g1w), bcast(g1b),
            bcast(wc2), bcast(bc2), bcast(g2w), bcast(g2b),
            bcast(wh), bcast(wr), bcast(badj),
        ],
        out_specs=pl.BlockSpec((1, c, p_out), lambda i: (i, 0, 0)),
        compiler_params=pltpu.CompilerParams(
            dimension_semantics=("parallel",)),
    )(xf, sf, wup, bup, scat, shifts,
      wc1, bc1, g1w, g1b, wc2, bc2, g2w, g2b, wh, wr, badj)

    return out.reshape(n, c, h2, w2)


# ------------------------------------------------------------------
# Deterministic parameter init (shapes follow the PyTorch __init__).
# ------------------------------------------------------------------

def init_params(key, in_channels, out_channels):
    ks = jax.random.split(key, 12)
    w = lambda k, shape: 0.1 * jax.random.normal(k, shape, jnp.float32)
    p = {}
    # ConvTranspose2d(2*in, in, k=2, s=2): weight (2*in, in, 2, 2)
    p['up_w'] = w(ks[0], (2 * in_channels, in_channels, 2, 2))
    p['up_b'] = w(ks[1], (in_channels,))
    # ResidualBlock(out_channels): two (Conv3x3 + GN(2) + SiLU); conv weights stored HWIO
    p['c1_w'] = jnp.transpose(w(ks[2], (out_channels, out_channels, 3, 3)), (2, 3, 1, 0))
    p['c1_b'] = w(ks[3], (out_channels,))
    p['g1_w'] = 1.0 + 0.05 * jax.random.normal(ks[4], (out_channels,), jnp.float32)
    p['g1_b'] = w(ks[5], (out_channels,))
    p['c2_w'] = jnp.transpose(w(ks[6], (out_channels, out_channels, 3, 3)), (2, 3, 1, 0))
    p['c2_b'] = w(ks[7], (out_channels,))
    p['g2_w'] = 1.0 + 0.05 * jax.random.normal(ks[8], (out_channels,), jnp.float32)
    p['g2_b'] = w(ks[9], (out_channels,))
    # Conv2d(2*out, out, k=1): weight (out, 2*out, 1, 1)
    p['adj_w'] = w(ks[10], (out_channels, 2 * out_channels, 1, 1))
    p['adj_b'] = w(ks[11], (out_channels,))
    return p


# ------------------------------------------------------------------
# Pure-JAX reference (for the correctness check).
# ------------------------------------------------------------------

def _ref_conv3x3(x, w_hwio, b):
    y = lax.conv_general_dilated(x, w_hwio, (1, 1), 'SAME',
                                 dimension_numbers=('NHWC', 'HWIO', 'NHWC'))
    return y + b.reshape(1, 1, 1, -1)


def _ref_gn_silu(x, gamma, beta, groups=GROUPS):
    nb, hh, ww, cc = x.shape
    xg = x.reshape(nb, hh, ww, groups, cc // groups)
    mean = xg.mean(axis=(1, 2, 4), keepdims=True)
    var = ((xg - mean) ** 2).mean(axis=(1, 2, 4), keepdims=True)
    xn = ((xg - mean) / jnp.sqrt(var + EPS)).reshape(nb, hh, ww, cc)
    y = xn * gamma.reshape(1, 1, 1, cc) + beta.reshape(1, 1, 1, cc)
    return y * jax.nn.sigmoid(y)


def ref_forward(p, x_nchw, skip_nchw):
    x = jnp.transpose(x_nchw, (0, 2, 3, 1))
    skip = jnp.transpose(skip_nchw, (0, 2, 3, 1))
    h = jnp.concatenate([x, skip], axis=-1)
    nb, hh, ww, _ = h.shape
    cout_up = p['up_w'].shape[1]
    h = (jnp.einsum('nijc,cokl->nikjlo', h, p['up_w'])
         .reshape(nb, 2 * hh, 2 * ww, cout_up) + p['up_b'].reshape(1, 1, 1, -1))
    r = _ref_gn_silu(_ref_conv3x3(h, p['c1_w'], p['c1_b']), p['g1_w'], p['g1_b'])
    r = _ref_gn_silu(_ref_conv3x3(r, p['c2_w'], p['c2_b']), p['g2_w'], p['g2_b'])
    h2 = jnp.concatenate([h, r], axis=-1)
    wadj = p['adj_w'].reshape(p['adj_w'].shape[0], -1)
    out = jnp.einsum('nhwc,oc->nhwo', h2, wadj) + p['adj_b'].reshape(1, 1, 1, -1)
    return jnp.transpose(out, (0, 3, 1, 2))


# ------------------------------------------------------------------

if __name__ == "__main__":
    Cin = Cout = 4          # forward requires in_channels == out_channels
    N, H, W = 2, 8, 8       # input spatial 8x8 -> output spatial 16x16

    key = jax.random.PRNGKey(0)
    kx, ks, kp = jax.random.split(key, 3)
    x = jax.random.normal(kx, (N, Cin, H, W), jnp.float32)       # NCHW (PyTorch)
    skip = jax.random.normal(ks, (N, Cin, H, W), jnp.float32)    # NCHW (PyTorch)
    params = init_params(kp, Cin, Cout)

    fwd = jax.jit(upblock_forward)
    out = jax.block_until_ready(fwd(params, x, skip))
    assert out.shape == (N, Cout, 2 * H, 2 * W), out.shape

    ref = jax.block_until_ready(ref_forward(params, x, skip))
    err = float(jnp.max(jnp.abs(out - ref)))
    assert err < 5e-3, f"mismatch vs reference: max abs err = {err}"

    print("KERNEL_OK")
</pallas_src>

<mosaic_0001>
module attributes {stable_mosaic.version = 11 : i64} {
  func.func @_upblock_kernel(%arg0: i32, %arg1: memref<1x4x64xf32, #tpu.memory_space<vmem>>, %arg2: memref<1x4x64xf32, #tpu.memory_space<vmem>>, %arg3: memref<4x4x8xf32, #tpu.memory_space<vmem>>, %arg4: memref<4x1xf32, #tpu.memory_space<vmem>>, %arg5: memref<4x64x256xf32, #tpu.memory_space<vmem>>, %arg6: memref<9x256x256xf32, #tpu.memory_space<vmem>>, %arg7: memref<4x36xf32, #tpu.memory_space<vmem>>, %arg8: memref<4x1xf32, #tpu.memory_space<vmem>>, %arg9: memref<4x1xf32, #tpu.memory_space<vmem>>, %arg10: memref<4x1xf32, #tpu.memory_space<vmem>>, %arg11: memref<4x36xf32, #tpu.memory_space<vmem>>, %arg12: memref<4x1xf32, #tpu.memory_space<vmem>>, %arg13: memref<4x1xf32, #tpu.memory_space<vmem>>, %arg14: memref<4x1xf32, #tpu.memory_space<vmem>>, %arg15: memref<4x4xf32, #tpu.memory_space<vmem>>, %arg16: memref<4x4xf32, #tpu.memory_space<vmem>>, %arg17: memref<4x1xf32, #tpu.memory_space<vmem>>, %arg18: memref<1x4x256xf32, #tpu.memory_space<vmem>>) attributes {dimension_semantics = [#tpu.dimension_semantics<parallel>], iteration_bounds = array<i64: 2>, scalar_prefetch = 0 : i64, scratch_operands = 0 : i64, tpu.core_type = #tpu.core_type<tc>, window_params = [{transform_indices = @transform_0, window_bounds = array<i64: 1, 4, 64>}, {transform_indices = @transform_1, window_bounds = array<i64: 1, 4, 64>}, {pipeline_mode = #tpu.pipeline_mode<synchronous>, transform_indices = @transform_2, window_bounds = array<i64: 4, 4, 8>}, {pipeline_mode = #tpu.pipeline_mode<synchronous>, transform_indices = @transform_3, window_bounds = array<i64: 4, 1>}, {pipeline_mode = #tpu.pipeline_mode<synchronous>, transform_indices = @transform_4, window_bounds = array<i64: 4, 64, 256>}, {pipeline_mode = #tpu.pipeline_mode<synchronous>, transform_indices = @transform_5, window_bounds = array<i64: 9, 256, 256>}, {pipeline_mode = #tpu.pipeline_mode<synchronous>, transform_indices = @transform_6, window_bounds = array<i64: 4, 36>}, {pipeline_mode = #tpu.pipeline_mode<synchronous>, transform_indices = @transform_7, window_bounds = array<i64: 4, 1>}, {pipeline_mode = #tpu.pipeline_mode<synchronous>, transform_indices = @transform_8, window_bounds = array<i64: 4, 1>}, {pipeline_mode = #tpu.pipeline_mode<synchronous>, transform_indices = @transform_9, window_bounds = array<i64: 4, 1>}, {pipeline_mode = #tpu.pipeline_mode<synchronous>, transform_indices = @transform_10, window_bounds = array<i64: 4, 36>}, {pipeline_mode = #tpu.pipeline_mode<synchronous>, transform_indices = @transform_11, window_bounds = array<i64: 4, 1>}, {pipeline_mode = #tpu.pipeline_mode<synchronous>, transform_indices = @transform_12, window_bounds = array<i64: 4, 1>}, {pipeline_mode = #tpu.pipeline_mode<synchronous>, transform_indices = @transform_13, window_bounds = array<i64: 4, 1>}, {pipeline_mode = #tpu.pipeline_mode<synchronous>, transform_indices = @transform_14, window_bounds = array<i64: 4, 4>}, {pipeline_mode = #tpu.pipeline_mode<synchronous>, transform_indices = @transform_15, window_bounds = array<i64: 4, 4>}, {pipeline_mode = #tpu.pipeline_mode<synchronous>, transform_indices = @transform_16, window_bounds = array<i64: 4, 1>}, {transform_indices = @transform_17, window_bounds = array<i64: 1, 4, 256>}]} {
    %c0 = arith.constant 0 : index
    %c0_0 = arith.constant 0 : index
    %c0_1 = arith.constant 0 : index
    %0 = vector.load %arg1[%c0, %c0_0, %c0_1] : memref<1x4x64xf32, #tpu.memory_space<vmem>>, vector<1x4x64xf32>
    %1 = vector.shape_cast %0 : vector<1x4x64xf32> to vector<4x64xf32>
    %c0_2 = arith.constant 0 : index
    %c0_3 = arith.constant 0 : index
    %c0_4 = arith.constant 0 : index
    %2 = vector.load %arg2[%c0_2, %c0_3, %c0_4] : memref<1x4x64xf32, #tpu.memory_space<vmem>>, vector<1x4x64xf32>
    %3 = vector.shape_cast %2 : vector<1x4x64xf32> to vector<4x64xf32>
    %4 = tpu.concatenate %1, %3 in 0 : vector<4x64xf32>, vector<4x64xf32> -> vector<8x64xf32>
    %c0_5 = arith.constant 0 : index
    %c0_6 = arith.constant 0 : index
    %5 = vector.load %arg4[%c0_5, %c0_6] : memref<4x1xf32, #tpu.memory_space<vmem>>, vector<4x1xf32>
    %c0_7 = arith.constant 0 : index
    %c0_8 = arith.constant 0 : index
    %c0_9 = arith.constant 0 : index
    %6 = vector.load %arg3[%c0_7, %c0_8, %c0_9] : memref<4x4x8xf32, #tpu.memory_space<vmem>>, vector<1x4x8xf32>
    %7 = vector.shape_cast %6 : vector<1x4x8xf32> to vector<4x8xf32>
    %cst = arith.constant dense<0.000000e+00> : vector<4x64xf32>
    %8 = tpu.matmul %7, %4, %cst {dimension_numbers = #tpu.dot_dimension_numbers<[1], [0], [0], [1], [0, 0, 1, 1], [], []>} : vector<4x8xf32>, vector<8x64xf32>, vector<4x64xf32> -> vector<4x64xf32>
    %c0_10 = arith.constant 0 : index
    %c0_11 = arith.constant 0 : index
    %c0_12 = arith.constant 0 : index
    %9 = vector.load %arg5[%c0_10, %c0_11, %c0_12] : memref<4x64x256xf32, #tpu.memory_space<vmem>>, vector<1x64x256xf32>
    %10 = vector.shape_cast %9 : vector<1x64x256xf32> to vector<64x256xf32>
    %cst_13 = arith.constant dense<0.000000e+00> : vector<4x256xf32>
    %11 = tpu.matmul %8, %10, %cst_13 {dimension_numbers = #tpu.dot_dimension_numbers<[1], [0], [0], [1], [0, 0, 1, 1], [], []>} : vector<4x64xf32>, vector<64x256xf32>, vector<4x256xf32> -> vector<4x256xf32>
    %12 = vector.broadcast %5 : vector<4x1xf32> to vector<4x256xf32>
    %13 = arith.addf %12, %11 : vector<4x256xf32>
    %c1 = arith.constant 1 : index
    %c0_14 = arith.constant 0 : index
    %c0_15 = arith.constant 0 : index
    %14 = vector.load %arg3[%c1, %c0_14, %c0_15] : memref<4x4x8xf32, #tpu.memory_space<vmem>>, vector<1x4x8xf32>
    %15 = vector.shape_cast %14 : vector<1x4x8xf32> to vector<4x8xf32>
    %cst_16 = arith.constant dense<0.000000e+00> : vector<4x64xf32>
    %16 = tpu.matmul %15, %4, %cst_16 {dimension_numbers = #tpu.dot_dimension_numbers<[1], [0], [0], [1], [0, 0, 1, 1], [], []>} : vector<4x8xf32>, vector<8x64xf32>, vector<4x64xf32> -> vector<4x64xf32>
    %c1_17 = arith.constant 1 : index
    %c0_18 = arith.constant 0 : index
    %c0_19 = arith.constant 0 : index
    %17 = vector.load %arg5[%c1_17, %c0_18, %c0_19] : memref<4x64x256xf32, #tpu.memory_space<vmem>>, vector<1x64x256xf32>
    %18 = vector.shape_cast %17 : vector<1x64x256xf32> to vector<64x256xf32>
    %cst_20 = arith.constant dense<0.000000e+00> : vector<4x256xf32>
    %19 = tpu.matmul %16, %18, %cst_20 {dimension_numbers = #tpu.dot_dimension_numbers<[1], [0], [0], [1], [0, 0, 1, 1], [], []>} : vector<4x64xf32>, vector<64x256xf32>, vector<4x256xf32> -> vector<4x256xf32>
    %20 = arith.addf %13, %19 : vector<4x256xf32>
    %c2 = arith.constant 2 : index
    %c0_21 = arith.constant 0 : index
    %c0_22 = arith.constant 0 : index
    %21 = vector.load %arg3[%c2, %c0_21, %c0_22] : memref<4x4x8xf32, #tpu.memory_space<vmem>>, vector<1x4x8xf32>
    %22 = vector.shape_cast %21 : vector<1x4x8xf32> to vector<4x8xf32>
    %cst_23 = arith.constant dense<0.000000e+00> : vector<4x64xf32>
    %23 = tpu.matmul %22, %4, %cst_23 {dimension_numbers = #tpu.dot_dimension_numbers<[1], [0], [0], [1], [0, 0, 1, 1], [], []>} : vector<4x8xf32>, vector<8x64xf32>, vector<4x64xf32> -> vector<4x64xf32>
    %c2_24 = arith.constant 2 : index
    %c0_25 = arith.constant 0 : index
    %c0_26 = arith.constant 0 : index
    %24 = vector.load %arg5[%c2_24, %c0_25, %c0_26] : memref<4x64x256xf32, #tpu.memory_space<vmem>>, vector<1x64x256xf32>
    %25 = vector.shape_cast %24 : vector<1x64x256xf32> to vector<64x256xf32>
    %cst_27 = arith.constant dense<0.000000e+00> : vector<4x256xf32>
    %26 = tpu.matmul %23, %25, %cst_27 {dimension_numbers = #tpu.dot_dimension_numbers<[1], [0], [0], [1], [0, 0, 1, 1], [], []>} : vector<4x64xf32>, vector<64x256xf32>, vector<4x256xf32> -> vector<4x256xf32>
    %27 = arith.addf %20, %26 : vector<4x256xf32>
    %c3 = arith.constant 3 : index
    %c0_28 = arith.constant 0 : index
    %c0_29 = arith.constant 0 : index
    %28 = vector.load %arg3[%c3, %c0_28, %c0_29] : memref<4x4x8xf32, #tpu.memory_space<vmem>>, vector<1x4x8xf32>
    %29 = vector.shape_cast %28 : vector<1x4x8xf32> to vector<4x8xf32>
    %cst_30 = arith.constant dense<0.000000e+00> : vector<4x64xf32>
    %30 = tpu.matmul %29, %4, %cst_30 {dimension_numbers = #tpu.dot_dimension_numbers<[1], [0], [0], [1], [0, 0, 1, 1], [], []>} : vector<4x8xf32>, vector<8x64xf32>, vector<4x64xf32> -> vector<4x64xf32>
    %c3_31 = arith.constant 3 : index
    %c0_32 = arith.constant 0 : index
    %c0_33 = arith.constant 0 : index
    %31 = vector.load %arg5[%c3_31, %c0_32, %c0_33] : memref<4x64x256xf32, #tpu.memory_space<vmem>>, vector<1x64x256xf32>
    %32 = vector.shape_cast %31 : vector<1x64x256xf32> to vector<64x256xf32>
    %cst_34 = arith.constant dense<0.000000e+00> : vector<4x256xf32>
    %33 = tpu.matmul %30, %32, %cst_34 {dimension_numbers = #tpu.dot_dimension_numbers<[1], [0], [0], [1], [0, 0, 1, 1], [], []>} : vector<4x64xf32>, vector<64x256xf32>, vector<4x256xf32> -> vector<4x256xf32>
    %34 = arith.addf %27, %33 : vector<4x256xf32>
    %c0_35 = arith.constant 0 : index
    %c0_36 = arith.constant 0 : index
    %c0_37 = arith.constant 0 : index
    %35 = vector.load %arg6[%c0_35, %c0_36, %c0_37] : memref<9x256x256xf32, #tpu.memory_space<vmem>>, vector<1x256x256xf32>
    %36 = vector.shape_cast %35 : vector<1x256x256xf32> to vector<256x256xf32>
    %cst_38 = arith.constant dense<0.000000e+00> : vector<4x256xf32>
    %37 = tpu.matmul %34, %36, %cst_38 {dimension_numbers = #tpu.dot_dimension_numbers<[1], [0], [0], [1], [0, 0, 1, 1], [], []>} : vector<4x256xf32>, vector<256x256xf32>, vector<4x256xf32> -> vector<4x256xf32>
    %c1_39 = arith.constant 1 : index
    %c0_40 = arith.constant 0 : index
    %c0_41 = arith.constant 0 : index
    %38 = vector.load %arg6[%c1_39, %c0_40, %c0_41] : memref<9x256x256xf32, #tpu.memory_space<vmem>>, vector<1x256x256xf32>
    %39 = vector.shape_cast %38 : vector<1x256x256xf32> to vector<256x256xf32>
    %cst_42 = arith.constant dense<0.000000e+00> : vector<4x256xf32>
    %40 = tpu.matmul %34, %39, %cst_42 {dimension_numbers = #tpu.dot_dimension_numbers<[1], [0], [0], [1], [0, 0, 1, 1], [], []>} : vector<4x256xf32>, vector<256x256xf32>, vector<4x256xf32> -> vector<4x256xf32>
    %c2_43 = arith.constant 2 : index
    %c0_44 = arith.constant 0 : index
    %c0_45 = arith.constant 0 : index
    %41 = vector.load %arg6[%c2_43, %c0_44, %c0_45] : memref<9x256x256xf32, #tpu.memory_space<vmem>>, vector<1x256x256xf32>
    %42 = vector.shape_cast %41 : vector<1x256x256xf32> to vector<256x256xf32>
    %cst_46 = arith.constant dense<0.000000e+00> : vector<4x256xf32>
    %43 = tpu.matmul %34, %42, %cst_46 {dimension_numbers = #tpu.dot_dimension_numbers<[1], [0], [0], [1], [0, 0, 1, 1], [], []>} : vector<4x256xf32>, vector<256x256xf32>, vector<4x256xf32> -> vector<4x256xf32>
    %c3_47 = arith.constant 3 : index
    %c0_48 = arith.constant 0 : index
    %c0_49 = arith.constant 0 : index
    %44 = vector.load %arg6[%c3_47, %c0_48, %c0_49] : memref<9x256x256xf32, #tpu.memory_space<vmem>>, vector<1x256x256xf32>
    %45 = vector.shape_cast %44 : vector<1x256x256xf32> to vector<256x256xf32>
    %cst_50 = arith.constant dense<0.000000e+00> : vector<4x256xf32>
    %46 = tpu.matmul %34, %45, %cst_50 {dimension_numbers = #tpu.dot_dimension_numbers<[1], [0], [0], [1], [0, 0, 1, 1], [], []>} : vector<4x256xf32>, vector<256x256xf32>, vector<4x256xf32> -> vector<4x256xf32>
    %c4 = arith.constant 4 : index
    %c0_51 = arith.constant 0 : index
    %c0_52 = arith.constant 0 : index
    %47 = vector.load %arg6[%c4, %c0_51, %c0_52] : memref<9x256x256xf32, #tpu.memory_space<vmem>>, vector<1x256x256xf32>
    %48 = vector.shape_cast %47 : vector<1x256x256xf32> to vector<256x256xf32>
    %cst_53 = arith.constant dense<0.000000e+00> : vector<4x256xf32>
    %49 = tpu.matmul %34, %48, %cst_53 {dimension_numbers = #tpu.dot_dimension_numbers<[1], [0], [0], [1], [0, 0, 1, 1], [], []>} : vector<4x256xf32>, vector<256x256xf32>, vector<4x256xf32> -> vector<4x256xf32>
    %c5 = arith.constant 5 : index
    %c0_54 = arith.constant 0 : index
    %c0_55 = arith.constant 0 : index
    %50 = vector.load %arg6[%c5, %c0_54, %c0_55] : memref<9x256x256xf32, #tpu.memory_space<vmem>>, vector<1x256x256xf32>
    %51 = vector.shape_cast %50 : vector<1x256x256xf32> to vector<256x256xf32>
    %cst_56 = arith.constant dense<0.000000e+00> : vector<4x256xf32>
    %52 = tpu.matmul %34, %51, %cst_56 {dimension_numbers = #tpu.dot_dimension_numbers<[1], [0], [0], [1], [0, 0, 1, 1], [], []>} : vector<4x256xf32>, vector<256x256xf32>, vector<4x256xf32> -> vector<4x256xf32>
    %c6 = arith.constant 6 : index
    %c0_57 = arith.constant 0 : index
    %c0_58 = arith.constant 0 : index
    %53 = vector.load %arg6[%c6, %c0_57, %c0_58] : memref<9x256x256xf32, #tpu.memory_space<vmem>>, vector<1x256x256xf32>
    %54 = vector.shape_cast %53 : vector<1x256x256xf32> to vector<256x256xf32>
    %cst_59 = arith.constant dense<0.000000e+00> : vector<4x256xf32>
    %55 = tpu.matmul %34, %54, %cst_59 {dimension_numbers = #tpu.dot_dimension_numbers<[1], [0], [0], [1], [0, 0, 1, 1], [], []>} : vector<4x256xf32>, vector<256x256xf32>, vector<4x256xf32> -> vector<4x256xf32>
    %c7 = arith.constant 7 : index
    %c0_60 = arith.constant 0 : index
    %c0_61 = arith.constant 0 : index
    %56 = vector.load %arg6[%c7, %c0_60, %c0_61] : memref<9x256x256xf32, #tpu.memory_space<vmem>>, vector<1x256x256xf32>
    %57 = vector.shape_cast %56 : vector<1x256x256xf32> to vector<256x256xf32>
    %cst_62 = arith.constant dense<0.000000e+00> : vector<4x256xf32>
    %58 = tpu.matmul %34, %57, %cst_62 {dimension_numbers = #tpu.dot_dimension_numbers<[1], [0], [0], [1], [0, 0, 1, 1], [], []>} : vector<4x256xf32>, vector<256x256xf32>, vector<4x256xf32> -> vector<4x256xf32>
    %c8 = arith.constant 8 : index
    %c0_63 = arith.constant 0 : index
    %c0_64 = arith.constant 0 : index
    %59 = vector.load %arg6[%c8, %c0_63, %c0_64] : memref<9x256x256xf32, #tpu.memory_space<vmem>>, vector<1x256x256xf32>
    %60 = vector.shape_cast %59 : vector<1x256x256xf32> to vector<256x256xf32>
    %cst_65 = arith.constant dense<0.000000e+00> : vector<4x256xf32>
    %61 = tpu.matmul %34, %60, %cst_65 {dimension_numbers = #tpu.dot_dimension_numbers<[1], [0], [0], [1], [0, 0, 1, 1], [], []>} : vector<4x256xf32>, vector<256x256xf32>, vector<4x256xf32> -> vector<4x256xf32>
    %62 = tpu.concatenate %37, %40, %43, %46, %49, %52, %55, %58, %61 in 0 : vector<4x256xf32>, vector<4x256xf32>, vector<4x256xf32>, vector<4x256xf32>, vector<4x256xf32>, vector<4x256xf32>, vector<4x256xf32>, vector<4x256xf32>, vector<4x256xf32> -> vector<36x256xf32>
    %c0_66 = arith.constant 0 : index
    %c0_67 = arith.constant 0 : index
    %63 = vector.load %arg7[%c0_66, %c0_67] : memref<4x36xf32, #tpu.memory_space<vmem>>, vector<4x36xf32>
    %cst_68 = arith.constant dense<0.000000e+00> : vector<4x256xf32>
    %64 = tpu.matmul %63, %62, %cst_68 {dimension_numbers = #tpu.dot_dimension_numbers<[1], [0], [0], [1], [0, 0, 1, 1], [], []>} : vector<4x36xf32>, vector<36x256xf32>, vector<4x256xf32> -> vector<4x256xf32>
    %c0_69 = arith.constant 0 : index
    %c0_70 = arith.constant 0 : index
    %65 = vector.load %arg8[%c0_69, %c0_70] : memref<4x1xf32, #tpu.memory_space<vmem>>, vector<4x1xf32>
    %66 = vector.broadcast %65 : vector<4x1xf32> to vector<4x256xf32>
    %67 = arith.addf %64, %66 : vector<4x256xf32>
    %68 = vector.extract_strided_slice %67 {offsets = [0, 0], sizes = [2, 256], strides = [1, 1]} : vector<4x256xf32> to vector<2x256xf32>
    %69 = vector.shape_cast %68 : vector<2x256xf32> to vector<1x2x256xf32>
    %cst_71 = arith.constant dense<0.000000e+00> : vector<1xf32>
    %70 = vector.multi_reduction <add>, %69, %cst_71 [1, 2] : vector<1x2x256xf32> to vector<1xf32>
    %71 = vector.shape_cast %70 : vector<1xf32> to vector<1x1x1xf32>
    %72 = vector.extract %71[0, 0, 0] : f32 from vector<1x1x1xf32>
    %73 = vector.broadcast %72 : f32 to vector<1x1xf32>
    %cst_72 = arith.constant 5.120000e+02 : f32
    %74 = vector.broadcast %cst_72 : f32 to vector<1x1xf32>
    %75 = arith.divf %73, %74 : vector<1x1xf32>
    %76 = arith.mulf %68, %68 : vector<2x256xf32>
    %77 = vector.shape_cast %76 : vector<2x256xf32> to vector<1x2x256xf32>
    %cst_73 = arith.constant dense<0.000000e+00> : vector<1xf32>
    %78 = vector.multi_reduction <add>, %77, %cst_73 [1, 2] : vector<1x2x256xf32> to vector<1xf32>
    %79 = vector.shape_cast %78 : vector<1xf32> to vector<1x1x1xf32>
    %80 = vector.extract %79[0, 0, 0] : f32 from vector<1x1x1xf32>
    %81 = vector.broadcast %80 : f32 to vector<1x1xf32>
    %cst_74 = arith.constant 5.120000e+02 : f32
    %82 = vector.broadcast %cst_74 : f32 to vector<1x1xf32>
    %83 = arith.divf %81, %82 : vector<1x1xf32>
    %84 = arith.mulf %75, %75 : vector<1x1xf32>
    %85 = arith.subf %83, %84 : vector<1x1xf32>
    %86 = vector.broadcast %75 : vector<1x1xf32> to vector<2x256xf32>
    %87 = arith.subf %68, %86 : vector<2x256xf32>
    %cst_75 = arith.constant 9.99999974E-6 : f32
    %88 = vector.broadcast %cst_75 : f32 to vector<1x1xf32>
    %89 = arith.addf %85, %88 : vector<1x1xf32>
    %90 = math.rsqrt %89 : vector<1x1xf32>
    %91 = vector.broadcast %90 : vector<1x1xf32> to vector<2x256xf32>
    %92 = arith.mulf %87, %91 : vector<2x256xf32>
    %93 = vector.extract_strided_slice %67 {offsets = [2, 0], sizes = [2, 256], strides = [1, 1]} : vector<4x256xf32> to vector<2x256xf32>
    %94 = vector.shape_cast %93 : vector<2x256xf32> to vector<1x2x256xf32>
    %cst_76 = arith.constant dense<0.000000e+00> : vector<1xf32>
    %95 = vector.multi_reduction <add>, %94, %cst_76 [1, 2] : vector<1x2x256xf32> to vector<1xf32>
    %96 = vector.shape_cast %95 : vector<1xf32> to vector<1x1x1xf32>
    %97 = vector.extract %96[0, 0, 0] : f32 from vector<1x1x1xf32>
    %98 = vector.broadcast %97 : f32 to vector<1x1xf32>
    %cst_77 = arith.constant 5.120000e+02 : f32
    %99 = vector.broadcast %cst_77 : f32 to vector<1x1xf32>
    %100 = arith.divf %98, %99 : vector<1x1xf32>
    %101 = arith.mulf %93, %93 : vector<2x256xf32>
    %102 = vector.shape_cast %101 : vector<2x256xf32> to vector<1x2x256xf32>
    %cst_78 = arith.constant dense<0.000000e+00> : vector<1xf32>
    %103 = vector.multi_reduction <add>, %102, %cst_78 [1, 2] : vector<1x2x256xf32> to vector<1xf32>
    %104 = vector.shape_cast %103 : vector<1xf32> to vector<1x1x1xf32>
    %105 = vector.extract %104[0, 0, 0] : f32 from vector<1x1x1xf32>
    %106 = vector.broadcast %105 : f32 to vector<1x1xf32>
    %cst_79 = arith.constant 5.120000e+02 : f32
    %107 = vector.broadcast %cst_79 : f32 to vector<1x1xf32>
    %108 = arith.divf %106, %107 : vector<1x1xf32>
    %109 = arith.mulf %100, %100 : vector<1x1xf32>
    %110 = arith.subf %108, %109 : vector<1x1xf32>
    %111 = vector.broadcast %100 : vector<1x1xf32> to vector<2x256xf32>
    %112 = arith.subf %93, %111 : vector<2x256xf32>
    %cst_80 = arith.constant 9.99999974E-6 : f32
    %113 = vector.broadcast %cst_80 : f32 to vector<1x1xf32>
    %114 = arith.addf %110, %113 : vector<1x1xf32>
    %115 = math.rsqrt %114 : vector<1x1xf32>
    %116 = vector.broadcast %115 : vector<1x1xf32> to vector<2x256xf32>
    %117 = arith.mulf %112, %116 : vector<2x256xf32>
    %118 = tpu.concatenate %92, %117 in 0 : vector<2x256xf32>, vector<2x256xf32> -> vector<4x256xf32>
    %c0_81 = arith.constant 0 : index
    %c0_82 = arith.constant 0 : index
    %119 = vector.load %arg9[%c0_81, %c0_82] : memref<4x1xf32, #tpu.memory_space<vmem>>, vector<4x1xf32>
    %120 = vector.broadcast %119 : vector<4x1xf32> to vector<4x256xf32>
    %121 = arith.mulf %118, %120 : vector<4x256xf32>
    %c0_83 = arith.constant 0 : index
    %c0_84 = arith.constant 0 : index
    %122 = vector.load %arg10[%c0_83, %c0_84] : memref<4x1xf32, #tpu.memory_space<vmem>>, vector<4x1xf32>
    %123 = vector.broadcast %122 : vector<4x1xf32> to vector<4x256xf32>
    %124 = arith.addf %121, %123 : vector<4x256xf32>
    %cst_85 = arith.constant 5.000000e-01 : f32
    %125 = vector.broadcast %cst_85 : f32 to vector<4x256xf32>
    %126 = arith.mulf %125, %124 : vector<4x256xf32>
    %127 = math.tanh %126 : vector<4x256xf32>
    %cst_86 = arith.constant 1.000000e+00 : f32
    %128 = vector.broadcast %cst_86 : f32 to vector<4x256xf32>
    %129 = arith.addf %127, %128 : vector<4x256xf32>
    %cst_87 = arith.constant 5.000000e-01 : f32
    %130 = vector.broadcast %cst_87 : f32 to vector<4x256xf32>
    %131 = arith.mulf %130, %129 : vector<4x256xf32>
    %132 = arith.mulf %124, %131 : vector<4x256xf32>
    %c0_88 = arith.constant 0 : index
    %c0_89 = arith.constant 0 : index
    %c0_90 = arith.constant 0 : index
    %133 = vector.load %arg6[%c0_88, %c0_89, %c0_90] : memref<9x256x256xf32, #tpu.memory_space<vmem>>, vector<1x256x256xf32>
    %134 = vector.shape_cast %133 : vector<1x256x256xf32> to vector<256x256xf32>
    %cst_91 = arith.constant dense<0.000000e+00> : vector<4x256xf32>
    %135 = tpu.matmul %132, %134, %cst_91 {dimension_numbers = #tpu.dot_dimension_numbers<[1], [0], [0], [1], [0, 0, 1, 1], [], []>} : vector<4x256xf32>, vector<256x256xf32>, vector<4x256xf32> -> vector<4x256xf32>
    %c1_92 = arith.constant 1 : index
    %c0_93 = arith.constant 0 : index
    %c0_94 = arith.constant 0 : index
    %136 = vector.load %arg6[%c1_92, %c0_93, %c0_94] : memref<9x256x256xf32, #tpu.memory_space<vmem>>, vector<1x256x256xf32>
    %137 = vector.shape_cast %136 : vector<1x256x256xf32> to vector<256x256xf32>
    %cst_95 = arith.constant dense<0.000000e+00> : vector<4x256xf32>
    %138 = tpu.matmul %132, %137, %cst_95 {dimension_numbers = #tpu.dot_dimension_numbers<[1], [0], [0], [1], [0, 0, 1, 1], [], []>} : vector<4x256xf32>, vector<256x256xf32>, vector<4x256xf32> -> vector<4x256xf32>
    %c2_96 = arith.constant 2 : index
    %c0_97 = arith.constant 0 : index
    %c0_98 = arith.constant 0 : index
    %139 = vector.load %arg6[%c2_96, %c0_97, %c0_98] : memref<9x256x256xf32, #tpu.memory_space<vmem>>, vector<1x256x256xf32>
    %140 = vector.shape_cast %139 : vector<1x256x256xf32> to vector<256x256xf32>
    %cst_99 = arith.constant dense<0.000000e+00> : vector<4x256xf32>
    %141 = tpu.matmul %132, %140, %cst_99 {dimension_numbers = #tpu.dot_dimension_numbers<[1], [0], [0], [1], [0, 0, 1, 1], [], []>} : vector<4x256xf32>, vector<256x256xf32>, vector<4x256xf32> -> vector<4x256xf32>
    %c3_100 = arith.constant 3 : index
    %c0_101 = arith.constant 0 : index
    %c0_102 = arith.constant 0 : index
    %142 = vector.load %arg6[%c3_100, %c0_101, %c0_102] : memref<9x256x256xf32, #tpu.memory_space<vmem>>, vector<1x256x256xf32>
    %143 = vector.shape_cast %142 : vector<1x256x256xf32> to vector<256x256xf32>
    %cst_103 = arith.constant dense<0.000000e+00> : vector<4x256xf32>
    %144 = tpu.matmul %132, %143, %cst_103 {dimension_numbers = #tpu.dot_dimension_numbers<[1], [0], [0], [1], [0, 0, 1, 1], [], []>} : vector<4x256xf32>, vector<256x256xf32>, vector<4x256xf32> -> vector<4x256xf32>
    %c4_104 = arith.constant 4 : index
    %c0_105 = arith.constant 0 : index
    %c0_106 = arith.constant 0 : index
    %145 = vector.load %arg6[%c4_104, %c0_105, %c0_106] : memref<9x256x256xf32, #tpu.memory_space<vmem>>, vector<1x256x256xf32>
    %146 = vector.shape_cast %145 : vector<1x256x256xf32> to vector<256x256xf32>
    %cst_107 = arith.constant dense<0.000000e+00> : vector<4x256xf32>
    %147 = tpu.matmul %132, %146, %cst_107 {dimension_numbers = #tpu.dot_dimension_numbers<[1], [0], [0], [1], [0, 0, 1, 1], [], []>} : vector<4x256xf32>, vector<256x256xf32>, vector<4x256xf32> -> vector<4x256xf32>
    %c5_108 = arith.constant 5 : index
    %c0_109 = arith.constant 0 : index
    %c0_110 = arith.constant 0 : index
    %148 = vector.load %arg6[%c5_108, %c0_109, %c0_110] : memref<9x256x256xf32, #tpu.memory_space<vmem>>, vector<1x256x256xf32>
    %149 = vector.shape_cast %148 : vector<1x256x256xf32> to vector<256x256xf32>
    %cst_111 = arith.constant dense<0.000000e+00> : vector<4x256xf32>
    %150 = tpu.matmul %132, %149, %cst_111 {dimension_numbers = #tpu.dot_dimension_numbers<[1], [0], [0], [1], [0, 0, 1, 1], [], []>} : vector<4x256xf32>, vector<256x256xf32>, vector<4x256xf32> -> vector<4x256xf32>
    %c6_112 = arith.constant 6 : index
    %c0_113 = arith.constant 0 : index
    %c0_114 = arith.constant 0 : index
    %151 = vector.load %arg6[%c6_112, %c0_113, %c0_114] : memref<9x256x256xf32, #tpu.memory_space<vmem>>, vector<1x256x256xf32>
    %152 = vector.shape_cast %151 : vector<1x256x256xf32> to vector<256x256xf32>
    %cst_115 = arith.constant dense<0.000000e+00> : vector<4x256xf32>
    %153 = tpu.matmul %132, %152, %cst_115 {dimension_numbers = #tpu.dot_dimension_numbers<[1], [0], [0], [1], [0, 0, 1, 1], [], []>} : vector<4x256xf32>, vector<256x256xf32>, vector<4x256xf32> -> vector<4x256xf32>
    %c7_116 = arith.constant 7 : index
    %c0_117 = arith.constant 0 : index
    %c0_118 = arith.constant 0 : index
    %154 = vector.load %arg6[%c7_116, %c0_117, %c0_118] : memref<9x256x256xf32, #tpu.memory_space<vmem>>, vector<1x256x256xf32>
    %155 = vector.shape_cast %154 : vector<1x256x256xf32> to vector<256x256xf32>
    %cst_119 = arith.constant dense<0.000000e+00> : vector<4x256xf32>
    %156 = tpu.matmul %132, %155, %cst_119 {dimension_numbers = #tpu.dot_dimension_numbers<[1], [0], [0], [1], [0, 0, 1, 1], [], []>} : vector<4x256xf32>, vector<256x256xf32>, vector<4x256xf32> -> vector<4x256xf32>
    %c8_120 = arith.constant 8 : index
    %c0_121 = arith.constant 0 : index
    %c0_122 = arith.constant 0 : index
    %157 = vector.load %arg6[%c8_120, %c0_121, %c0_122] : memref<9x256x256xf32, #tpu.memory_space<vmem>>, vector<1x256x256xf32>
    %158 = vector.shape_cast %157 : vector<1x256x256xf32> to vector<256x256xf32>
    %cst_123 = arith.constant dense<0.000000e+00> : vector<4x256xf32>
    %159 = tpu.matmul %132, %158, %cst_123 {dimension_numbers = #tpu.dot_dimension_numbers<[1], [0], [0], [1], [0, 0, 1, 1], [], []>} : vector<4x256xf32>, vector<256x256xf32>, vector<4x256xf32> -> vector<4x256xf32>
    %160 = tpu.concatenate %135, %138, %141, %144, %147, %150, %153, %156, %159 in 0 : vector<4x256xf32>, vector<4x256xf32>, vector<4x256xf32>, vector<4x256xf32>, vector<4x256xf32>, vector<4x256xf32>, vector<4x256xf32>, vector<4x256xf32>, vector<4x256xf32> -> vector<36x256xf32>
    %c0_124 = arith.constant 0 : index
    %c0_125 = arith.constant 0 : index
    %161 = vector.load %arg11[%c0_124, %c0_125] : memref<4x36xf32, #tpu.memory_space<vmem>>, vector<4x36xf32>
    %cst_126 = arith.constant dense<0.000000e+00> : vector<4x256xf32>
    %162 = tpu.matmul %161, %160, %cst_126 {dimension_numbers = #tpu.dot_dimension_numbers<[1], [0], [0], [1], [0, 0, 1, 1], [], []>} : vector<4x36xf32>, vector<36x256xf32>, vector<4x256xf32> -> vector<4x256xf32>
    %c0_127 = arith.constant 0 : index
    %c0_128 = arith.constant 0 : index
    %163 = vector.load %arg12[%c0_127, %c0_128] : memref<4x1xf32, #tpu.memory_space<vmem>>, vector<4x1xf32>
    %164 = vector.broadcast %163 : vector<4x1xf32> to vector<4x256xf32>
    %165 = arith.addf %162, %164 : vector<4x256xf32>
    %166 = vector.extract_strided_slice %165 {offsets = [0, 0], sizes = [2, 256], strides = [1, 1]} : vector<4x256xf32> to vector<2x256xf32>
    %167 = vector.shape_cast %166 : vector<2x256xf32> to vector<1x2x256xf32>
    %cst_129 = arith.constant dense<0.000000e+00> : vector<1xf32>
    %168 = vector.multi_reduction <add>, %167, %cst_129 [1, 2] : vector<1x2x256xf32> to vector<1xf32>
    %169 = vector.shape_cast %168 : vector<1xf32> to vector<1x1x1xf32>
    %170 = vector.extract %169[0, 0, 0] : f32 from vector<1x1x1xf32>
    %171 = vector.broadcast %170 : f32 to vector<1x1xf32>
    %cst_130 = arith.constant 5.120000e+02 : f32
    %172 = vector.broadcast %cst_130 : f32 to vector<1x1xf32>
    %173 = arith.divf %171, %172 : vector<1x1xf32>
    %174 = arith.mulf %166, %166 : vector<2x256xf32>
    %175 = vector.shape_cast %174 : vector<2x256xf32> to vector<1x2x256xf32>
    %cst_131 = arith.constant dense<0.000000e+00> : vector<1xf32>
    %176 = vector.multi_reduction <add>, %175, %cst_131 [1, 2] : vector<1x2x256xf32> to vector<1xf32>
    %177 = vector.shape_cast %176 : vector<1xf32> to vector<1x1x1xf32>
    %178 = vector.extract %177[0, 0, 0] : f32 from vector<1x1x1xf32>
    %179 = vector.broadcast %178 : f32 to vector<1x1xf32>
    %cst_132 = arith.constant 5.120000e+02 : f32
    %180 = vector.broadcast %cst_132 : f32 to vector<1x1xf32>
    %181 = arith.divf %179, %180 : vector<1x1xf32>
    %182 = arith.mulf %173, %173 : vector<1x1xf32>
    %183 = arith.subf %181, %182 : vector<1x1xf32>
    %184 = vector.broadcast %173 : vector<1x1xf32> to vector<2x256xf32>
    %185 = arith.subf %166, %184 : vector<2x256xf32>
    %cst_133 = arith.constant 9.99999974E-6 : f32
    %186 = vector.broadcast %cst_133 : f32 to vector<1x1xf32>
    %187 = arith.addf %183, %186 : vector<1x1xf32>
    %188 = math.rsqrt %187 : vector<1x1xf32>
    %189 = vector.broadcast %188 : vector<1x1xf32> to vector<2x256xf32>
    %190 = arith.mulf %185, %189 : vector<2x256xf32>
    %191 = vector.extract_strided_slice %165 {offsets = [2, 0], sizes = [2, 256], strides = [1, 1]} : vector<4x256xf32> to vector<2x256xf32>
    %192 = vector.shape_cast %191 : vector<2x256xf32> to vector<1x2x256xf32>
    %cst_134 = arith.constant dense<0.000000e+00> : vector<1xf32>
    %193 = vector.multi_reduction <add>, %192, %cst_134 [1, 2] : vector<1x2x256xf32> to vector<1xf32>
    %194 = vector.shape_cast %193 : vector<1xf32> to vector<1x1x1xf32>
    %195 = vector.extract %194[0, 0, 0] : f32 from vector<1x1x1xf32>
    %196 = vector.broadcast %195 : f32 to vector<1x1xf32>
    %cst_135 = arith.constant 5.120000e+02 : f32
    %197 = vector.broadcast %cst_135 : f32 to vector<1x1xf32>
    %198 = arith.divf %196, %197 : vector<1x1xf32>
    %199 = arith.mulf %191, %191 : vector<2x256xf32>
    %200 = vector.shape_cast %199 : vector<2x256xf32> to vector<1x2x256xf32>
    %cst_136 = arith.constant dense<0.000000e+00> : vector<1xf32>
    %201 = vector.multi_reduction <add>, %200, %cst_136 [1, 2] : vector<1x2x256xf32> to vector<1xf32>
    %202 = vector.shape_cast %201 : vector<1xf32> to vector<1x1x1xf32>
    %203 = vector.extract %202[0, 0, 0] : f32 from vector<1x1x1xf32>
    %204 = vector.broadcast %203 : f32 to vector<1x1xf32>
    %cst_137 = arith.constant 5.120000e+02 : f32
    %205 = vector.broadcast %cst_137 : f32 to vector<1x1xf32>
    %206 = arith.divf %204, %205 : vector<1x1xf32>
    %207 = arith.mulf %198, %198 : vector<1x1xf32>
    %208 = arith.subf %206, %207 : vector<1x1xf32>
    %209 = vector.broadcast %198 : vector<1x1xf32> to vector<2x256xf32>
    %210 = arith.subf %191, %209 : vector<2x256xf32>
    %cst_138 = arith.constant 9.99999974E-6 : f32
    %211 = vector.broadcast %cst_138 : f32 to vector<1x1xf32>
    %212 = arith.addf %208, %211 : vector<1x1xf32>
    %213 = math.rsqrt %212 : vector<1x1xf32>
    %214 = vector.broadcast %213 : vector<1x1xf32> to vector<2x256xf32>
    %215 = arith.mulf %210, %214 : vector<2x256xf32>
    %216 = tpu.concatenate %190, %215 in 0 : vector<2x256xf32>, vector<2x256xf32> -> vector<4x256xf32>
    %c0_139 = arith.constant 0 : index
    %c0_140 = arith.constant 0 : index
    %217 = vector.load %arg13[%c0_139, %c0_140] : memref<4x1xf32, #tpu.memory_space<vmem>>, vector<4x1xf32>
    %218 = vector.broadcast %217 : vector<4x1xf32> to vector<4x256xf32>
    %219 = arith.mulf %216, %218 : vector<4x256xf32>
    %c0_141 = arith.constant 0 : index
    %c0_142 = arith.constant 0 : index
    %220 = vector.load %arg14[%c0_141, %c0_142] : memref<4x1xf32, #tpu.memory_space<vmem>>, vector<4x1xf32>
    %221 = vector.broadcast %220 : vector<4x1xf32> to vector<4x256xf32>
    %222 = arith.addf %219, %221 : vector<4x256xf32>
    %cst_143 = arith.constant 5.000000e-01 : f32
    %223 = vector.broadcast %cst_143 : f32 to vector<4x256xf32>
    %224 = arith.mulf %223, %222 : vector<4x256xf32>
    %225 = math.tanh %224 : vector<4x256xf32>
    %cst_144 = arith.constant 1.000000e+00 : f32
    %226 = vector.broadcast %cst_144 : f32 to vector<4x256xf32>
    %227 = arith.addf %225, %226 : vector<4x256xf32>
    %cst_145 = arith.constant 5.000000e-01 : f32
    %228 = vector.broadcast %cst_145 : f32 to vector<4x256xf32>
    %229 = arith.mulf %228, %227 : vector<4x256xf32>
    %230 = arith.mulf %222, %229 : vector<4x256xf32>
    %c0_146 = arith.constant 0 : index
    %c0_147 = arith.constant 0 : index
    %231 = vector.load %arg15[%c0_146, %c0_147] : memref<4x4xf32, #tpu.memory_space<vmem>>, vector<4x4xf32>
    %cst_148 = arith.constant dense<0.000000e+00> : vector<4x256xf32>
    %232 = tpu.matmul %231, %34, %cst_148 {dimension_numbers = #tpu.dot_dimension_numbers<[1], [0], [0], [1], [0, 0, 1, 1], [], []>} : vector<4x4xf32>, vector<4x256xf32>, vector<4x256xf32> -> vector<4x256xf32>
    %c0_149 = arith.constant 0 : index
    %c0_150 = arith.constant 0 : index
    %233 = vector.load %arg16[%c0_149, %c0_150] : memref<4x4xf32, #tpu.memory_space<vmem>>, vector<4x4xf32>
    %cst_151 = arith.constant dense<0.000000e+00> : vector<4x256xf32>
    %234 = tpu.matmul %233, %230, %cst_151 {dimension_numbers = #tpu.dot_dimension_numbers<[1], [0], [0], [1], [0, 0, 1, 1], [], []>} : vector<4x4xf32>, vector<4x256xf32>, vector<4x256xf32> -> vector<4x256xf32>
    %235 = arith.addf %232, %234 : vector<4x256xf32>
    %c0_152 = arith.constant 0 : index
    %c0_153 = arith.constant 0 : index
    %236 = vector.load %arg17[%c0_152, %c0_153] : memref<4x1xf32, #tpu.memory_space<vmem>>, vector<4x1xf32>
    %237 = vector.broadcast %236 : vector<4x1xf32> to vector<4x256xf32>
    %238 = arith.addf %235, %237 : vector<4x256xf32>
    %c0_154 = arith.constant 0 : index
    %c0_155 = arith.constant 0 : index
    %c0_156 = arith.constant 0 : index
    %239 = vector.load %arg18[%c0_154, %c0_155, %c0_156] : memref<1x4x256xf32, #tpu.memory_space<vmem>>, vector<1x4x256xf32>
    %240 = vector.shape_cast %239 : vector<1x4x256xf32> to vector<4x256xf32>
    %241 = vector.shape_cast %238 : vector<4x256xf32> to vector<1x4x256xf32>
    tpu.vector_store %arg18[%c0_154, %c0_155, %c0_156], %241 {strides = array<i32>} : memref<1x4x256xf32, #tpu.memory_space<vmem>>, vector<1x4x256xf32>,
    return
  }
  func.func @transform_0(%arg0: i32) -> (i32, i32, i32) {
    %c0_i32 = arith.constant 0 : i32
    %c0_i32_0 = arith.constant 0 : i32
    %c0_i32_1 = arith.constant 0 : i32
    return %arg0, %c0_i32, %c0_i32_0 : i32, i32, i32
  }
  func.func @transform_1(%arg0: i32) -> (i32, i32, i32) {
    %c0_i32 = arith.constant 0 : i32
    %c0_i32_0 = arith.constant 0 : i32
    %c0_i32_1 = arith.constant 0 : i32
    return %arg0, %c0_i32, %c0_i32_0 : i32, i32, i32
  }
  func.func @transform_2(%arg0: i32) -> (i32, i32, i32) {
    %c0_i32 = arith.constant 0 : i32
    %c0_i32_0 = arith.constant 0 : i32
    %c0_i32_1 = arith.constant 0 : i32
    %c0_i32_2 = arith.constant 0 : i32
    return %c0_i32, %c0_i32_0, %c0_i32_1 : i32, i32, i32
  }
  func.func @transform_3(%arg0: i32) -> (i32, i32) {
    %c0_i32 = arith.constant 0 : i32
    %c0_i32_0 = arith.constant 0 : i32
    %c0_i32_1 = arith.constant 0 : i32
    return %c0_i32, %c0_i32_0 : i32, i32
  }
  func.func @transform_4(%arg0: i32) -> (i32, i32, i32) {
    %c0_i32 = arith.constant 0 : i32
    %c0_i32_0 = arith.constant 0 : i32
    %c0_i32_1 = arith.constant 0 : i32
    %c0_i32_2 = arith.constant 0 : i32
    return %c0_i32, %c0_i32_0, %c0_i32_1 : i32, i32, i32
  }
  func.func @transform_5(%arg0: i32) -> (i32, i32, i32) {
    %c0_i32 = arith.constant 0 : i32
    %c0_i32_0 = arith.constant 0 : i32
    %c0_i32_1 = arith.constant 0 : i32
    %c0_i32_2 = arith.constant 0 : i32
    return %c0_i32, %c0_i32_0, %c0_i32_1 : i32, i32, i32
  }
  func.func @transform_6(%arg0: i32) -> (i32, i32) {
    %c0_i32 = arith.constant 0 : i32
    %c0_i32_0 = arith.constant 0 : i32
    %c0_i32_1 = arith.constant 0 : i32
    return %c0_i32, %c0_i32_0 : i32, i32
  }
  func.func @transform_7(%arg0: i32) -> (i32, i32) {
    %c0_i32 = arith.constant 0 : i32
    %c0_i32_0 = arith.constant 0 : i32
    %c0_i32_1 = arith.constant 0 : i32
    return %c0_i32, %c0_i32_0 : i32, i32
  }
  func.func @transform_8(%arg0: i32) -> (i32, i32) {
    %c0_i32 = arith.constant 0 : i32
    %c0_i32_0 = arith.constant 0 : i32
    %c0_i32_1 = arith.constant 0 : i32
    return %c0_i32, %c0_i32_0 : i32, i32
  }
  func.func @transform_9(%arg0: i32) -> (i32, i32) {
    %c0_i32 = arith.constant 0 : i32
    %c0_i32_0 = arith.constant 0 : i32
    %c0_i32_1 = arith.constant 0 : i32
    return %c0_i32, %c0_i32_0 : i32, i32
  }
  func.func @transform_10(%arg0: i32) -> (i32, i32) {
    %c0_i32 = arith.constant 0 : i32
    %c0_i32_0 = arith.constant 0 : i32
    %c0_i32_1 = arith.constant 0 : i32
    return %c0_i32, %c0_i32_0 : i32, i32
  }
  func.func @transform_11(%arg0: i32) -> (i32, i32) {
    %c0_i32 = arith.constant 0 : i32
    %c0_i32_0 = arith.constant 0 : i32
    %c0_i32_1 = arith.constant 0 : i32
    return %c0_i32, %c0_i32_0 : i32, i32
  }
  func.func @transform_12(%arg0: i32) -> (i32, i32) {
    %c0_i32 = arith.constant 0 : i32
    %c0_i32_0 = arith.constant 0 : i32
    %c0_i32_1 = arith.constant 0 : i32
    return %c0_i32, %c0_i32_0 : i32, i32
  }
  func.func @transform_13(%arg0: i32) -> (i32, i32) {
    %c0_i32 = arith.constant 0 : i32
    %c0_i32_0 = arith.constant 0 : i32
    %c0_i32_1 = arith.constant 0 : i32
    return %c0_i32, %c0_i32_0 : i32, i32
  }
  func.func @transform_14(%arg0: i32) -> (i32, i32) {
    %c0_i32 = arith.constant 0 : i32
    %c0_i32_0 = arith.constant 0 : i32
    %c0_i32_1 = arith.constant 0 : i32
    return %c0_i32, %c0_i32_0 : i32, i32
  }
  func.func @transform_15(%arg0: i32) -> (i32, i32) {
    %c0_i32 = arith.constant 0 : i32
    %c0_i32_0 = arith.constant 0 : i32
    %c0_i32_1 = arith.constant 0 : i32
    return %c0_i32, %c0_i32_0 : i32, i32
  }
  func.func @transform_16(%arg0: i32) -> (i32, i32) {
    %c0_i32 = arith.constant 0 : i32
    %c0_i32_0 = arith.constant 0 : i32
    %c0_i32_1 = arith.constant 0 : i32
    return %c0_i32, %c0_i32_0 : i32, i32
  }
  func.func @transform_17(%arg0: i32) -> (i32, i32, i32) {
    %c0_i32 = arith.constant 0 : i32
    %c0_i32_0 = arith.constant 0 : i32
    %c0_i32_1 = arith.constant 0 : i32
    return %arg0, %c0_i32, %c0_i32_0 : i32, i32, i32
  }
}

</mosaic_0001>

<bundles_post_ra>
// kernel: upblock_forward.1
= control target key start
LH: loop header
LB: loop body
LE: loop exit
PB: predicated region body
PF: predicated region fallthrough
CT: control target
= control target key end

     0   :  { %s6891_s0 = inlined_call_operand.vmem [shape: f32[2,4,64], index: 0, kind: input, shape index: {}]   ;;  %s6892_s1 = inlined_call_operand.vmem [shape: f32[2,4,64], index: 1, kind: input, shape index: {}]   ;;  %s6893_s2 = inlined_call_operand.vmem [shape: f32[4,4,8], index: 2, kind: input, shape index: {}]   ;;  %s6894_s3 = inlined_call_operand.vmem [shape: f32[4,1], index: 3, kind: input, shape index: {}]   ;;  %s6895_s4 = inlined_call_operand.hbm [shape: f32[4,64,256], index: 4, kind: input, shape index: {}]   ;;  %s6896_s5 = inlined_call_operand.hbm [shape: f32[9,256,256], index: 5, kind: input, shape index: {}]   ;;  %s6897_s6 = inlined_call_operand.vmem [shape: f32[4,36], index: 6, kind: input, shape index: {}]   ;;  %s6898_s7 = inlined_call_operand.vmem [shape: f32[4,1], index: 7, kind: input, shape index: {}]   ;;  %s6899_s8 = inlined_call_operand.vmem [shape: f32[4,1], index: 8, kind: input, shape index: {}]   ;;  %s6900_s9 = inlined_call_operand.vmem [shape: f32[4,1], index: 9, kind: input, shape index: {}]   ;;  %s6901_s10 = inlined_call_operand.vmem [shape: f32[4,36], index: 10, kind: input, shape index: {}]   ;;  %s6902_s11 = inlined_call_operand.vmem [shape: f32[4,1], index: 11, kind: input, shape index: {}]   ;;  %s6903_s12 = inlined_call_operand.vmem [shape: f32[4,1], index: 12, kind: input, shape index: {}]   ;;  %s6904_s13 = inlined_call_operand.vmem [shape: f32[4,1], index: 13, kind: input, shape index: {}]   ;;  %s6905_s14 = inlined_call_operand.vmem [shape: f32[4,4], index: 14, kind: input, shape index: {}]   ;;  %s6906_s15 = inlined_call_operand.vmem [shape: f32[4,4], index: 15, kind: input, shape index: {}]   ;;  %s6907_s16 = inlined_call_operand.vmem [shape: f32[4,1], index: 16, kind: input, shape index: {}]   ;;  %s6908_s17 = inlined_call_operand.vmem [shape: f32[2,4,256], index: 17, kind: output, shape index: {}]  }
   0x1   :  { %7151 = sst [smem:[#allocation246_spill]] %s6891_s0 }
   0x2   :  { %7152 = sst [smem:[#allocation247_spill]] %s6892_s1 }
   0x3   :  { %7153 = sst [smem:[#allocation248_spill]] %s6908_s17 }
   0x4   :  { %22 = vsyncpa [#allocation3], 0 }
   0x5   :  { %23 = vsyncpa [#allocation5], 0  ;;  %s5420_s24 = smov 0  }
   0x6 LB: > { %7154 = sst [smem:[#allocation8_spill]] %s5321_s24  ;;  %s5426_s25 = sadd.s32 4294967295, %s5321_s24   ;;  %s5321_s24 = sphi %s5420_s24, %s29_s24  }
   0x7   : > { %p3876_p0 = scmp.ge.s32.totalorder %s5321_s24, 1  ;;  %p427_p1 = scmp.lt.s32.totalorder %s5321_s24, 3 }
   0x8   : > { %s5323_s26 = smov [#allocation2]   ;;  %p6909_p3 = scmp.eq.s32.totalorder %s5426_s25, 0 }
   0x9   : > { %s445_s27 = sshll.u32 %s5323_s26, 4  ;;  %p5430_p2 = pnand %p3876_p0, %p427_p1  ;;  %s446_s27 = int_to_ptr.vmem [resolvable:$true] %s445_s27 }
   0xa   : > { %s5324_s29 = smov [#allocation4]   ;;  %s5251_s1 = scalar_lea.hbm %s6895_s4, 8192 }
   0xb   : > { %s7155_s28 = scalar_select %p5430_p2, 1, 0 }
   0xc   : > { %p5207_p4 = pneg %p5430_p2  ;;  %s458_s0 = sshll.u32 %s5324_s29, 4  ;;  %s5443_s0 = int_to_ptr.vmem [resolvable:$true] %s458_s0 }
   0xd   : > { %p5252_p6 = scmp.ne.s32.totalorder %s6895_s4, %s5251_s1  ;;  %p5258_p10 = scmp.lt.u32.totalorder %s5251_s1, %s6895_s4 }
   0xe   : > { %p5439_p5 = pnand %p6909_p3, %p5207_p4 }
  0x10   : > { %p5253_p7 = pneg %p5439_p5 }
  0x12   : > { %p5254_p8 = pnand %p5253_p7, %p5252_p6 }
  0x14   : > { %p5255_p9 = pneg %p5254_p8 }
  0x16   : > { %p5260_p11 = pnand %p5258_p10, %p5255_p9 }
  0x18   : > { %5263 = shalt.err (!%p5260_p11)
}
  0x19   : > { %s5264_s26 = scalar_lea.vmem %s446_s27, 8192  ;;  %p5272_p1 = scmp.lt.s32.totalorder %s446_s27, %s446_s27 }
  0x1a   : > { %p5265_p12 = scmp.ne.s32.totalorder %s446_s27, %s5264_s26  ;;  %p5273_p4 = scmp.lt.s32.totalorder %s5264_s26, %s5264_s26 }
  0x1c   : > { %p5267_p13 = pnand %p5265_p12, %p5253_p7  ;;  %p5274_p3 = por %p5273_p4, %p5272_p1 }
  0x1e   : > { %p5268_p0 = pneg %p5267_p13 }
  0x20   : > { %p5275_p2 = pnand %p5274_p3, %p5268_p0 }
  0x22   : > { %5278 = shalt.err (!%p5275_p2)
}
  0x23   : > { %s5325_s29 = smov 256   ;;  %s5326_s18 = smov 16  }
  0x24   : > { %5210 = dma.hbm_to_vmem [thread:$0]  (!%p5439_p5), %s6895_s4, 8192, %s446_s27, [#allocation3], %s5325_s29, %s5325_s29, %s5326_s18  }
  0x25   : > { %s5279_s22 = scalar_lea.hbm %s6896_s5, 73728 }
  0x26   : > { %p5280_p6 = scmp.ne.s32.totalorder %s6896_s5, %s5279_s22  ;;  %p5286_p8 = scmp.lt.u32.totalorder %s5279_s22, %s6896_s5 }
  0x28   : > { %p5282_p2 = pnand %p5280_p6, %p5253_p7 }
  0x2a   : > { %p5283_p3 = pneg %p5282_p2 }
  0x2c   : > { %p5288_p9 = pnand %p5286_p8, %p5283_p3 }
  0x2e   : > { %5291 = shalt.err (!%p5288_p9)
}
  0x2f   : > { %s5292_s27 = scalar_lea.vmem %s5443_s0, 73728  ;;  %p5300_p13 = scmp.lt.s32.totalorder %s5443_s0, %s5443_s0 }
  0x30   : > { %p5293_p10 = scmp.ne.s32.totalorder %s5443_s0, %s5292_s27  ;;  %p5301_p0 = scmp.lt.s32.totalorder %s5292_s27, %s5292_s27 }
  0x32   : > { %p5295_p11 = pnand %p5293_p10, %p5253_p7  ;;  %p5302_p1 = por %p5301_p0, %p5300_p13 }
  0x34   : > { %p5296_p12 = pneg %p5295_p11 }
  0x36   : > { %p5303_p4 = pnand %p5302_p1, %p5296_p12 }
  0x38   : > { %5306 = shalt.err (!%p5303_p4)
}
  0x39   : > { %5213 = dma.hbm_to_vmem [thread:$0]  (!%p5439_p5), %s6896_s5, 73728, %s5443_s0, [#allocation5], %s5325_s29, %s5325_s29, %s5326_s18  }
  0x3a   : > { %p7157_p6 = scmp.ne.s32.totalorder %s7155_s28, 0 }
  0x3c   : > { %521 = sbr.rel (%p7157_p6) target bundleno = 2884 (0xb44), region = 88 }
  0x43   : > { %p7158_p2 = scmp.eq.s32.totalorder %s5426_s25, 0 }
  0x45   : > { %5312 = dma.done.wait (%p7158_p2), [#allocation3], 8192   ;;  %p7159_p7 = pmov %p7158_p2 }
  0x46   : > { %p7160_p3 = pmov %p7158_p2 }
  0x47   : > { %5314 = vsyncadd (%p7159_p7), [#allocation3], 4294959104 }
  0x48   : > { %5316 = dma.done.wait (%p7160_p3), [#allocation5], 73728   ;;  %p7161_p8 = pmov %p7158_p2 }
  0x49   : > { %p580_p9 = scmp.lt.s32.totalorder %s5426_s25, 1  ;;  %v6912_v0 = vmov 0.0   ;;  %vm5328_vm0 = vmmov 0   ;;  %s7162_s29 = sld [smem:[#allocation246_spill]]  ;;  %vm598_vm1 = vcmask 1043456   ;;  %v677_v5 = vld [vmem:[#allocation2 + $0x8] sm:$0xff] }
  0x4a   : > { %5318 = vsyncadd (%p7161_p8), [#allocation5], 4294893568  ;;  %3921 = vmatprep.subr.mxu0 %v6912_v0  ;;  %3923 = vmatprep.mubr.msk.f32.mxu0 %vm5328_vm0, %v6912_v0  ;;  %s7163_s20 = sld [smem:[#allocation247_spill]]  ;;  %v601_v3 = vld [vmem:[%s6893_s2] sm:$0xf]  ;;  %v679_v6 = vld [vmem:[#allocation2 + $0x18] sm:$0xff] }
  0x4b   : > { %s7643_s25 = smov (!%p580_p9, %s5426_s25), 1  ;;  %933 = vmatprep.mubr.f32.mxu1 %v6912_v0  ;;  %v676_v7 = vld [vmem:[#allocation2] sm:$0xff]  ;;  %vm602_vm2 = vcmask 64512   ;;  %v3941_v8 = vpack.c.bf16 %v679_v6, %v677_v5  ;;  %v678_v9 = vld [vmem:[#allocation2 + $0x10] sm:$0xff]  ;;  %v681_v10 = vld [vmem:[#allocation2 + $0x28] sm:$0xff]  ;;  %v5329_v33 = vmov 0  }
  0x4c   : > { %s3883_s28 = sshll.u32 %s7643_s25, 2  ;;  %v683_v11 = vld [vmem:[#allocation2 + $0x38] sm:$0xff]  ;;  %v3943_v13 = vpack.c.bf16 %v678_v9, %v676_v7  ;;  %v680_v15 = vld [vmem:[#allocation2 + $0x20] sm:$0xff]  ;;  %v682_v16 = vld [vmem:[#allocation2 + $0x30] sm:$0xff]  ;;  %5233 = vset.pattern.permute.xlu0 %v5329_v33  ;;  %5234 = vset.pattern.permute.xlu1 %v5329_v33  ;;  %vm692_vm3 = vcmask 523264   ;;  %vm2540_vm4 = vcmask 293888  }
  0x4d   : > { %v3945_v14 = vpack.c.bf16 %v683_v11, %v681_v10  ;;  %v685_v17 = vld [vmem:[#allocation2 + $0x48] sm:$0xff]  ;;  %v687_v18 = vld [vmem:[#allocation2 + $0x58] sm:$0xff]  ;;  %v3947_v19 = vpack.c.bf16 %v682_v16, %v680_v15  ;;  %v684_v21 = vld [vmem:[#allocation2 + $0x40] sm:$0xff]  ;;  %vm2621_vm5 = vcmask 1041408   ;;  %vm3611_vm6 = vcmask 31744  }
  0x4e   : > { %v3949_v20 = vpack.c.bf16 %v687_v18, %v685_v17  ;;  %v686_v22 = vld [vmem:[#allocation2 + $0x50] sm:$0xff]  ;;  %v689_v23 = vld [vmem:[#allocation2 + $0x68] sm:$0xff]  ;;  %v691_v24 = vld [vmem:[#allocation2 + $0x78] sm:$0xff] }
  0x4f   : > { %s583_s18 = scalar_lea.vmem %s7162_s29, %s3883_s28  ;;  %v3951_v25 = vpack.c.bf16 %v686_v22, %v684_v21  ;;  %v3953_v26 = vpack.c.bf16 %v691_v24, %v689_v23  ;;  %v688_v27 = vld [vmem:[#allocation2 + $0x60] sm:$0xff]  ;;  %v690_v28 = vld [vmem:[#allocation2 + $0x70] sm:$0xff]  ;;  %v851_v31 = vld [vmem:[#allocation2 + $0x88] sm:$0xff] }
  0x50   : > { %s587_s21 = scalar_lea.vmem %s7163_s20, %s3883_s28  ;;  %v593_v1 = vld [vmem:[%s583_s18] sm:$0xf]  ;;  %v3955_v29 = vpack.c.bf16 %v690_v28, %v688_v27  ;;  %v853_v32 = vld [vmem:[#allocation2 + $0x98] sm:$0xff]  ;;  %v852_v36 = vld [vmem:[#allocation2 + $0x90] sm:$0xff]  ;;  %s3912_s18 = sshll.u32 %s7643_s25, 3 }
  0x51   : > { %v594_v2 = vld [vmem:[%s587_s21] sm:$0xf]  ;;  %v3957_v34 = vpack.c.bf16 %v853_v32, %v851_v31  ;;  %v855_v37 = vld [vmem:[#allocation2 + $0xa8] sm:$0xff]  ;;  %v857_v39 = vld [vmem:[#allocation2 + $0xb8] sm:$0xff]  ;;  %s7640_s20 = sld [smem:[#allocation248_spill]] }
  0x52   : > { %v596_v4 = vrot.slane %v594_v2, 4  ;;  %v600_v30 = vld [vmem:[%s6894_s3] sm:$0xf]  ;;  %v856_v41 = vld [vmem:[#allocation2 + $0xb0] sm:$0xff]  ;;  %v3961_v42 = vpack.c.bf16 %v857_v39, %v855_v37  ;;  %v859_v43 = vld [vmem:[#allocation2 + $0xc8] sm:$0xff] }
  0x53   : > { %v850_v35 = vld [vmem:[#allocation2 + $0x80] sm:$0xff]  ;;  %769 = vperm.xlu0 %5233, %v600_v30   ;;  %3958 = vmatprep.subr.bf16.mxu1 %v3957_v34  ;;  %v861_v44 = vld [vmem:[#allocation2 + $0xd8] sm:$0xff]  ;;  %v860_v48 = vld [vmem:[#allocation2 + $0xd0] sm:$0xff] }
  0x54   : > { %v5521_v12 = vsel %vm598_vm1, %v593_v1, %v596_v4  ;;  %v3959_v38 = vpack.c.bf16 %v852_v36, %v850_v35  ;;  %v854_v40 = vld [vmem:[#allocation2 + $0xa0] sm:$0xff]  ;;  %v3965_v46 = vpack.c.bf16 %v861_v44, %v859_v43  ;;  %v863_v49 = vld [vmem:[#allocation2 + $0xe8] sm:$0xff]  ;;  %v865_v50 = vld [vmem:[#allocation2 + $0xf8] sm:$0xff] }
  0x55   : > { %3922 = vmatpush3.msra.mxu0 %v5521_v12  ;;  %v3963_v45 = vpack.c.bf16 %v856_v41, %v854_v40  ;;  %v858_v47 = vld [vmem:[#allocation2 + $0xc0] sm:$0xff]  ;;  %v3969_v52 = vpack.c.bf16 %v865_v50, %v863_v49  ;;  %v3892_v56 = vld [vmem:[%s6893_s2 + $0x8] sm:$0xf]  ;;  %v3895_v57 = vld [vmem:[%s6893_s2 + $0xc] sm:$0xf] }
  0x56   : > { %3924 = vmatmul.mubr.msk.f32.vlgmr.msra.gmra.mrb[0].mxu0 %vm602_vm2, %v601_v3  ;;  %3942 = vmatprep.subr.bf16.mxu0 %v3941_v8  ;;  %v3967_v51 = vpack.c.bf16 %v860_v48, %v858_v47  ;;  %v3889_v55 = vld [vmem:[%s6893_s2 + $0x4] sm:$0xf]  ;;  %v864_v59 = vld [vmem:[#allocation2 + $0xf0] sm:$0xff]  ;;  %v1019_v61 = vld [vmem:[#allocation2 + $0x108] sm:$0xff] }
  0x57   : > { %3944 = vmatpush1.bf16.msra.mxu0 %v3943_v13  ;;  %760 = vmatprep.mubr.f32.mxu0 %v6912_v0  ;;  %v862_v58 = vld [vmem:[#allocation2 + $0xe0] sm:$0xff]  ;;  %v1021_v62 = vld [vmem:[#allocation2 + $0x118] sm:$0xff]  ;;  %v1279_v2 = vld [vmem:[#allocation4 + $0x8] sm:$0xff]  ;;  %s592_s21 = scalar_lea.vmem %s7640_s20, %s3912_s18 }
  0x58   : > { %3946 = vmatprep.subr.bf16.mxu0 %v3945_v14  ;;  %3960 = vmatpush1.bf16.msra.mxu1 %v3959_v38  ;;  %v3971_v60 = vpack.c.bf16 %v864_v59, %v862_v58  ;;  %v3973_v63 = vpack.c.bf16 %v1021_v62, %v1019_v61  ;;  %v2534_v1 = vld [vmem:[%s6898_s7] sm:$0xf]  ;;  %v1281_v3 = vld [vmem:[#allocation4 + $0x18] sm:$0xff]  ;;  %v1280_v6 = vld [vmem:[#allocation4 + $0x10] sm:$0xff] }
  0x59   : > { %3962 = vmatprep.subr.bf16.mxu1 %v3961_v42  ;;  %2537 = vperm.xlu0 %5233, %v2534_v1   ;;  %v5557_v4 = vpack.c.bf16 %v1281_v3, %v1279_v2  ;;  %v1278_v5 = vld [vmem:[#allocation4] sm:$0xff]  ;;  %v1283_v8 = vld [vmem:[#allocation4 + $0x28] sm:$0xff]  ;;  %v1285_v9 = vld [vmem:[#allocation4 + $0x38] sm:$0xff] }
  0x5a   : > { %v5560_v7 = vpack.c.bf16 %v1280_v6, %v1278_v5  ;;  %v5562_v10 = vpack.c.bf16 %v1285_v9, %v1283_v8  ;;  %v1282_v11 = vld [vmem:[#allocation4 + $0x20] sm:$0xff]  ;;  %v1287_v14 = vld [vmem:[#allocation4 + $0x48] sm:$0xff]  ;;  %v1289_v15 = vld [vmem:[#allocation4 + $0x58] sm:$0xff] }
  0x5b   : > { %3948 = vmatpush1.bf16.msra.mxu0 %v3947_v19  ;;  %v5568_v16 = vpack.c.bf16 %v1289_v15, %v1287_v14  ;;  %v1286_v17 = vld [vmem:[#allocation4 + $0x40] sm:$0xff]  ;;  %v1288_v18 = vld [vmem:[#allocation4 + $0x50] sm:$0xff]  ;;  %v1293_v21 = vld [vmem:[#allocation4 + $0x78] sm:$0xff] }
  0x5c   : > { %3950 = vmatprep.subr.bf16.mxu0 %v3949_v20  ;;  %3964 = vmatpush1.bf16.msra.mxu1 %v3963_v45  ;;  %v5571_v19 = vpack.c.bf16 %v1288_v18, %v1286_v17  ;;  %v1291_v20 = vld [vmem:[#allocation4 + $0x68] sm:$0xff]  ;;  %v1290_v23 = vld [vmem:[#allocation4 + $0x60] sm:$0xff]  ;;  %v1292_v24 = vld [vmem:[#allocation4 + $0x70] sm:$0xff] }
  0x5d   : > { %3966 = vmatprep.subr.bf16.mxu1 %v3965_v46  ;;  %v5574_v22 = vpack.c.bf16 %v1293_v21, %v1291_v20  ;;  %v1297_v27 = vld [vmem:[#allocation4 + $0x98] sm:$0xff]  ;;  %v1296_v30 = vld [vmem:[#allocation4 + $0x90] sm:$0xff]  ;;  %v1299_v32 = vld [vmem:[#allocation4 + $0xa8] sm:$0xff] }
  0x5e   : > { %v1301_v33 = vld [vmem:[#allocation4 + $0xb8] sm:$0xff]  ;;  %v1298_v35 = vld [vmem:[#allocation4 + $0xa0] sm:$0xff]  ;;  %v1300_v36 = vld [vmem:[#allocation4 + $0xb0] sm:$0xff] }
  0x5f   : > { %3952 = vmatpush1.bf16.msra.mxu0 %v3951_v25  ;;  %v5577_v25 = vpack.c.bf16 %v1292_v24, %v1290_v23  ;;  %v5586_v34 = vpack.c.bf16 %v1301_v33, %v1299_v32  ;;  %v5589_v37 = vpack.c.bf16 %v1300_v36, %v1298_v35  ;;  %v1303_v38 = vld [vmem:[#allocation4 + $0xc8] sm:$0xff]  ;;  %v1305_v39 = vld [vmem:[#allocation4 + $0xd8] sm:$0xff]  ;;  %v1302_v41 = vld [vmem:[#allocation4 + $0xc0] sm:$0xff] }
  0x60   : > { %3954 = vmatprep.subr.bf16.mxu0 %v3953_v26  ;;  %3968 = vmatpush1.bf16.msra.mxu1 %v3967_v51  ;;  %v1295_v26 = vld [vmem:[#allocation4 + $0x88] sm:$0xff]  ;;  %v5592_v40 = vpack.c.bf16 %v1305_v39, %v1303_v38  ;;  %v1304_v42 = vld [vmem:[#allocation4 + $0xd0] sm:$0xff]  ;;  %v1309_v45 = vld [vmem:[#allocation4 + $0xf8] sm:$0xff] }
  0x61   : > { %3970 = vmatprep.subr.bf16.mxu1 %v3969_v52  ;;  %7164 = vst [vmem:[#allocation9_spill] sm:$0xff] %v5577_v25  ;;  %v5580_v28 = vpack.c.bf16 %v1297_v27, %v1295_v26  ;;  %7167 = vst [vmem:[#allocation12_spill] sm:$0xff] %v5586_v34  ;;  %v5595_v43 = vpack.c.bf16 %v1304_v42, %v1302_v41  ;;  %v1307_v44 = vld [vmem:[#allocation4 + $0xe8] sm:$0xff]  ;;  %v1306_v47 = vld [vmem:[#allocation4 + $0xe0] sm:$0xff] }
  0x62   : > { %7168 = vst [vmem:[#allocation13_spill] sm:$0xff] %v5589_v37  ;;  %7169 = vst [vmem:[#allocation14_spill] sm:$0xff] %v5592_v40  ;;  %v5598_v46 = vpack.c.bf16 %v1309_v45, %v1307_v44  ;;  %v1308_v48 = vld [vmem:[#allocation4 + $0xf0] sm:$0xff]  ;;  %v1311_v50 = vld [vmem:[#allocation4 + $0x108] sm:$0xff] }
  0x63   : > { %3956 = vmatpush1.bf16.msra.mxu0 %v3955_v29  ;;  %7165 = vst [vmem:[#allocation10_spill] sm:$0xff] %v5580_v28  ;;  %v1294_v29 = vld [vmem:[#allocation4 + $0x80] sm:$0xff]  ;;  %7170 = vst [vmem:[#allocation15_spill] sm:$0xff] %v5595_v43  ;;  %v5601_v49 = vpack.c.bf16 %v1308_v48, %v1306_v47  ;;  %v1313_v51 = vld [vmem:[#allocation4 + $0x118] sm:$0xff] }
  0x64   : > { %3926 = vmatprep.subr.mxu0 %v6912_v0  ;;  %3972 = vmatpush1.bf16.msra.mxu1 %v3971_v60  ;;  %v5583_v31 = vpack.c.bf16 %v1296_v30, %v1294_v29  ;;  %7171 = vst [vmem:[#allocation16_spill] sm:$0xff] %v5598_v46  ;;  %v5604_v52 = vpack.c.bf16 %v1313_v51, %v1311_v50  ;;  %v1314_v59 = vld [vmem:[#allocation4 + $0x120] sm:$0xff]  ;;  %v1316_v60 = vld [vmem:[#allocation4 + $0x130] sm:$0xff]  ;;  %v1319_v62 = vld [vmem:[#allocation4 + $0x148] sm:$0xff] }
  0x65   : > { %3974 = vmatprep.subr.bf16.mxu1 %v3973_v63  ;;  %7172 = vst [vmem:[#allocation17_spill] sm:$0xff] %v5601_v49  ;;  %v5613_v61 = vpack.c.bf16 %v1316_v60, %v1314_v59  ;;  %v1321_v63 = vld [vmem:[#allocation4 + $0x158] sm:$0xff]  ;;  %v1318_v2 = vld [vmem:[#allocation4 + $0x140] sm:$0xff]  ;;  %v1320_v3 = vld [vmem:[#allocation4 + $0x150] sm:$0xff] }
  0x66   : > { %7166 = vst [vmem:[#allocation11_spill] sm:$0xff] %v5583_v31  ;;  %7173 = vst [vmem:[#allocation18_spill] sm:$0xff] %v5604_v52  ;;  %v5616_v1 = vpack.c.bf16 %v1321_v63, %v1319_v62  ;;  %v5619_v5 = vpack.c.bf16 %v1320_v3, %v1318_v2  ;;  %v1323_v6 = vld [vmem:[#allocation4 + $0x168] sm:$0xff]  ;;  %v1325_v8 = vld [vmem:[#allocation4 + $0x178] sm:$0xff] }
  0x67   : > { %7176 = vst [vmem:[#allocation21_spill] sm:$0xff] %v5613_v61  ;;  %v5622_v9 = vpack.c.bf16 %v1325_v8, %v1323_v6  ;;  %v1327_v15 = vld [vmem:[#allocation4 + $0x188] sm:$0xff]  ;;  %v1329_v17 = vld [vmem:[#allocation4 + $0x198] sm:$0xff]  ;;  %v1326_v20 = vld [vmem:[#allocation4 + $0x180] sm:$0xff] }
  0x68   : > { %7177 = vst [vmem:[#allocation22_spill] sm:$0xff] %v5616_v1  ;;  %7178 = vst [vmem:[#allocation23_spill] sm:$0xff] %v5619_v5  ;;  %v5628_v18 = vpack.c.bf16 %v1329_v17, %v1327_v15  ;;  %v1328_v21 = vld [vmem:[#allocation4 + $0x190] sm:$0xff]  ;;  %v1331_v24 = vld [vmem:[#allocation4 + $0x1a8] sm:$0xff] }
  0x69   : > { %7179 = vst [vmem:[#allocation24_spill] sm:$0xff] %v5622_v9  ;;  %v5631_v23 = vpack.c.bf16 %v1328_v21, %v1326_v20  ;;  %v1333_v26 = vld [vmem:[#allocation4 + $0x1b8] sm:$0xff]  ;;  %v1330_v29 = vld [vmem:[#allocation4 + $0x1a0] sm:$0xff]  ;;  %v1332_v30 = vld [vmem:[#allocation4 + $0x1b0] sm:$0xff] }
  0x6a   : > { %7181 = vst [vmem:[#allocation26_spill] sm:$0xff] %v5628_v18  ;;  %v5634_v27 = vpack.c.bf16 %v1333_v26, %v1331_v24  ;;  %v5637_v32 = vpack.c.bf16 %v1332_v30, %v1330_v29  ;;  %v1335_v33 = vld [vmem:[#allocation4 + $0x1c8] sm:$0xff]  ;;  %v1337_v35 = vld [vmem:[#allocation4 + $0x1d8] sm:$0xff]  ;;  %v1334_v38 = vld [vmem:[#allocation4 + $0x1c0] sm:$0xff] }
  0x6b   : > { %7182 = vst [vmem:[#allocation27_spill] sm:$0xff] %v5631_v23  ;;  %v5640_v36 = vpack.c.bf16 %v1337_v35, %v1335_v33  ;;  %v1336_v39 = vld [vmem:[#allocation4 + $0x1d0] sm:$0xff]  ;;  %v1018_v42 = vld [vmem:[#allocation2 + $0x100] sm:$0xff]  ;;  %v1023_v47 = vld [vmem:[#allocation2 + $0x128] sm:$0xff] }
  0x6c   : > { %7183 = vst [vmem:[#allocation28_spill] sm:$0xff] %v5634_v27  ;;  %7184 = vst [vmem:[#allocation29_spill] sm:$0xff] %v5637_v32  ;;  %v5643_v41 = vpack.c.bf16 %v1336_v39, %v1334_v38  ;;  %v1020_v44 = vld [vmem:[#allocation2 + $0x110] sm:$0xff]  ;;  %v1025_v48 = vld [vmem:[#allocation2 + $0x138] sm:$0xff] }
  0x6d   : > { %7185 = vst [vmem:[#allocation30_spill] sm:$0xff] %v5640_v36  ;;  %v3975_v51 = vpack.c.bf16 %v1020_v44, %v1018_v42  ;;  %v1027_v59 = vld [vmem:[#allocation2 + $0x148] sm:$0xff]  ;;  %v1029_v60 = vld [vmem:[#allocation2 + $0x158] sm:$0xff]  ;;  %v1026_v3 = vld [vmem:[#allocation2 + $0x140] sm:$0xff] }
  0x6e   : > { %7186 = vst [vmem:[#allocation31_spill] sm:$0xff] %v5643_v41  ;;  %v3981_v2 = vpack.c.bf16 %v1029_v60, %v1027_v59  ;;  %v1028_v6 = vld [vmem:[#allocation2 + $0x150] sm:$0xff]  ;;  %v1031_v8 = vld [vmem:[#allocation2 + $0x168] sm:$0xff]  ;;  %v1030_v21 = vld [vmem:[#allocation2 + $0x160] sm:$0xff] }
  0x6f   : > { %v3983_v17 = vpack.c.bf16 %v1028_v6, %v1026_v3  ;;  %v1032_v24 = vld [vmem:[#allocation2 + $0x170] sm:$0xff]  ;;  %v1187_v26 = vld [vmem:[#allocation2 + $0x188] sm:$0xff]  ;;  %v1189_v29 = vld [vmem:[#allocation2 + $0x198] sm:$0xff] }
  0x70   : > { %v3987_v35 = vpack.c.bf16 %v1032_v24, %v1030_v21  ;;  %v3989_v38 = vpack.c.bf16 %v1189_v29, %v1187_v26  ;;  %v1186_v39 = vld [vmem:[#allocation2 + $0x180] sm:$0xff]  ;;  %v1188_v42 = vld [vmem:[#allocation2 + $0x190] sm:$0xff]  ;;  %v1191_v44 = vld [vmem:[#allocation2 + $0x1a8] sm:$0xff] }
  0x71   : > { %v1201_v3 = vld [vmem:[#allocation2 + $0x1f8] sm:$0xff]  ;;  %v1414_v24 = vld [vmem:[#allocation4 + $0x200] sm:$0xff]  ;;  %v1416_v26 = vld [vmem:[#allocation4 + $0x210] sm:$0xff] }
  0x72   : > { %v1419_v29 = vld [vmem:[#allocation4 + $0x228] sm:$0xff] }
 0x129   : > { %v672_v53 = vpop.f32.mrb[0].mxu0 }
 0x12a   : > { %v3925_v54 = vpop.f32.mrb[1].mxu0  ;;  %3888 = vmatmul.mubr.msk.f32.vlgmr.msra.gmra.mrb[2].mxu0 %vm692_vm3, %v672_v53  ;;  %v1310_v53 = vld [vmem:[#allocation4 + $0x100] sm:$0xff] }
 0x12b   : > { %3927 = vmatpush3.msra.mxu0 %v5521_v12  ;;  %3928 = vmatprep.mubr.msk.f32.mxu0 %vm5328_vm0, %v6912_v0  ;;  %v1312_v54 = vld [vmem:[#allocation4 + $0x110] sm:$0xff] }
 0x12c   : > { %3931 = vmatprep.subr.mxu0 %v6912_v0 }
 0x12e   : > { %3929 = vmatmul.mubr.msk.f32.vlgmr.msra.gmra.mrb[4].mxu0 %vm602_vm2, %v3889_v55  ;;  %v5607_v55 = vpack.c.bf16 %v1312_v54, %v1310_v53  ;;  %v3977_v53 = vpack.c.bf16 %v1025_v48, %v1023_v47  ;;  %v1022_v54 = vld [vmem:[#allocation2 + $0x120] sm:$0xff]  ;;  %v1193_v47 = vld [vmem:[#allocation2 + $0x1b8] sm:$0xff]  ;;  %v3991_v48 = vpack.c.bf16 %v1188_v42, %v1186_v39  ;;  %v1420_v42 = vld [vmem:[#allocation4 + $0x230] sm:$0xff] }
 0x12f   : > { %3932 = vmatpush3.msra.mxu0 %v5521_v12  ;;  %3933 = vmatprep.mubr.msk.f32.mxu0 %vm5328_vm0, %v6912_v0  ;;  %v1418_v39 = vld [vmem:[#allocation4 + $0x220] sm:$0xff] }
 0x130   : > { %3936 = vmatprep.subr.mxu0 %v6912_v0  ;;  %7174 = vst [vmem:[#allocation19_spill] sm:$0xff] %v5607_v55 }
 0x132   : > { %3934 = vmatmul.mubr.msk.f32.vlgmr.msra.gmra.mrb[6].mxu0 %vm602_vm2, %v3892_v56  ;;  %v1315_v56 = vld [vmem:[#allocation4 + $0x128] sm:$0xff] }
 0x133   : > { %3937 = vmatpush3.msra.mxu0 %v5521_v12  ;;  %3938 = vmatprep.mubr.msk.f32.mxu0 %vm5328_vm0, %v6912_v0  ;;  %v1284_v12 = vld [vmem:[#allocation4 + $0x30] sm:$0xff] }
 0x134   : > { %4006 = vmatprep.subr.bf16.mxu0 %v5557_v4  ;;  %v5565_v13 = vpack.c.bf16 %v1284_v12, %v1282_v11  ;;  %v1322_v11 = vld [vmem:[#allocation4 + $0x160] sm:$0xff]  ;;  %v1324_v12 = vld [vmem:[#allocation4 + $0x170] sm:$0xff] }
 0x135   : > { %v5625_v14 = vpack.c.bf16 %v1324_v12, %v1322_v11  ;;  %v1033_v11 = vld [vmem:[#allocation2 + $0x178] sm:$0xff] }
 0x136   : > { %3939 = vmatmul.mubr.msk.f32.vlgmr.msra.gmra.mrb[8].mxu0 %vm602_vm2, %v3895_v57  ;;  %v1317_v57 = vld [vmem:[#allocation4 + $0x138] sm:$0xff]  ;;  %v3985_v20 = vpack.c.bf16 %v1033_v11, %v1031_v8  ;;  %v1198_v11 = vld [vmem:[#allocation2 + $0x1e0] sm:$0xff] }
 0x137   : > { %4008 = vmatpush1.bf16.msra.mxu0 %v5560_v7  ;;  %v5610_v58 = vpack.c.bf16 %v1317_v57, %v1315_v56  ;;  %7180 = vst [vmem:[#allocation25_spill] sm:$0xff] %v5625_v14  ;;  %v1024_v56 = vld [vmem:[#allocation2 + $0x130] sm:$0xff] }
 0x138   : > { %4010 = vmatprep.subr.bf16.mxu0 %v5562_v10  ;;  %v3979_v63 = vpack.c.bf16 %v1024_v56, %v1022_v54  ;;  %v1192_v54 = vld [vmem:[#allocation2 + $0x1b0] sm:$0xff]  ;;  %v1195_v56 = vld [vmem:[#allocation2 + $0x1c8] sm:$0xff] }
 0x139   : > { %7175 = vst [vmem:[#allocation20_spill] sm:$0xff] %v5610_v58 }
 0x13b   : > { %4012 = vmatpush1.bf16.msra.mxu0 %v5565_v13 }
 0x13c   : > { %4014 = vmatprep.subr.bf16.mxu0 %v5568_v16 }
 0x13f   : > { %4016 = vmatpush1.bf16.msra.mxu0 %v5571_v19 }
 0x140   : > { %4018 = vmatprep.subr.bf16.mxu0 %v5574_v22 }
 0x143   : > { %4020 = vmatpush1.bf16.msra.mxu0 %v5577_v25  ;;  %v1703_v25 = vld [vmem:[#allocation4 + $0x688] sm:$0xff] }
 0x144   : > { %4022 = vmatprep.subr.bf16.mxu0 %v5580_v28  ;;  %v1559_v28 = vld [vmem:[#allocation4 + $0x448] sm:$0xff] }
 0x147   : > { %4024 = vmatpush1.bf16.msra.mxu0 %v5583_v31  ;;  %v1692_v31 = vld [vmem:[#allocation4 + $0x630] sm:$0xff] }
 0x148   : > { %4026 = vmatprep.subr.bf16.mxu0 %v5586_v34  ;;  %v1690_v34 = vld [vmem:[#allocation4 + $0x620] sm:$0xff] }
 0x14b   : > { %4028 = vmatpush1.bf16.msra.mxu0 %v5589_v37  ;;  %v1556_v37 = vld [vmem:[#allocation4 + $0x430] sm:$0xff] }
 0x14c   : > { %4030 = vmatprep.subr.bf16.mxu0 %v5592_v40 }
 0x14f   : > { %4032 = vmatpush1.bf16.msra.mxu0 %v5595_v43 }
 0x150   : > { %4034 = vmatprep.subr.bf16.mxu0 %v5598_v46  ;;  %v1693_v46 = vld [vmem:[#allocation4 + $0x638] sm:$0xff] }
 0x153   : > { %4036 = vmatpush1.bf16.msra.mxu0 %v5601_v49  ;;  %v1555_v49 = vld [vmem:[#allocation4 + $0x428] sm:$0xff] }
 0x154   : > { %4038 = vmatprep.subr.bf16.mxu0 %v5604_v52 }
 0x157   : > { %4040 = vmatpush1.bf16.msra.mxu0 %v5607_v55 }
 0x158   : > { %4042 = vmatprep.subr.bf16.mxu0 %v5610_v58 }
 0x15b   : > { %4044 = vmatpush1.bf16.msra.mxu0 %v5613_v61  ;;  %v1476_v61 = vld [vmem:[#allocation4 + $0x3f0] sm:$0xff] }
 0x15c   : > { %4046 = vmatprep.subr.bf16.mxu0 %v5616_v1  ;;  %v1474_v1 = vld [vmem:[#allocation4 + $0x3e0] sm:$0xff] }
 0x15f   : > { %4048 = vmatpush1.bf16.msra.mxu0 %v5619_v5  ;;  %v1340_v5 = vld [vmem:[#allocation4 + $0x1f0] sm:$0xff] }
 0x160   : > { %4050 = vmatprep.subr.bf16.mxu0 %v5622_v9 }
 0x163   : > { %4052 = vmatpush1.bf16.msra.mxu0 %v5625_v14  ;;  %v1472_v14 = vld [vmem:[#allocation4 + $0x3d0] sm:$0xff] }
 0x164   : > { %4054 = vmatprep.subr.bf16.mxu0 %v5628_v18  ;;  %v1470_v18 = vld [vmem:[#allocation4 + $0x3c0] sm:$0xff] }
 0x167   : > { %4056 = vmatpush1.bf16.msra.mxu0 %v5631_v23  ;;  %v1468_v23 = vld [vmem:[#allocation4 + $0x3b0] sm:$0xff] }
 0x168   : > { %4058 = vmatprep.subr.bf16.mxu0 %v5634_v27  ;;  %v1466_v27 = vld [vmem:[#allocation4 + $0x3a0] sm:$0xff] }
 0x16b   : > { %4060 = vmatpush1.bf16.msra.mxu0 %v5637_v32  ;;  %v1464_v32 = vld [vmem:[#allocation4 + $0x390] sm:$0xff] }
 0x16c   : > { %4062 = vmatprep.subr.bf16.mxu0 %v5640_v36  ;;  %v1462_v36 = vld [vmem:[#allocation4 + $0x380] sm:$0xff] }
 0x16f   : > { %4064 = vmatpush1.bf16.msra.mxu0 %v5643_v41  ;;  %v1460_v41 = vld [vmem:[#allocation4 + $0x370] sm:$0xff] }
 0x1fd   : > { %v5647_v45 = vpop.f32.mrb[2].mxu0 }
 0x1fe   : > { %v5649_v50 = vpop.f32.mrb[3].mxu0 }
 0x201   : > { %v845_v57 = vpop.f32.mrb[4].mxu0 }
 0x202   : > { %v3930_v62 = vpop.f32.mrb[5].mxu0  ;;  %3891 = vmatmul.mubr.msk.f32.vlgmr.msra.gmra.mrb[0].mxu1 %vm692_vm3, %v845_v57  ;;  %v1197_v57 = vld [vmem:[#allocation2 + $0x1d8] sm:$0xff] }
 0x203   : > { %3976 = vmatpush1.bf16.msra.mxu1 %v3975_v51  ;;  %1101 = vmatprep.mubr.f32.mxu1 %v6912_v0  ;;  %v3993_v51 = vpack.c.bf16 %v1193_v47, %v1191_v44  ;;  %v3997_v60 = vpack.c.bf16 %v1197_v57, %v1195_v56  ;;  %v1194_v62 = vld [vmem:[#allocation2 + $0x1c0] sm:$0xff]  ;;  %v1423_v44 = vld [vmem:[#allocation4 + $0x248] sm:$0xff]  ;;  %v1425_v47 = vld [vmem:[#allocation4 + $0x258] sm:$0xff] }
 0x204   : > { %3978 = vmatprep.subr.bf16.mxu1 %v3977_v53  ;;  %v1190_v53 = vld [vmem:[#allocation2 + $0x1a0] sm:$0xff]  ;;  %v1427_v56 = vld [vmem:[#allocation4 + $0x268] sm:$0xff]  ;;  %v1429_v57 = vld [vmem:[#allocation4 + $0x278] sm:$0xff] }
 0x205   : > { %v1013_v12 = vpop.f32.mrb[6].mxu0  ;;  %v3995_v59 = vpack.c.bf16 %v1192_v54, %v1190_v53  ;;  %v1422_v53 = vld [vmem:[#allocation4 + $0x240] sm:$0xff]  ;;  %v1424_v54 = vld [vmem:[#allocation4 + $0x250] sm:$0xff] }
 0x206   : > { %v3935_v15 = vpop.f32.mrb[7].mxu0 }
 0x207   : > { %3980 = vmatpush1.bf16.msra.mxu1 %v3979_v63  ;;  %v1196_v63 = vld [vmem:[#allocation2 + $0x1d0] sm:$0xff] }
 0x208   : > { %3982 = vmatprep.subr.bf16.mxu1 %v3981_v2  ;;  %v1199_v2 = vld [vmem:[#allocation2 + $0x1e8] sm:$0xff]  ;;  %v3999_v6 = vpack.c.bf16 %v1196_v63, %v1194_v62  ;;  %v1200_v15 = vld [vmem:[#allocation2 + $0x1f0] sm:$0xff] }
 0x209   : > { %v1181_v30 = vpop.f32.mrb[8].mxu0  ;;  %v4001_v8 = vpack.c.bf16 %v1201_v3, %v1199_v2  ;;  %v1428_v62 = vld [vmem:[#allocation4 + $0x270] sm:$0xff]  ;;  %v1431_v63 = vld [vmem:[#allocation4 + $0x288] sm:$0xff]  ;;  %v1433_v2 = vld [vmem:[#allocation4 + $0x298] sm:$0xff] }
 0x20a   : > { %v3940_v33 = vpop.f32.mrb[9].mxu0 }
 0x20b   : > { %3984 = vmatpush1.bf16.msra.mxu1 %v3983_v17  ;;  %v1415_v17 = vld [vmem:[#allocation4 + $0x208] sm:$0xff]  ;;  %v1421_v33 = vld [vmem:[#allocation4 + $0x238] sm:$0xff] }
 0x20c   : > { %3986 = vmatprep.subr.bf16.mxu1 %v3985_v20  ;;  %v1417_v20 = vld [vmem:[#allocation4 + $0x218] sm:$0xff] }
 0x20d   : > { %v5655_v21 = vpack.c.bf16 %v1417_v20, %v1415_v17  ;;  %v1437_v17 = vld [vmem:[#allocation4 + $0x2b8] sm:$0xff] }
 0x20f   : > { %3988 = vmatpush1.bf16.msra.mxu1 %v3987_v35  ;;  %v5657_v35 = vpack.c.bf16 %v1416_v26, %v1414_v24  ;;  %v1434_v24 = vld [vmem:[#allocation4 + $0x2a0] sm:$0xff]  ;;  %v1436_v26 = vld [vmem:[#allocation4 + $0x2b0] sm:$0xff] }
 0x210   : > { %3990 = vmatprep.subr.bf16.mxu1 %v3989_v38  ;;  %v5660_v38 = vpack.c.bf16 %v1421_v33, %v1419_v29  ;;  %v1439_v29 = vld [vmem:[#allocation4 + $0x2c8] sm:$0xff]  ;;  %v1441_v33 = vld [vmem:[#allocation4 + $0x2d8] sm:$0xff] }
 0x212   : > { %3894 = vmatmul.mubr.msk.f32.vlgmr.msra.gmra.mrb[0].mxu1 %vm692_vm3, %v1013_v12  ;;  %v4003_v12 = vpack.c.bf16 %v1200_v15, %v1198_v11  ;;  %v1432_v11 = vld [vmem:[#allocation4 + $0x290] sm:$0xff]  ;;  %v1435_v15 = vld [vmem:[#allocation4 + $0x2a8] sm:$0xff] }
 0x213   : > { %3992 = vmatpush1.bf16.msra.mxu1 %v3991_v48  ;;  %1269 = vmatprep.mubr.f32.mxu1 %v6912_v0  ;;  %v5664_v48 = vpack.c.bf16 %v1420_v42, %v1418_v39  ;;  %v5688_v39 = vpack.c.bf16 %v1436_v26, %v1434_v24  ;;  %v5691_v42 = vpack.c.bf16 %v1441_v33, %v1439_v29  ;;  %v1451_v24 = vld [vmem:[#allocation4 + $0x328] sm:$0xff]  ;;  %v1453_v26 = vld [vmem:[#allocation4 + $0x338] sm:$0xff]  ;;  %v1458_v0 = vld [vmem:[#allocation4 + $0x360] sm:$0xff] }
 0x214   : > { %3994 = vmatprep.subr.bf16.mxu1 %v3993_v51  ;;  %v5667_v51 = vpack.c.bf16 %v1425_v47, %v1423_v44  ;;  %v1438_v44 = vld [vmem:[#allocation4 + $0x2c0] sm:$0xff]  ;;  %v1440_v47 = vld [vmem:[#allocation4 + $0x2d0] sm:$0xff]  ;;  %v5709_v33 = vpack.c.bf16 %v1453_v26, %v1451_v24 }
 0x217   : > { %3996 = vmatpush1.bf16.msra.mxu1 %v3995_v59  ;;  %v5670_v59 = vpack.c.bf16 %v1424_v54, %v1422_v53  ;;  %v1443_v53 = vld [vmem:[#allocation4 + $0x2e8] sm:$0xff]  ;;  %v1445_v54 = vld [vmem:[#allocation4 + $0x2f8] sm:$0xff] }
 0x218   : > { %3998 = vmatprep.subr.bf16.mxu1 %v3997_v60  ;;  %v5673_v60 = vpack.c.bf16 %v1429_v57, %v1427_v56  ;;  %v5694_v56 = vpack.c.bf16 %v1440_v47, %v1438_v44  ;;  %v5697_v57 = vpack.c.bf16 %v1445_v54, %v1443_v53  ;;  %v1450_v44 = vld [vmem:[#allocation4 + $0x320] sm:$0xff]  ;;  %v1452_v47 = vld [vmem:[#allocation4 + $0x330] sm:$0xff]  ;;  %v1455_v53 = vld [vmem:[#allocation4 + $0x348] sm:$0xff] }
 0x219   : > { %v1457_v54 = vld [vmem:[#allocation4 + $0x358] sm:$0xff] }
 0x21b   : > { %4000 = vmatpush1.bf16.msra.mxu1 %v3999_v6  ;;  %v5679_v6 = vpack.c.bf16 %v1433_v2, %v1431_v63  ;;  %v1447_v63 = vld [vmem:[#allocation4 + $0x308] sm:$0xff]  ;;  %v1449_v2 = vld [vmem:[#allocation4 + $0x318] sm:$0xff] }
 0x21c   : > { %4002 = vmatprep.subr.bf16.mxu1 %v4001_v8  ;;  %v1430_v8 = vld [vmem:[#allocation4 + $0x280] sm:$0xff] }
 0x21d   : > { %v5682_v20 = vpack.c.bf16 %v1432_v11, %v1430_v8  ;;  %v5703_v11 = vpack.c.bf16 %v1449_v2, %v1447_v63  ;;  %v1454_v63 = vld [vmem:[#allocation4 + $0x340] sm:$0xff]  ;;  %v1456_v2 = vld [vmem:[#allocation4 + $0x350] sm:$0xff] }
 0x21e   : > { %v5718_v24 = vpack.c.bf16 %v1456_v2, %v1454_v63  ;;  %v1467_v63 = vld [vmem:[#allocation4 + $0x3a8] sm:$0xff]  ;;  %v1469_v2 = vld [vmem:[#allocation4 + $0x3b8] sm:$0xff] }
 0x21f   : > { %4004 = vmatpush1.bf16.msra.mxu1 %v4003_v12  ;;  %v5685_v12 = vpack.c.bf16 %v1437_v17, %v1435_v15  ;;  %v1446_v15 = vld [vmem:[#allocation4 + $0x300] sm:$0xff]  ;;  %v1448_v17 = vld [vmem:[#allocation4 + $0x310] sm:$0xff] }
 0x220   : > { %4070 = vmatprep.subr.bf16.mxu1 %v5655_v21  ;;  %v5706_v29 = vpack.c.bf16 %v1448_v17, %v1446_v15  ;;  %v1459_v15 = vld [vmem:[#allocation4 + $0x368] sm:$0xff]  ;;  %v1461_v17 = vld [vmem:[#allocation4 + $0x378] sm:$0xff] }
 0x221   : > { %v5721_v26 = vpack.c.bf16 %v1461_v17, %v1459_v15  ;;  %v5730_v15 = vpack.c.bf16 %v1464_v32, %v1462_v36  ;;  %v5733_v17 = vpack.c.bf16 %v1469_v2, %v1467_v63  ;;  %v5742_v32 = vpack.c.bf16 %v1472_v14, %v1470_v18  ;;  %v1339_v36 = vld [vmem:[#allocation4 + $0x1e8] sm:$0xff]  ;;  %v1341_v63 = vld [vmem:[#allocation4 + $0x1f8] sm:$0xff] }
 0x222   : > { %3897 = vmatmul.mubr.msk.f32.vlgmr.msra.gmra.mrb[0].mxu1 %vm692_vm3, %v1181_v30  ;;  %v1426_v30 = vld [vmem:[#allocation4 + $0x260] sm:$0xff]  ;;  %v1475_v2 = vld [vmem:[#allocation4 + $0x3e8] sm:$0xff]  ;;  %v5746_v9 = vpack.c.bf16 %v1341_v63, %v1339_v36  ;;  %v5753_v14 = vpack.c.bf16 %v1476_v61, %v1474_v1  ;;  %v1553_v36 = vld [vmem:[#allocation4 + $0x418] sm:$0xff]  ;;  %v770_v61 = vpop.permute.xlu0 %769 }
 0x223   : > { %4072 = vmatpush1.bf16.msra.mxu1 %v5657_v35  ;;  %v5676_v3 = vpack.c.bf16 %v1428_v62, %v1426_v30  ;;  %v1442_v30 = vld [vmem:[#allocation4 + $0x2e0] sm:$0xff]  ;;  %v1444_v62 = vld [vmem:[#allocation4 + $0x2f0] sm:$0xff]  ;;  %v1551_v18 = vld [vmem:[#allocation4 + $0x408] sm:$0xff]  ;;  %v773_v55 = vadd.f32 %v770_v61, %v5649_v50 }
 0x224   : > { %4074 = vmatprep.subr.bf16.mxu1 %v5660_v38  ;;  %v5700_v8 = vpack.c.bf16 %v1444_v62, %v1442_v30  ;;  %v5712_v30 = vpack.c.bf16 %v1452_v47, %v1450_v44  ;;  %v5715_v62 = vpack.c.bf16 %v1457_v54, %v1455_v53  ;;  %v1463_v44 = vld [vmem:[#allocation4 + $0x388] sm:$0xff]  ;;  %v1465_v47 = vld [vmem:[#allocation4 + $0x398] sm:$0xff]  ;;  %v5724_v53 = vpack.c.bf16 %v1460_v41, %v1458_v0  ;;  %v1550_v1 = vld [vmem:[#allocation4 + $0x400] sm:$0xff] }
 0x225   : > { %v5727_v54 = vpack.c.bf16 %v1465_v47, %v1463_v44  ;;  %v1471_v0 = vld [vmem:[#allocation4 + $0x3c8] sm:$0xff]  ;;  %v1473_v41 = vld [vmem:[#allocation4 + $0x3d8] sm:$0xff]  ;;  %v5736_v44 = vpack.c.bf16 %v1468_v23, %v1466_v27  ;;  %7187 = vst [vmem:[#allocation32_spill] sm:$0xff] %v5746_v9  ;;  %v1338_v27 = vld [vmem:[#allocation4 + $0x1e0] sm:$0xff]  ;;  %4066 = vmatprep.subr.bf16.mxu0 %v5746_v9  ;;  %v5758_v58 = vpack.c.bf16 %v1553_v36, %v1551_v18 }
 0x226   : > { %v5739_v47 = vpack.c.bf16 %v1473_v41, %v1471_v0  ;;  %v1477_v23 = vld [vmem:[#allocation4 + $0x3f8] sm:$0xff]  ;;  %v5750_v41 = vpack.c.bf16 %v1340_v5, %v1338_v27  ;;  %v1687_v63 = vld [vmem:[#allocation4 + $0x608] sm:$0xff]  ;;  %v1552_v27 = vld [vmem:[#allocation4 + $0x410] sm:$0xff] }
 0x227   : > { %4076 = vmatpush1.bf16.msra.mxu1 %v5664_v48  ;;  %v5748_v0 = vpack.c.bf16 %v1477_v23, %v1475_v2  ;;  %7189 = vst [vmem:[#allocation34_spill] sm:$0xff] %v5758_v58  ;;  %v1689_v2 = vld [vmem:[#allocation4 + $0x618] sm:$0xff]  ;;  %v772_v23 = vadd.f32 %v770_v61, %v5647_v45  ;;  %v1688_v9 = vld [vmem:[#allocation4 + $0x610] sm:$0xff]  ;;  %v5770_v43 = vpack.c.bf16 %v1552_v27, %v1550_v1  ;;  %v1554_v45 = vld [vmem:[#allocation4 + $0x420] sm:$0xff] }
 0x228   : > { %4078 = vmatprep.subr.bf16.mxu1 %v5667_v51  ;;  %7188 = vst [vmem:[#allocation33_spill] sm:$0xff] %v5750_v41  ;;  %4068 = vmatpush1.bf16.msra.mxu0 %v5750_v41  ;;  %v5760_v5 = vpack.c.bf16 %v1689_v2, %v1687_v63  ;;  %v1686_v41 = vld [vmem:[#allocation4 + $0x600] sm:$0xff]  ;;  %v1557_v63 = vld [vmem:[#allocation4 + $0x438] sm:$0xff]  ;;  %v1691_v2 = vld [vmem:[#allocation4 + $0x628] sm:$0xff] }
 0x229   : > { %4134 = vmatprep.subr.bf16.mxu0 %v5758_v58  ;;  %7191 = vst [vmem:[#allocation36_spill] sm:$0xff] %v5770_v43  ;;  %v5772_v40 = vpack.c.bf16 %v1688_v9, %v1686_v41  ;;  %v5778_v50 = vpack.c.bf16 %v1693_v46, %v1691_v2  ;;  %v1561_v61 = vld [vmem:[#allocation4 + $0x458] sm:$0xff]  ;;  %v5784_v9 = vpack.c.bf16 %v1556_v37, %v1554_v45  ;;  %v1558_v1 = vld [vmem:[#allocation4 + $0x440] sm:$0xff]  ;;  %v1563_v2 = vld [vmem:[#allocation4 + $0x468] sm:$0xff] }
 0x22a   : > { %v5786_v41 = vpack.c.bf16 %v1692_v31, %v1690_v34  ;;  %v5790_v46 = vpack.c.bf16 %v1561_v61, %v1559_v28  ;;  %v1565_v37 = vld [vmem:[#allocation4 + $0x478] sm:$0xff]  ;;  %v1699_v31 = vld [vmem:[#allocation4 + $0x668] sm:$0xff]  ;;  %v1562_v61 = vld [vmem:[#allocation4 + $0x460] sm:$0xff] }
 0x22b   : > { %4080 = vmatpush1.bf16.msra.mxu1 %v5670_v59  ;;  %7192 = vst [vmem:[#allocation37_spill] sm:$0xff] %v5772_v40  ;;  %7194 = vst [vmem:[#allocation39_spill] sm:$0xff] %v5778_v50  ;;  %v1701_v34 = vld [vmem:[#allocation4 + $0x678] sm:$0xff] }
 0x22c   : > { %4082 = vmatprep.subr.bf16.mxu1 %v5673_v60  ;;  %7195 = vst [vmem:[#allocation40_spill] sm:$0xff] %v5784_v9  ;;  %7196 = vst [vmem:[#allocation41_spill] sm:$0xff] %v5786_v41 }
 0x22d   : > { %7197 = vst [vmem:[#allocation42_spill] sm:$0xff] %v5790_v46 }
 0x22f   : > { %4084 = vmatpush1.bf16.msra.mxu1 %v5676_v3 }
 0x230   : > { %4086 = vmatprep.subr.bf16.mxu1 %v5679_v6 }
 0x233   : > { %4088 = vmatpush1.bf16.msra.mxu1 %v5682_v20 }
 0x234   : > { %4090 = vmatprep.subr.bf16.mxu1 %v5685_v12 }
 0x237   : > { %4092 = vmatpush1.bf16.msra.mxu1 %v5688_v39 }
 0x238   : > { %4094 = vmatprep.subr.bf16.mxu1 %v5691_v42 }
 0x23b   : > { %4096 = vmatpush1.bf16.msra.mxu1 %v5694_v56 }
 0x23c   : > { %4098 = vmatprep.subr.bf16.mxu1 %v5697_v57 }
 0x23f   : > { %4100 = vmatpush1.bf16.msra.mxu1 %v5700_v8 }
 0x240   : > { %4102 = vmatprep.subr.bf16.mxu1 %v5703_v11 }
 0x243   : > { %4104 = vmatpush1.bf16.msra.mxu1 %v5706_v29 }
 0x244   : > { %4106 = vmatprep.subr.bf16.mxu1 %v5709_v33 }
 0x247   : > { %4108 = vmatpush1.bf16.msra.mxu1 %v5712_v30 }
 0x248   : > { %4110 = vmatprep.subr.bf16.mxu1 %v5715_v62 }
 0x24b   : > { %4112 = vmatpush1.bf16.msra.mxu1 %v5718_v24 }
 0x24c   : > { %4114 = vmatprep.subr.bf16.mxu1 %v5721_v26 }
 0x24f   : > { %4116 = vmatpush1.bf16.msra.mxu1 %v5724_v53 }
 0x250   : > { %4118 = vmatprep.subr.bf16.mxu1 %v5727_v54 }
 0x253   : > { %4120 = vmatpush1.bf16.msra.mxu1 %v5730_v15 }
 0x254   : > { %4122 = vmatprep.subr.bf16.mxu1 %v5733_v17 }
 0x257   : > { %4124 = vmatpush1.bf16.msra.mxu1 %v5736_v44 }
 0x258   : > { %4126 = vmatprep.subr.bf16.mxu1 %v5739_v47 }
 0x25b   : > { %4128 = vmatpush1.bf16.msra.mxu1 %v5742_v32 }
 0x25c   : > { %4130 = vmatprep.subr.bf16.mxu1 %v5748_v0 }
 0x25f   : > { %4132 = vmatpush1.bf16.msra.mxu1 %v5753_v14 }
 0x260   : > { %4198 = vmatprep.subr.bf16.mxu1 %v5760_v5 }
 0x2f5   : > { %v1271_v52 = vpop.f32.mrb[0].mxu1 }
 0x2f6   : > { %v5766_v18 = vadd.f32 %v1271_v52, %v772_v23  ;;  %v1273_v36 = vpop.f32.mrb[1].mxu1  ;;  %v5776_v52 = vpack.c.bf16 %v1557_v63, %v1555_v49  ;;  %v1697_v23 = vld [vmem:[#allocation4 + $0x658] sm:$0xff]  ;;  %v1560_v49 = vld [vmem:[#allocation4 + $0x450] sm:$0xff] }
 0x2f7   : > { %v5768_v58 = vadd.f32 %v1273_v36, %v773_v55  ;;  %v1695_v55 = vld [vmem:[#allocation4 + $0x648] sm:$0xff]  ;;  %v1694_v36 = vld [vmem:[#allocation4 + $0x640] sm:$0xff]  ;;  %v1696_v63 = vld [vmem:[#allocation4 + $0x650] sm:$0xff]  ;;  %v5798_v45 = vpack.c.bf16 %v1560_v49, %v1558_v1 }
 0x2f8   : > { %7193 = vst [vmem:[#allocation38_spill] sm:$0xff] %v5776_v52  ;;  %v5792_v27 = vpack.c.bf16 %v1697_v23, %v1695_v55  ;;  %v5800_v28 = vpack.c.bf16 %v1696_v63, %v1694_v36  ;;  %v1564_v55 = vld [vmem:[#allocation4 + $0x470] sm:$0xff]  ;;  %v5804_v23 = vpack.c.bf16 %v1565_v37, %v1563_v2  ;;  %v1566_v36 = vld [vmem:[#allocation4 + $0x480] sm:$0xff] }
 0x2f9   : > { %7190 = vst [vmem:[#allocation35_spill] sm:$0xff] %v5768_v58  ;;  %1406 = vmatprep.mubr.f32.mxu0 %v5768_v58  ;;  %1542 = vmatprep.mubr.f32.mxu1 %v5768_v58  ;;  %7199 = vst [vmem:[#allocation44_spill] sm:$0xff] %v5798_v45  ;;  %v5810_v1 = vpack.c.bf16 %v1564_v55, %v1562_v61  ;;  %v1568_v63 = vld [vmem:[#allocation4 + $0x490] sm:$0xff]  ;;  %v1570_v61 = vld [vmem:[#allocation4 + $0x4a0] sm:$0xff] }
 0x2fa   : > { %1407 = vmatmul.mubr.f32.vlgmr.msra.gmra.mrb[10].mxu0 %v5766_v18  ;;  %1543 = vmatmul.mubr.f32.vlgmr.msra.gmra.mrb[2].mxu1 %v5766_v18  ;;  %7198 = vst [vmem:[#allocation43_spill] sm:$0xff] %v5792_v27  ;;  %7200 = vst [vmem:[#allocation45_spill] sm:$0xff] %v5800_v28  ;;  %v1572_v55 = vld [vmem:[#allocation4 + $0x4b0] sm:$0xff] }
 0x2fb   : > { %4136 = vmatpush1.bf16.msra.mxu0 %v5770_v43  ;;  %4200 = vmatpush1.bf16.msra.mxu1 %v5772_v40  ;;  %7201 = vst [vmem:[#allocation46_spill] sm:$0xff] %v5804_v23  ;;  %v1700_v40 = vld [vmem:[#allocation4 + $0x670] sm:$0xff]  ;;  %v1567_v43 = vld [vmem:[#allocation4 + $0x488] sm:$0xff]  ;;  %7203 = vst [vmem:[#allocation48_spill] sm:$0xff] %v5810_v1 }
 0x2fc   : > { %1678 = vmatprep.mubr.f32.mxu0 %v5768_v58  ;;  %1814 = vmatprep.mubr.f32.mxu1 %v5768_v58 }
 0x2fd   : > { %4138 = vmatprep.subr.bf16.mxu0 %v5776_v52  ;;  %4202 = vmatprep.subr.bf16.mxu1 %v5778_v50  ;;  %v5806_v50 = vpack.c.bf16 %v1701_v34, %v1699_v31  ;;  %v1698_v52 = vld [vmem:[#allocation4 + $0x660] sm:$0xff]  ;;  %v1704_v34 = vld [vmem:[#allocation4 + $0x690] sm:$0xff] }
 0x2fe   : > { %v5812_v49 = vpack.c.bf16 %v1700_v40, %v1698_v52  ;;  %v1702_v31 = vld [vmem:[#allocation4 + $0x680] sm:$0xff]  ;;  %v5822_v40 = vpack.c.bf16 %v1568_v63, %v1566_v36  ;;  %v5834_v36 = vpack.c.bf16 %v1572_v55, %v1570_v61 }
 0x2ff   : > { %4140 = vmatpush1.bf16.msra.mxu0 %v5784_v9  ;;  %4204 = vmatpush1.bf16.msra.mxu1 %v5786_v41  ;;  %7202 = vst [vmem:[#allocation47_spill] sm:$0xff] %v5806_v50  ;;  %v1569_v9 = vld [vmem:[#allocation4 + $0x498] sm:$0xff]  ;;  %v5824_v52 = vpack.c.bf16 %v1704_v34, %v1702_v31  ;;  %v1574_v31 = vld [vmem:[#allocation4 + $0x4c0] sm:$0xff]  ;;  %v1576_v34 = vld [vmem:[#allocation4 + $0x4d0] sm:$0xff] }
 0x300   : > { %4142 = vmatprep.subr.bf16.mxu0 %v5790_v46  ;;  %4206 = vmatprep.subr.bf16.mxu1 %v5792_v27  ;;  %v1705_v41 = vld [vmem:[#allocation4 + $0x698] sm:$0xff]  ;;  %7204 = vst [vmem:[#allocation49_spill] sm:$0xff] %v5812_v49  ;;  %v5816_v2 = vpack.c.bf16 %v1569_v9, %v1567_v43  ;;  %v1571_v27 = vld [vmem:[#allocation4 + $0x4a8] sm:$0xff]  ;;  %7207 = vst [vmem:[#allocation52_spill] sm:$0xff] %v5822_v40  ;;  %v5846_v61 = vpack.c.bf16 %v1576_v34, %v1574_v31 }
 0x301   : > { %v5818_v37 = vpack.c.bf16 %v1705_v41, %v1703_v25  ;;  %v1707_v46 = vld [vmem:[#allocation4 + $0x6a8] sm:$0xff]  ;;  %7208 = vst [vmem:[#allocation53_spill] sm:$0xff] %v5824_v52  ;;  %v1706_v9 = vld [vmem:[#allocation4 + $0x6a0] sm:$0xff]  ;;  %v1708_v41 = vld [vmem:[#allocation4 + $0x6b0] sm:$0xff] }
 0x302   : > { %7205 = vst [vmem:[#allocation50_spill] sm:$0xff] %v5816_v2  ;;  %7211 = vst [vmem:[#allocation56_spill] sm:$0xff] %v5834_v36  ;;  %v5836_v63 = vpack.c.bf16 %v1708_v41, %v1706_v9  ;;  %v1578_v9 = vld [vmem:[#allocation4 + $0x4e0] sm:$0xff]  ;;  %v1580_v41 = vld [vmem:[#allocation4 + $0x4f0] sm:$0xff] }
 0x303   : > { %4144 = vmatpush1.bf16.msra.mxu0 %v5798_v45  ;;  %4208 = vmatpush1.bf16.msra.mxu1 %v5800_v28  ;;  %7206 = vst [vmem:[#allocation51_spill] sm:$0xff] %v5818_v37  ;;  %v1573_v45 = vld [vmem:[#allocation4 + $0x4b8] sm:$0xff]  ;;  %7215 = vst [vmem:[#allocation60_spill] sm:$0xff] %v5846_v61  ;;  %v5858_v31 = vpack.c.bf16 %v1580_v41, %v1578_v9 }
 0x304   : > { %4146 = vmatprep.subr.bf16.mxu0 %v5804_v23  ;;  %4210 = vmatprep.subr.bf16.mxu1 %v5806_v50  ;;  %v1709_v28 = vld [vmem:[#allocation4 + $0x6b8] sm:$0xff]  ;;  %v5828_v25 = vpack.c.bf16 %v1573_v45, %v1571_v27  ;;  %v1575_v50 = vld [vmem:[#allocation4 + $0x4c8] sm:$0xff]  ;;  %7212 = vst [vmem:[#allocation57_spill] sm:$0xff] %v5836_v63  ;;  %v1710_v45 = vld [vmem:[#allocation4 + $0x6c0] sm:$0xff] }
 0x305   : > { %v5830_v43 = vpack.c.bf16 %v1709_v28, %v1707_v46  ;;  %v1711_v23 = vld [vmem:[#allocation4 + $0x6c8] sm:$0xff]  ;;  %v1712_v28 = vld [vmem:[#allocation4 + $0x6d0] sm:$0xff]  ;;  %7219 = vst [vmem:[#allocation64_spill] sm:$0xff] %v5858_v31 }
 0x306   : > { %7209 = vst [vmem:[#allocation54_spill] sm:$0xff] %v5828_v25  ;;  %v5848_v55 = vpack.c.bf16 %v1712_v28, %v1710_v45  ;;  %v1582_v45 = vld [vmem:[#allocation4 + $0x500] sm:$0xff]  ;;  %v1584_v28 = vld [vmem:[#allocation4 + $0x510] sm:$0xff] }
 0x307   : > { %4148 = vmatpush1.bf16.msra.mxu0 %v5810_v1  ;;  %4212 = vmatpush1.bf16.msra.mxu1 %v5812_v49  ;;  %7210 = vst [vmem:[#allocation55_spill] sm:$0xff] %v5830_v43  ;;  %v1577_v1 = vld [vmem:[#allocation4 + $0x4d8] sm:$0xff]  ;;  %v5870_v9 = vpack.c.bf16 %v1584_v28, %v1582_v45 }
 0x308   : > { %4150 = vmatprep.subr.bf16.mxu0 %v5816_v2  ;;  %4214 = vmatprep.subr.bf16.mxu1 %v5818_v37  ;;  %v1713_v49 = vld [vmem:[#allocation4 + $0x6d8] sm:$0xff]  ;;  %v5840_v46 = vpack.c.bf16 %v1577_v1, %v1575_v50  ;;  %v1579_v37 = vld [vmem:[#allocation4 + $0x4e8] sm:$0xff]  ;;  %7216 = vst [vmem:[#allocation61_spill] sm:$0xff] %v5848_v55  ;;  %v1714_v1 = vld [vmem:[#allocation4 + $0x6e0] sm:$0xff] }
 0x309   : > { %v5842_v27 = vpack.c.bf16 %v1713_v49, %v1711_v23  ;;  %v1715_v2 = vld [vmem:[#allocation4 + $0x6e8] sm:$0xff]  ;;  %v1716_v49 = vld [vmem:[#allocation4 + $0x6f0] sm:$0xff]  ;;  %7223 = vst [vmem:[#allocation68_spill] sm:$0xff] %v5870_v9 }
 0x30a   : > { %7213 = vst [vmem:[#allocation58_spill] sm:$0xff] %v5840_v46  ;;  %v5860_v34 = vpack.c.bf16 %v1716_v49, %v1714_v1  ;;  %v1586_v1 = vld [vmem:[#allocation4 + $0x520] sm:$0xff]  ;;  %v1588_v49 = vld [vmem:[#allocation4 + $0x530] sm:$0xff] }
 0x30b   : > { %4152 = vmatpush1.bf16.msra.mxu0 %v5822_v40  ;;  %4216 = vmatpush1.bf16.msra.mxu1 %v5824_v52  ;;  %7214 = vst [vmem:[#allocation59_spill] sm:$0xff] %v5842_v27  ;;  %v1581_v40 = vld [vmem:[#allocation4 + $0x4f8] sm:$0xff]  ;;  %v5882_v45 = vpack.c.bf16 %v1588_v49, %v1586_v1 }
 0x30c   : > { %4154 = vmatprep.subr.bf16.mxu0 %v5828_v25  ;;  %4218 = vmatprep.subr.bf16.mxu1 %v5830_v43  ;;  %v1717_v52 = vld [vmem:[#allocation4 + $0x6f8] sm:$0xff]  ;;  %v5852_v50 = vpack.c.bf16 %v1581_v40, %v1579_v37  ;;  %v1583_v43 = vld [vmem:[#allocation4 + $0x508] sm:$0xff]  ;;  %7220 = vst [vmem:[#allocation65_spill] sm:$0xff] %v5860_v34  ;;  %v1718_v40 = vld [vmem:[#allocation4 + $0x700] sm:$0xff] }
 0x30d   : > { %v5854_v23 = vpack.c.bf16 %v1717_v52, %v1715_v2  ;;  %v1719_v25 = vld [vmem:[#allocation4 + $0x708] sm:$0xff]  ;;  %v1720_v52 = vld [vmem:[#allocation4 + $0x710] sm:$0xff]  ;;  %7227 = vst [vmem:[#allocation72_spill] sm:$0xff] %v5882_v45 }
 0x30e   : > { %7217 = vst [vmem:[#allocation62_spill] sm:$0xff] %v5852_v50  ;;  %v5872_v41 = vpack.c.bf16 %v1720_v52, %v1718_v40  ;;  %v1590_v40 = vld [vmem:[#allocation4 + $0x540] sm:$0xff]  ;;  %v1592_v52 = vld [vmem:[#allocation4 + $0x550] sm:$0xff] }
 0x30f   : > { %4156 = vmatpush1.bf16.msra.mxu0 %v5834_v36  ;;  %4220 = vmatpush1.bf16.msra.mxu1 %v5836_v63  ;;  %7218 = vst [vmem:[#allocation63_spill] sm:$0xff] %v5854_v23  ;;  %v1585_v36 = vld [vmem:[#allocation4 + $0x518] sm:$0xff]  ;;  %v5894_v1 = vpack.c.bf16 %v1592_v52, %v1590_v40 }
 0x310   : > { %4158 = vmatprep.subr.bf16.mxu0 %v5840_v46  ;;  %4222 = vmatprep.subr.bf16.mxu1 %v5842_v27  ;;  %v1721_v63 = vld [vmem:[#allocation4 + $0x718] sm:$0xff]  ;;  %v5864_v2 = vpack.c.bf16 %v1585_v36, %v1583_v43  ;;  %v1587_v27 = vld [vmem:[#allocation4 + $0x528] sm:$0xff]  ;;  %7224 = vst [vmem:[#allocation69_spill] sm:$0xff] %v5872_v41  ;;  %v1722_v36 = vld [vmem:[#allocation4 + $0x720] sm:$0xff] }
 0x311   : > { %v5866_v37 = vpack.c.bf16 %v1721_v63, %v1719_v25  ;;  %v1723_v46 = vld [vmem:[#allocation4 + $0x728] sm:$0xff]  ;;  %v1724_v63 = vld [vmem:[#allocation4 + $0x730] sm:$0xff]  ;;  %7231 = vst [vmem:[#allocation76_spill] sm:$0xff] %v5894_v1 }
 0x312   : > { %7221 = vst [vmem:[#allocation66_spill] sm:$0xff] %v5864_v2  ;;  %v5884_v28 = vpack.c.bf16 %v1724_v63, %v1722_v36  ;;  %v1594_v36 = vld [vmem:[#allocation4 + $0x560] sm:$0xff]  ;;  %v1596_v63 = vld [vmem:[#allocation4 + $0x570] sm:$0xff] }
 0x313   : > { %4160 = vmatpush1.bf16.msra.mxu0 %v5846_v61  ;;  %4224 = vmatpush1.bf16.msra.mxu1 %v5848_v55  ;;  %7222 = vst [vmem:[#allocation67_spill] sm:$0xff] %v5866_v37  ;;  %v1589_v61 = vld [vmem:[#allocation4 + $0x538] sm:$0xff]  ;;  %v5906_v40 = vpack.c.bf16 %v1596_v63, %v1594_v36 }
 0x314   : > { %4162 = vmatprep.subr.bf16.mxu0 %v5852_v50  ;;  %4226 = vmatprep.subr.bf16.mxu1 %v5854_v23  ;;  %v1725_v55 = vld [vmem:[#allocation4 + $0x738] sm:$0xff]  ;;  %v5876_v25 = vpack.c.bf16 %v1589_v61, %v1587_v27  ;;  %v1591_v23 = vld [vmem:[#allocation4 + $0x548] sm:$0xff]  ;;  %7228 = vst [vmem:[#allocation73_spill] sm:$0xff] %v5884_v28  ;;  %v1726_v61 = vld [vmem:[#allocation4 + $0x740] sm:$0xff] }
 0x315   : > { %v5878_v43 = vpack.c.bf16 %v1725_v55, %v1723_v46  ;;  %v1727_v50 = vld [vmem:[#allocation4 + $0x748] sm:$0xff]  ;;  %v1728_v55 = vld [vmem:[#allocation4 + $0x750] sm:$0xff]  ;;  %7235 = vst [vmem:[#allocation80_spill] sm:$0xff] %v5906_v40 }
 0x316   : > { %7225 = vst [vmem:[#allocation70_spill] sm:$0xff] %v5876_v25  ;;  %v5896_v49 = vpack.c.bf16 %v1728_v55, %v1726_v61  ;;  %v1598_v61 = vld [vmem:[#allocation4 + $0x580] sm:$0xff]  ;;  %v1600_v55 = vld [vmem:[#allocation4 + $0x590] sm:$0xff] }
 0x317   : > { %4164 = vmatpush1.bf16.msra.mxu0 %v5858_v31  ;;  %4228 = vmatpush1.bf16.msra.mxu1 %v5860_v34  ;;  %7226 = vst [vmem:[#allocation71_spill] sm:$0xff] %v5878_v43  ;;  %v1593_v31 = vld [vmem:[#allocation4 + $0x558] sm:$0xff]  ;;  %v5918_v36 = vpack.c.bf16 %v1600_v55, %v1598_v61 }
 0x318   : > { %4166 = vmatprep.subr.bf16.mxu0 %v5864_v2  ;;  %4230 = vmatprep.subr.bf16.mxu1 %v5866_v37  ;;  %v1729_v34 = vld [vmem:[#allocation4 + $0x758] sm:$0xff]  ;;  %v5888_v46 = vpack.c.bf16 %v1593_v31, %v1591_v23  ;;  %v1595_v37 = vld [vmem:[#allocation4 + $0x568] sm:$0xff]  ;;  %7232 = vst [vmem:[#allocation77_spill] sm:$0xff] %v5896_v49  ;;  %v1730_v31 = vld [vmem:[#allocation4 + $0x760] sm:$0xff] }
 0x319   : > { %v5890_v27 = vpack.c.bf16 %v1729_v34, %v1727_v50  ;;  %v1731_v2 = vld [vmem:[#allocation4 + $0x768] sm:$0xff]  ;;  %v1732_v34 = vld [vmem:[#allocation4 + $0x770] sm:$0xff]  ;;  %7239 = vst [vmem:[#allocation84_spill] sm:$0xff] %v5918_v36 }
 0x31a   : > { %7229 = vst [vmem:[#allocation74_spill] sm:$0xff] %v5888_v46  ;;  %v5908_v52 = vpack.c.bf16 %v1732_v34, %v1730_v31  ;;  %v1602_v31 = vld [vmem:[#allocation4 + $0x5a0] sm:$0xff]  ;;  %v1604_v34 = vld [vmem:[#allocation4 + $0x5b0] sm:$0xff] }
 0x31b   : > { %4168 = vmatpush1.bf16.msra.mxu0 %v5870_v9  ;;  %4232 = vmatpush1.bf16.msra.mxu1 %v5872_v41  ;;  %7230 = vst [vmem:[#allocation75_spill] sm:$0xff] %v5890_v27  ;;  %v1597_v9 = vld [vmem:[#allocation4 + $0x578] sm:$0xff]  ;;  %v5930_v61 = vpack.c.bf16 %v1604_v34, %v1602_v31 }
 0x31c   : > { %4170 = vmatprep.subr.bf16.mxu0 %v5876_v25  ;;  %4234 = vmatprep.subr.bf16.mxu1 %v5878_v43  ;;  %v1733_v41 = vld [vmem:[#allocation4 + $0x778] sm:$0xff]  ;;  %v5900_v50 = vpack.c.bf16 %v1597_v9, %v1595_v37  ;;  %v1599_v43 = vld [vmem:[#allocation4 + $0x588] sm:$0xff]  ;;  %7236 = vst [vmem:[#allocation81_spill] sm:$0xff] %v5908_v52  ;;  %v1734_v9 = vld [vmem:[#allocation4 + $0x780] sm:$0xff] }
 0x31d   : > { %v5902_v23 = vpack.c.bf16 %v1733_v41, %v1731_v2  ;;  %v1735_v25 = vld [vmem:[#allocation4 + $0x788] sm:$0xff]  ;;  %v1736_v41 = vld [vmem:[#allocation4 + $0x790] sm:$0xff]  ;;  %7243 = vst [vmem:[#allocation88_spill] sm:$0xff] %v5930_v61 }
 0x31e   : > { %7233 = vst [vmem:[#allocation78_spill] sm:$0xff] %v5900_v50  ;;  %v5920_v63 = vpack.c.bf16 %v1736_v41, %v1734_v9  ;;  %v1606_v9 = vld [vmem:[#allocation4 + $0x5c0] sm:$0xff]  ;;  %v1608_v41 = vld [vmem:[#allocation4 + $0x5d0] sm:$0xff] }
 0x31f   : > { %4172 = vmatpush1.bf16.msra.mxu0 %v5882_v45  ;;  %4236 = vmatpush1.bf16.msra.mxu1 %v5884_v28  ;;  %7234 = vst [vmem:[#allocation79_spill] sm:$0xff] %v5902_v23  ;;  %v1601_v45 = vld [vmem:[#allocation4 + $0x598] sm:$0xff]  ;;  %v5942_v31 = vpack.c.bf16 %v1608_v41, %v1606_v9 }
 0x320   : > { %4174 = vmatprep.subr.bf16.mxu0 %v5888_v46  ;;  %4238 = vmatprep.subr.bf16.mxu1 %v5890_v27  ;;  %v1737_v28 = vld [vmem:[#allocation4 + $0x798] sm:$0xff]  ;;  %v5912_v2 = vpack.c.bf16 %v1601_v45, %v1599_v43  ;;  %v1603_v27 = vld [vmem:[#allocation4 + $0x5a8] sm:$0xff]  ;;  %7240 = vst [vmem:[#allocation85_spill] sm:$0xff] %v5920_v63  ;;  %v1738_v45 = vld [vmem:[#allocation4 + $0x7a0] sm:$0xff] }
 0x321   : > { %v5914_v37 = vpack.c.bf16 %v1737_v28, %v1735_v25  ;;  %v1739_v46 = vld [vmem:[#allocation4 + $0x7a8] sm:$0xff]  ;;  %v1740_v28 = vld [vmem:[#allocation4 + $0x7b0] sm:$0xff]  ;;  %7247 = vst [vmem:[#allocation92_spill] sm:$0xff] %v5942_v31 }
 0x322   : > { %7237 = vst [vmem:[#allocation82_spill] sm:$0xff] %v5912_v2  ;;  %v5932_v55 = vpack.c.bf16 %v1740_v28, %v1738_v45  ;;  %v1610_v45 = vld [vmem:[#allocation4 + $0x5e0] sm:$0xff]  ;;  %v1612_v28 = vld [vmem:[#allocation4 + $0x5f0] sm:$0xff] }
 0x323   : > { %4176 = vmatpush1.bf16.msra.mxu0 %v5894_v1  ;;  %4240 = vmatpush1.bf16.msra.mxu1 %v5896_v49  ;;  %7238 = vst [vmem:[#allocation83_spill] sm:$0xff] %v5914_v37  ;;  %v1605_v1 = vld [vmem:[#allocation4 + $0x5b8] sm:$0xff]  ;;  %v5954_v9 = vpack.c.bf16 %v1612_v28, %v1610_v45 }
 0x324   : > { %4178 = vmatprep.subr.bf16.mxu0 %v5900_v50  ;;  %4242 = vmatprep.subr.bf16.mxu1 %v5902_v23  ;;  %v1741_v49 = vld [vmem:[#allocation4 + $0x7b8] sm:$0xff]  ;;  %v5924_v25 = vpack.c.bf16 %v1605_v1, %v1603_v27  ;;  %v1607_v23 = vld [vmem:[#allocation4 + $0x5c8] sm:$0xff]  ;;  %7244 = vst [vmem:[#allocation89_spill] sm:$0xff] %v5932_v55  ;;  %v1742_v1 = vld [vmem:[#allocation4 + $0x7c0] sm:$0xff] }
 0x325   : > { %v5926_v43 = vpack.c.bf16 %v1741_v49, %v1739_v46  ;;  %v1743_v50 = vld [vmem:[#allocation4 + $0x7c8] sm:$0xff]  ;;  %v1744_v49 = vld [vmem:[#allocation4 + $0x7d0] sm:$0xff]  ;;  %7250 = vst [vmem:[#allocation95_spill] sm:$0xff] %v5954_v9 }
 0x326   : > { %7241 = vst [vmem:[#allocation86_spill] sm:$0xff] %v5924_v25  ;;  %v5944_v34 = vpack.c.bf16 %v1744_v49, %v1742_v1  ;;  %v1958_v1 = vld [vmem:[#allocation4 + $0xa00] sm:$0xff]  ;;  %v1960_v49 = vld [vmem:[#allocation4 + $0xa10] sm:$0xff] }
 0x327   : > { %4180 = vmatpush1.bf16.msra.mxu0 %v5906_v40  ;;  %4244 = vmatpush1.bf16.msra.mxu1 %v5908_v52  ;;  %7242 = vst [vmem:[#allocation87_spill] sm:$0xff] %v5926_v43  ;;  %v1609_v40 = vld [vmem:[#allocation4 + $0x5d8] sm:$0xff] }
 0x328   : > { %4182 = vmatprep.subr.bf16.mxu0 %v5912_v2  ;;  %4246 = vmatprep.subr.bf16.mxu1 %v5914_v37  ;;  %v1745_v52 = vld [vmem:[#allocation4 + $0x7d8] sm:$0xff]  ;;  %v5936_v46 = vpack.c.bf16 %v1609_v40, %v1607_v23  ;;  %v1611_v37 = vld [vmem:[#allocation4 + $0x5e8] sm:$0xff]  ;;  %7248 = vst [vmem:[#allocation93_spill] sm:$0xff] %v5944_v34  ;;  %v1746_v40 = vld [vmem:[#allocation4 + $0x7e0] sm:$0xff] }
 0x329   : > { %v5938_v27 = vpack.c.bf16 %v1745_v52, %v1743_v50  ;;  %v1747_v2 = vld [vmem:[#allocation4 + $0x7e8] sm:$0xff]  ;;  %v1748_v52 = vld [vmem:[#allocation4 + $0x7f0] sm:$0xff] }
 0x32a   : > { %7245 = vst [vmem:[#allocation90_spill] sm:$0xff] %v5936_v46  ;;  %v5956_v41 = vpack.c.bf16 %v1748_v52, %v1746_v40  ;;  %v1964_v52 = vld [vmem:[#allocation4 + $0xa30] sm:$0xff] }
 0x32b   : > { %4184 = vmatpush1.bf16.msra.mxu0 %v5918_v36  ;;  %4248 = vmatpush1.bf16.msra.mxu1 %v5920_v63  ;;  %7246 = vst [vmem:[#allocation91_spill] sm:$0xff] %v5938_v27  ;;  %v1613_v36 = vld [vmem:[#allocation4 + $0x5f8] sm:$0xff] }
 0x32c   : > { %4186 = vmatprep.subr.bf16.mxu0 %v5924_v25  ;;  %4250 = vmatprep.subr.bf16.mxu1 %v5926_v43  ;;  %v1749_v63 = vld [vmem:[#allocation4 + $0x7f8] sm:$0xff]  ;;  %v5948_v50 = vpack.c.bf16 %v1613_v36, %v1611_v37  ;;  %v1823_v43 = vld [vmem:[#allocation4 + $0x808] sm:$0xff]  ;;  %7251 = vst [vmem:[#allocation96_spill] sm:$0xff] %v5956_v41  ;;  %v1822_v36 = vld [vmem:[#allocation4 + $0x800] sm:$0xff] }
 0x32d   : > { %v5950_v23 = vpack.c.bf16 %v1749_v63, %v1747_v2  ;;  %v1959_v25 = vld [vmem:[#allocation4 + $0xa08] sm:$0xff]  ;;  %v1824_v63 = vld [vmem:[#allocation4 + $0x810] sm:$0xff] }
 0x32e   : > { %v5966_v45 = vpack.c.bf16 %v1824_v63, %v1822_v36  ;;  %v1967_v36 = vld [vmem:[#allocation4 + $0xa48] sm:$0xff]  ;;  %v1969_v63 = vld [vmem:[#allocation4 + $0xa58] sm:$0xff] }
 0x32f   : > { %4188 = vmatpush1.bf16.msra.mxu0 %v5930_v61  ;;  %4252 = vmatpush1.bf16.msra.mxu1 %v5932_v55  ;;  %7249 = vst [vmem:[#allocation94_spill] sm:$0xff] %v5950_v23  ;;  %v1825_v61 = vld [vmem:[#allocation4 + $0x818] sm:$0xff] }
 0x330   : > { %4190 = vmatprep.subr.bf16.mxu0 %v5936_v46  ;;  %4254 = vmatprep.subr.bf16.mxu1 %v5938_v27  ;;  %v1961_v55 = vld [vmem:[#allocation4 + $0xa18] sm:$0xff]  ;;  %v5960_v2 = vpack.c.bf16 %v1825_v61, %v1823_v43  ;;  %v1827_v27 = vld [vmem:[#allocation4 + $0x828] sm:$0xff]  ;;  %7254 = vst [vmem:[#allocation99_spill] sm:$0xff] %v5966_v45  ;;  %v1826_v43 = vld [vmem:[#allocation4 + $0x820] sm:$0xff] }
 0x331   : > { %v5962_v37 = vpack.c.bf16 %v1961_v55, %v1959_v25  ;;  %v1963_v46 = vld [vmem:[#allocation4 + $0xa28] sm:$0xff]  ;;  %v5970_v25 = vpack.c.bf16 %v1960_v49, %v1958_v1  ;;  %v1828_v61 = vld [vmem:[#allocation4 + $0x830] sm:$0xff]  ;;  %v1962_v55 = vld [vmem:[#allocation4 + $0xa20] sm:$0xff] }
 0x332   : > { %7252 = vst [vmem:[#allocation97_spill] sm:$0xff] %v5960_v2  ;;  %v5980_v1 = vpack.c.bf16 %v1828_v61, %v1826_v43  ;;  %v1966_v49 = vld [vmem:[#allocation4 + $0xa40] sm:$0xff]  ;;  %v1835_v43 = vld [vmem:[#allocation4 + $0x868] sm:$0xff]  ;;  %v1837_v61 = vld [vmem:[#allocation4 + $0x878] sm:$0xff] }
 0x333   : > { %4192 = vmatpush1.bf16.msra.mxu0 %v5942_v31  ;;  %4256 = vmatpush1.bf16.msra.mxu1 %v5944_v34  ;;  %7253 = vst [vmem:[#allocation98_spill] sm:$0xff] %v5962_v37  ;;  %v1829_v31 = vld [vmem:[#allocation4 + $0x838] sm:$0xff]  ;;  %7255 = vst [vmem:[#allocation100_spill] sm:$0xff] %v5970_v25 }
 0x334   : > { %4194 = vmatprep.subr.bf16.mxu0 %v5948_v50  ;;  %4258 = vmatprep.subr.bf16.mxu1 %v5950_v23  ;;  %v1965_v34 = vld [vmem:[#allocation4 + $0xa38] sm:$0xff]  ;;  %v5972_v28 = vpack.c.bf16 %v1829_v31, %v1827_v27  ;;  %v1831_v23 = vld [vmem:[#allocation4 + $0x848] sm:$0xff]  ;;  %7258 = vst [vmem:[#allocation103_spill] sm:$0xff] %v5980_v1  ;;  %v1830_v31 = vld [vmem:[#allocation4 + $0x840] sm:$0xff] }
 0x335   : > { %v5974_v40 = vpack.c.bf16 %v1965_v34, %v1963_v46  ;;  %v5984_v46 = vpack.c.bf16 %v1964_v52, %v1962_v55  ;;  %v1832_v34 = vld [vmem:[#allocation4 + $0x850] sm:$0xff]  ;;  %v1834_v52 = vld [vmem:[#allocation4 + $0x860] sm:$0xff] }
 0x336   : > { %7256 = vst [vmem:[#allocation101_spill] sm:$0xff] %v5972_v28  ;;  %v5993_v55 = vpack.c.bf16 %v1832_v34, %v1830_v31  ;;  %v1975_v31 = vld [vmem:[#allocation4 + $0xa88] sm:$0xff]  ;;  %v1977_v34 = vld [vmem:[#allocation4 + $0xa98] sm:$0xff] }
 0x337   : > { %4196 = vmatpush1.bf16.msra.mxu0 %v5954_v9  ;;  %4260 = vmatpush1.bf16.msra.mxu1 %v5956_v41  ;;  %7257 = vst [vmem:[#allocation102_spill] sm:$0xff] %v5974_v40  ;;  %v1833_v9 = vld [vmem:[#allocation4 + $0x858] sm:$0xff]  ;;  %7259 = vst [vmem:[#allocation104_spill] sm:$0xff] %v5984_v46  ;;  %v1839_v41 = vld [vmem:[#allocation4 + $0x888] sm:$0xff] }
 0x338   : > { %4262 = vmatprep.subr.bf16.mxu0 %v5960_v2  ;;  %4326 = vmatprep.subr.bf16.mxu1 %v5962_v37  ;;  %v5986_v27 = vpack.c.bf16 %v1833_v9, %v1831_v23  ;;  %v1968_v37 = vld [vmem:[#allocation4 + $0xa50] sm:$0xff]  ;;  %v1971_v2 = vld [vmem:[#allocation4 + $0xa68] sm:$0xff]  ;;  %7262 = vst [vmem:[#allocation107_spill] sm:$0xff] %v5993_v55  ;;  %v5999_v9 = vpack.c.bf16 %v1837_v61, %v1835_v43  ;;  %v1838_v43 = vld [vmem:[#allocation4 + $0x880] sm:$0xff] }
 0x339   : > { %v5997_v23 = vpack.c.bf16 %v1968_v37, %v1966_v49  ;;  %v6014_v61 = vpack.c.bf16 %v1977_v34, %v1975_v31  ;;  %v1978_v31 = vld [vmem:[#allocation4 + $0xaa0] sm:$0xff] }
 0x33a   : > { %1679 = vmatmul.mubr.f32.vlgmr.msra.gmra.mrb[12].mxu0 %v5766_v18  ;;  %1815 = vmatmul.mubr.f32.vlgmr.msra.gmra.mrb[4].mxu1 %v5766_v18  ;;  %7260 = vst [vmem:[#allocation105_spill] sm:$0xff] %v5986_v27  ;;  %7264 = vst [vmem:[#allocation109_spill] sm:$0xff] %v5999_v9 }
 0x33b   : > { %4264 = vmatpush1.bf16.msra.mxu0 %v5966_v45  ;;  %1950 = vmatprep.mubr.f32.mxu0 %v5768_v58  ;;  %v5990_v45 = vpack.c.bf16 %v1969_v63, %v1967_v36  ;;  %7263 = vst [vmem:[#allocation108_spill] sm:$0xff] %v5997_v23  ;;  %v1836_v36 = vld [vmem:[#allocation4 + $0x870] sm:$0xff]  ;;  %v1970_v63 = vld [vmem:[#allocation4 + $0xa60] sm:$0xff]  ;;  %7269 = vst [vmem:[#allocation114_spill] sm:$0xff] %v6014_v61 }
 0x33c   : > { %4328 = vmatpush1.bf16.msra.mxu1 %v5970_v25  ;;  %2086 = vmatprep.mubr.f32.mxu1 %v5768_v58  ;;  %v1973_v25 = vld [vmem:[#allocation4 + $0xa78] sm:$0xff] }
 0x33d   : > { %4266 = vmatprep.subr.bf16.mxu0 %v5972_v28  ;;  %4330 = vmatprep.subr.bf16.mxu1 %v5974_v40  ;;  %7261 = vst [vmem:[#allocation106_spill] sm:$0xff] %v5990_v45  ;;  %v6002_v40 = vpack.c.bf16 %v1973_v25, %v1971_v2  ;;  %v1972_v28 = vld [vmem:[#allocation4 + $0xa70] sm:$0xff]  ;;  %v1974_v25 = vld [vmem:[#allocation4 + $0xa80] sm:$0xff] }
 0x33e   : > { %v6009_v37 = vpack.c.bf16 %v1972_v28, %v1970_v63  ;;  %v1840_v2 = vld [vmem:[#allocation4 + $0x890] sm:$0xff] }
 0x33f   : > { %4268 = vmatpush1.bf16.msra.mxu0 %v5980_v1  ;;  %7265 = vst [vmem:[#allocation110_spill] sm:$0xff] %v6002_v40  ;;  %v1841_v1 = vld [vmem:[#allocation4 + $0x898] sm:$0xff]  ;;  %v1844_v63 = vld [vmem:[#allocation4 + $0x8b0] sm:$0xff] }
 0x340   : > { %4332 = vmatpush1.bf16.msra.mxu1 %v5984_v46  ;;  %4270 = vmatprep.subr.bf16.mxu0 %v5986_v27  ;;  %v6005_v46 = vpack.c.bf16 %v1836_v36, %v1834_v52  ;;  %7267 = vst [vmem:[#allocation112_spill] sm:$0xff] %v6009_v37  ;;  %v6011_v49 = vpack.c.bf16 %v1841_v1, %v1839_v41  ;;  %v1843_v27 = vld [vmem:[#allocation4 + $0x8a8] sm:$0xff]  ;;  %v1981_v36 = vld [vmem:[#allocation4 + $0xab8] sm:$0xff]  ;;  %v1842_v1 = vld [vmem:[#allocation4 + $0x8a0] sm:$0xff] }
 0x341   : > { %4334 = vmatprep.subr.bf16.mxu1 %v5990_v45  ;;  %v1976_v45 = vld [vmem:[#allocation4 + $0xa90] sm:$0xff]  ;;  %v1979_v52 = vld [vmem:[#allocation4 + $0xaa8] sm:$0xff] }
 0x342   : > { %7266 = vst [vmem:[#allocation111_spill] sm:$0xff] %v6005_v46  ;;  %7268 = vst [vmem:[#allocation113_spill] sm:$0xff] %v6011_v49  ;;  %v6021_v41 = vpack.c.bf16 %v1976_v45, %v1974_v25  ;;  %v6026_v34 = vpack.c.bf16 %v1981_v36, %v1979_v52  ;;  %v1848_v25 = vld [vmem:[#allocation4 + $0x8d0] sm:$0xff]  ;;  %v1982_v52 = vld [vmem:[#allocation4 + $0xac0] sm:$0xff] }
 0x343   : > { %4272 = vmatpush1.bf16.msra.mxu0 %v5993_v55  ;;  %v1845_v55 = vld [vmem:[#allocation4 + $0x8b8] sm:$0xff] }
 0x344   : > { %4336 = vmatpush1.bf16.msra.mxu1 %v5997_v23  ;;  %4274 = vmatprep.subr.bf16.mxu0 %v5999_v9  ;;  %v6017_v23 = vpack.c.bf16 %v1840_v2, %v1838_v43  ;;  %7271 = vst [vmem:[#allocation116_spill] sm:$0xff] %v6021_v41  ;;  %v6023_v28 = vpack.c.bf16 %v1845_v55, %v1843_v27  ;;  %7273 = vst [vmem:[#allocation118_spill] sm:$0xff] %v6026_v34  ;;  %v1847_v9 = vld [vmem:[#allocation4 + $0x8c8] sm:$0xff]  ;;  %v1985_v2 = vld [vmem:[#allocation4 + $0xad8] sm:$0xff] }
 0x345   : > { %4338 = vmatprep.subr.bf16.mxu1 %v6002_v40  ;;  %v1980_v40 = vld [vmem:[#allocation4 + $0xab0] sm:$0xff]  ;;  %v1983_v43 = vld [vmem:[#allocation4 + $0xac8] sm:$0xff]  ;;  %v1846_v55 = vld [vmem:[#allocation4 + $0x8c0] sm:$0xff] }
 0x346   : > { %7270 = vst [vmem:[#allocation115_spill] sm:$0xff] %v6017_v23  ;;  %7272 = vst [vmem:[#allocation117_spill] sm:$0xff] %v6023_v28  ;;  %v6033_v45 = vpack.c.bf16 %v1980_v40, %v1978_v31  ;;  %v6038_v36 = vpack.c.bf16 %v1985_v2, %v1983_v43  ;;  %v1852_v31 = vld [vmem:[#allocation4 + $0x8f0] sm:$0xff]  ;;  %v1986_v43 = vld [vmem:[#allocation4 + $0xae0] sm:$0xff] }
 0x347   : > { %4276 = vmatpush1.bf16.msra.mxu0 %v6005_v46  ;;  %v1849_v46 = vld [vmem:[#allocation4 + $0x8d8] sm:$0xff] }
 0x348   : > { %4340 = vmatpush1.bf16.msra.mxu1 %v6009_v37  ;;  %4278 = vmatprep.subr.bf16.mxu0 %v6011_v49  ;;  %v6029_v37 = vpack.c.bf16 %v1844_v63, %v1842_v1  ;;  %7275 = vst [vmem:[#allocation120_spill] sm:$0xff] %v6033_v45  ;;  %v6035_v27 = vpack.c.bf16 %v1849_v46, %v1847_v9  ;;  %7277 = vst [vmem:[#allocation122_spill] sm:$0xff] %v6038_v36  ;;  %v1851_v49 = vld [vmem:[#allocation4 + $0x8e8] sm:$0xff]  ;;  %v1989_v63 = vld [vmem:[#allocation4 + $0xaf8] sm:$0xff] }
 0x349   : > { %4342 = vmatprep.subr.bf16.mxu1 %v6014_v61  ;;  %v1984_v61 = vld [vmem:[#allocation4 + $0xad0] sm:$0xff]  ;;  %v1987_v1 = vld [vmem:[#allocation4 + $0xae8] sm:$0xff]  ;;  %v1850_v9 = vld [vmem:[#allocation4 + $0x8e0] sm:$0xff] }
 0x34a   : > { %7274 = vst [vmem:[#allocation119_spill] sm:$0xff] %v6029_v37  ;;  %7276 = vst [vmem:[#allocation121_spill] sm:$0xff] %v6035_v27  ;;  %v6045_v40 = vpack.c.bf16 %v1984_v61, %v1982_v52  ;;  %v6050_v2 = vpack.c.bf16 %v1989_v63, %v1987_v1  ;;  %v1854_v61 = vld [vmem:[#allocation4 + $0x900] sm:$0xff]  ;;  %v1856_v52 = vld [vmem:[#allocation4 + $0x910] sm:$0xff] }
 0x34b   : > { %4280 = vmatpush1.bf16.msra.mxu0 %v6017_v23  ;;  %v1853_v23 = vld [vmem:[#allocation4 + $0x8f8] sm:$0xff]  ;;  %v1990_v1 = vld [vmem:[#allocation4 + $0xb00] sm:$0xff] }
 0x34c   : > { %4344 = vmatpush1.bf16.msra.mxu1 %v6021_v41  ;;  %4282 = vmatprep.subr.bf16.mxu0 %v6023_v28  ;;  %v6041_v41 = vpack.c.bf16 %v1848_v25, %v1846_v55  ;;  %7279 = vst [vmem:[#allocation124_spill] sm:$0xff] %v6045_v40  ;;  %v6047_v46 = vpack.c.bf16 %v1853_v23, %v1851_v49  ;;  %7281 = vst [vmem:[#allocation126_spill] sm:$0xff] %v6050_v2  ;;  %v1855_v28 = vld [vmem:[#allocation4 + $0x908] sm:$0xff]  ;;  %v1993_v25 = vld [vmem:[#allocation4 + $0xb18] sm:$0xff] }
 0x34d   : > { %4346 = vmatprep.subr.bf16.mxu1 %v6026_v34  ;;  %v1988_v34 = vld [vmem:[#allocation4 + $0xaf0] sm:$0xff]  ;;  %v1991_v55 = vld [vmem:[#allocation4 + $0xb08] sm:$0xff] }
 0x34e   : > { %7278 = vst [vmem:[#allocation123_spill] sm:$0xff] %v6041_v41  ;;  %7280 = vst [vmem:[#allocation125_spill] sm:$0xff] %v6047_v46  ;;  %v6057_v23 = vpack.c.bf16 %v1988_v34, %v1986_v43  ;;  %v6062_v63 = vpack.c.bf16 %v1993_v25, %v1991_v55  ;;  %v1858_v34 = vld [vmem:[#allocation4 + $0x920] sm:$0xff]  ;;  %v1860_v43 = vld [vmem:[#allocation4 + $0x930] sm:$0xff] }
 0x34f   : > { %4284 = vmatpush1.bf16.msra.mxu0 %v6029_v37  ;;  %v1857_v37 = vld [vmem:[#allocation4 + $0x918] sm:$0xff]  ;;  %v1994_v55 = vld [vmem:[#allocation4 + $0xb20] sm:$0xff] }
 0x350   : > { %4348 = vmatpush1.bf16.msra.mxu1 %v6033_v45  ;;  %4286 = vmatprep.subr.bf16.mxu0 %v6035_v27  ;;  %v6053_v45 = vpack.c.bf16 %v1852_v31, %v1850_v9  ;;  %7283 = vst [vmem:[#allocation128_spill] sm:$0xff] %v6057_v23  ;;  %v6059_v49 = vpack.c.bf16 %v1857_v37, %v1855_v28  ;;  %7285 = vst [vmem:[#allocation130_spill] sm:$0xff] %v6062_v63  ;;  %v1859_v27 = vld [vmem:[#allocation4 + $0x928] sm:$0xff]  ;;  %v1997_v31 = vld [vmem:[#allocation4 + $0xb38] sm:$0xff] }
 0x351   : > { %4350 = vmatprep.subr.bf16.mxu1 %v6038_v36  ;;  %v1992_v36 = vld [vmem:[#allocation4 + $0xb10] sm:$0xff]  ;;  %v1995_v9 = vld [vmem:[#allocation4 + $0xb28] sm:$0xff] }
 0x352   : > { %7282 = vst [vmem:[#allocation127_spill] sm:$0xff] %v6053_v45  ;;  %7284 = vst [vmem:[#allocation129_spill] sm:$0xff] %v6059_v49  ;;  %v6069_v37 = vpack.c.bf16 %v1992_v36, %v1990_v1  ;;  %v6074_v25 = vpack.c.bf16 %v1997_v31, %v1995_v9  ;;  %v1862_v36 = vld [vmem:[#allocation4 + $0x940] sm:$0xff]  ;;  %v1864_v1 = vld [vmem:[#allocation4 + $0x950] sm:$0xff] }
 0x353   : > { %4288 = vmatpush1.bf16.msra.mxu0 %v6041_v41  ;;  %v1861_v41 = vld [vmem:[#allocation4 + $0x938] sm:$0xff]  ;;  %v1998_v9 = vld [vmem:[#allocation4 + $0xb40] sm:$0xff] }
 0x354   : > { %4352 = vmatpush1.bf16.msra.mxu1 %v6045_v40  ;;  %4290 = vmatprep.subr.bf16.mxu0 %v6047_v46  ;;  %v6065_v40 = vpack.c.bf16 %v1856_v52, %v1854_v61  ;;  %7287 = vst [vmem:[#allocation132_spill] sm:$0xff] %v6069_v37  ;;  %v6071_v28 = vpack.c.bf16 %v1861_v41, %v1859_v27  ;;  %7289 = vst [vmem:[#allocation134_spill] sm:$0xff] %v6074_v25  ;;  %v1863_v46 = vld [vmem:[#allocation4 + $0x948] sm:$0xff]  ;;  %v2001_v52 = vld [vmem:[#allocation4 + $0xb58] sm:$0xff] }
 0x355   : > { %4354 = vmatprep.subr.bf16.mxu1 %v6050_v2  ;;  %v1996_v2 = vld [vmem:[#allocation4 + $0xb30] sm:$0xff]  ;;  %v1999_v61 = vld [vmem:[#allocation4 + $0xb48] sm:$0xff] }
 0x356   : > { %7286 = vst [vmem:[#allocation131_spill] sm:$0xff] %v6065_v40  ;;  %7288 = vst [vmem:[#allocation133_spill] sm:$0xff] %v6071_v28  ;;  %v6081_v41 = vpack.c.bf16 %v1996_v2, %v1994_v55  ;;  %v6086_v31 = vpack.c.bf16 %v2001_v52, %v1999_v61  ;;  %v1866_v2 = vld [vmem:[#allocation4 + $0x960] sm:$0xff]  ;;  %v1868_v55 = vld [vmem:[#allocation4 + $0x970] sm:$0xff] }
 0x357   : > { %4292 = vmatpush1.bf16.msra.mxu0 %v6053_v45  ;;  %v1865_v45 = vld [vmem:[#allocation4 + $0x958] sm:$0xff]  ;;  %v2002_v61 = vld [vmem:[#allocation4 + $0xb60] sm:$0xff] }
 0x358   : > { %4356 = vmatpush1.bf16.msra.mxu1 %v6057_v23  ;;  %4294 = vmatprep.subr.bf16.mxu0 %v6059_v49  ;;  %v6077_v23 = vpack.c.bf16 %v1860_v43, %v1858_v34  ;;  %7291 = vst [vmem:[#allocation136_spill] sm:$0xff] %v6081_v41  ;;  %v6083_v27 = vpack.c.bf16 %v1865_v45, %v1863_v46  ;;  %7293 = vst [vmem:[#allocation138_spill] sm:$0xff] %v6086_v31  ;;  %v1867_v49 = vld [vmem:[#allocation4 + $0x968] sm:$0xff]  ;;  %v2005_v43 = vld [vmem:[#allocation4 + $0xb78] sm:$0xff] }
 0x359   : > { %4358 = vmatprep.subr.bf16.mxu1 %v6062_v63  ;;  %v2000_v63 = vld [vmem:[#allocation4 + $0xb50] sm:$0xff]  ;;  %v2003_v34 = vld [vmem:[#allocation4 + $0xb68] sm:$0xff] }
 0x35a   : > { %7290 = vst [vmem:[#allocation135_spill] sm:$0xff] %v6077_v23  ;;  %7292 = vst [vmem:[#allocation137_spill] sm:$0xff] %v6083_v27  ;;  %v6093_v45 = vpack.c.bf16 %v2000_v63, %v1998_v9  ;;  %v6098_v52 = vpack.c.bf16 %v2005_v43, %v2003_v34  ;;  %v1870_v63 = vld [vmem:[#allocation4 + $0x980] sm:$0xff]  ;;  %v1872_v9 = vld [vmem:[#allocation4 + $0x990] sm:$0xff] }
 0x35b   : > { %4296 = vmatpush1.bf16.msra.mxu0 %v6065_v40  ;;  %v1869_v40 = vld [vmem:[#allocation4 + $0x978] sm:$0xff]  ;;  %v2006_v34 = vld [vmem:[#allocation4 + $0xb80] sm:$0xff] }
 0x35c   : > { %4360 = vmatpush1.bf16.msra.mxu1 %v6069_v37  ;;  %4298 = vmatprep.subr.bf16.mxu0 %v6071_v28  ;;  %v6089_v37 = vpack.c.bf16 %v1864_v1, %v1862_v36  ;;  %7295 = vst [vmem:[#allocation140_spill] sm:$0xff] %v6093_v45  ;;  %v6095_v46 = vpack.c.bf16 %v1869_v40, %v1867_v49  ;;  %7297 = vst [vmem:[#allocation142_spill] sm:$0xff] %v6098_v52  ;;  %v1871_v28 = vld [vmem:[#allocation4 + $0x988] sm:$0xff]  ;;  %v2009_v1 = vld [vmem:[#allocation4 + $0xb98] sm:$0xff] }
 0x35d   : > { %4362 = vmatprep.subr.bf16.mxu1 %v6074_v25  ;;  %v2004_v25 = vld [vmem:[#allocation4 + $0xb70] sm:$0xff]  ;;  %v2007_v36 = vld [vmem:[#allocation4 + $0xb88] sm:$0xff] }
 0x35e   : > { %7294 = vst [vmem:[#allocation139_spill] sm:$0xff] %v6089_v37  ;;  %7296 = vst [vmem:[#allocation141_spill] sm:$0xff] %v6095_v46  ;;  %v6105_v40 = vpack.c.bf16 %v2004_v25, %v2002_v61  ;;  %v6110_v43 = vpack.c.bf16 %v2009_v1, %v2007_v36  ;;  %v1874_v25 = vld [vmem:[#allocation4 + $0x9a0] sm:$0xff]  ;;  %v1876_v61 = vld [vmem:[#allocation4 + $0x9b0] sm:$0xff] }
 0x35f   : > { %4300 = vmatpush1.bf16.msra.mxu0 %v6077_v23  ;;  %v1873_v23 = vld [vmem:[#allocation4 + $0x998] sm:$0xff]  ;;  %v2010_v36 = vld [vmem:[#allocation4 + $0xba0] sm:$0xff] }
 0x360   : > { %4364 = vmatpush1.bf16.msra.mxu1 %v6081_v41  ;;  %4302 = vmatprep.subr.bf16.mxu0 %v6083_v27  ;;  %v6101_v41 = vpack.c.bf16 %v1868_v55, %v1866_v2  ;;  %7299 = vst [vmem:[#allocation144_spill] sm:$0xff] %v6105_v40  ;;  %v6107_v49 = vpack.c.bf16 %v1873_v23, %v1871_v28  ;;  %7301 = vst [vmem:[#allocation146_spill] sm:$0xff] %v6110_v43  ;;  %v1875_v27 = vld [vmem:[#allocation4 + $0x9a8] sm:$0xff]  ;;  %v2013_v55 = vld [vmem:[#allocation4 + $0xbb8] sm:$0xff] }
 0x361   : > { %4366 = vmatprep.subr.bf16.mxu1 %v6086_v31  ;;  %v2008_v31 = vld [vmem:[#allocation4 + $0xb90] sm:$0xff]  ;;  %v2011_v2 = vld [vmem:[#allocation4 + $0xba8] sm:$0xff] }
 0x362   : > { %7298 = vst [vmem:[#allocation143_spill] sm:$0xff] %v6101_v41  ;;  %7300 = vst [vmem:[#allocation145_spill] sm:$0xff] %v6107_v49  ;;  %v6117_v23 = vpack.c.bf16 %v2008_v31, %v2006_v34  ;;  %v6122_v1 = vpack.c.bf16 %v2013_v55, %v2011_v2  ;;  %v1878_v31 = vld [vmem:[#allocation4 + $0x9c0] sm:$0xff]  ;;  %v1880_v34 = vld [vmem:[#allocation4 + $0x9d0] sm:$0xff] }
 0x363   : > { %4304 = vmatpush1.bf16.msra.mxu0 %v6089_v37  ;;  %v1877_v37 = vld [vmem:[#allocation4 + $0x9b8] sm:$0xff]  ;;  %v2014_v2 = vld [vmem:[#allocation4 + $0xbc0] sm:$0xff] }
 0x364   : > { %4368 = vmatpush1.bf16.msra.mxu1 %v6093_v45  ;;  %4306 = vmatprep.subr.bf16.mxu0 %v6095_v46  ;;  %v6113_v45 = vpack.c.bf16 %v1872_v9, %v1870_v63  ;;  %7303 = vst [vmem:[#allocation148_spill] sm:$0xff] %v6117_v23  ;;  %v6119_v28 = vpack.c.bf16 %v1877_v37, %v1875_v27  ;;  %7305 = vst [vmem:[#allocation150_spill] sm:$0xff] %v6122_v1  ;;  %v1879_v46 = vld [vmem:[#allocation4 + $0x9c8] sm:$0xff]  ;;  %v2017_v9 = vld [vmem:[#allocation4 + $0xbd8] sm:$0xff] }
 0x365   : > { %4370 = vmatprep.subr.bf16.mxu1 %v6098_v52  ;;  %v2012_v52 = vld [vmem:[#allocation4 + $0xbb0] sm:$0xff]  ;;  %v2015_v63 = vld [vmem:[#allocation4 + $0xbc8] sm:$0xff] }
 0x366   : > { %7302 = vst [vmem:[#allocation147_spill] sm:$0xff] %v6113_v45  ;;  %7304 = vst [vmem:[#allocation149_spill] sm:$0xff] %v6119_v28  ;;  %v6129_v37 = vpack.c.bf16 %v2012_v52, %v2010_v36  ;;  %v6134_v55 = vpack.c.bf16 %v2017_v9, %v2015_v63  ;;  %v1882_v52 = vld [vmem:[#allocation4 + $0x9e0] sm:$0xff]  ;;  %v1884_v36 = vld [vmem:[#allocation4 + $0x9f0] sm:$0xff] }
 0x367   : > { %4308 = vmatpush1.bf16.msra.mxu0 %v6101_v41  ;;  %v1881_v41 = vld [vmem:[#allocation4 + $0x9d8] sm:$0xff]  ;;  %v2018_v63 = vld [vmem:[#allocation4 + $0xbe0] sm:$0xff] }
 0x368   : > { %4372 = vmatpush1.bf16.msra.mxu1 %v6105_v40  ;;  %4310 = vmatprep.subr.bf16.mxu0 %v6107_v49  ;;  %v6125_v40 = vpack.c.bf16 %v1876_v61, %v1874_v25  ;;  %7307 = vst [vmem:[#allocation152_spill] sm:$0xff] %v6129_v37  ;;  %v6131_v27 = vpack.c.bf16 %v1881_v41, %v1879_v46  ;;  %7309 = vst [vmem:[#allocation154_spill] sm:$0xff] %v6134_v55  ;;  %v1883_v49 = vld [vmem:[#allocation4 + $0x9e8] sm:$0xff]  ;;  %v2021_v61 = vld [vmem:[#allocation4 + $0xbf8] sm:$0xff] }
 0x369   : > { %4374 = vmatprep.subr.bf16.mxu1 %v6110_v43  ;;  %v2016_v43 = vld [vmem:[#allocation4 + $0xbd0] sm:$0xff]  ;;  %v2019_v25 = vld [vmem:[#allocation4 + $0xbe8] sm:$0xff] }
 0x36a   : > { %7306 = vst [vmem:[#allocation151_spill] sm:$0xff] %v6125_v40  ;;  %7308 = vst [vmem:[#allocation153_spill] sm:$0xff] %v6131_v27  ;;  %v6141_v41 = vpack.c.bf16 %v2016_v43, %v2014_v2  ;;  %v6146_v9 = vpack.c.bf16 %v2021_v61, %v2019_v25  ;;  %v2094_v43 = vld [vmem:[#allocation4 + $0xc00] sm:$0xff]  ;;  %v2096_v2 = vld [vmem:[#allocation4 + $0xc10] sm:$0xff] }
 0x36b   : > { %4312 = vmatpush1.bf16.msra.mxu0 %v6113_v45  ;;  %v1885_v45 = vld [vmem:[#allocation4 + $0x9f8] sm:$0xff]  ;;  %v2230_v61 = vld [vmem:[#allocation4 + $0xe00] sm:$0xff] }
 0x36c   : > { %4376 = vmatpush1.bf16.msra.mxu1 %v6117_v23  ;;  %4314 = vmatprep.subr.bf16.mxu0 %v6119_v28  ;;  %v6137_v23 = vpack.c.bf16 %v1880_v34, %v1878_v31  ;;  %7311 = vst [vmem:[#allocation156_spill] sm:$0xff] %v6141_v41  ;;  %v6143_v46 = vpack.c.bf16 %v1885_v45, %v1883_v49  ;;  %7313 = vst [vmem:[#allocation158_spill] sm:$0xff] %v6146_v9  ;;  %v2095_v28 = vld [vmem:[#allocation4 + $0xc08] sm:$0xff]  ;;  %v2233_v34 = vld [vmem:[#allocation4 + $0xe18] sm:$0xff] }
 0x36d   : > { %4378 = vmatprep.subr.bf16.mxu1 %v6122_v1  ;;  %v2020_v1 = vld [vmem:[#allocation4 + $0xbf0] sm:$0xff]  ;;  %v2231_v31 = vld [vmem:[#allocation4 + $0xe08] sm:$0xff] }
 0x36e   : > { %7310 = vst [vmem:[#allocation155_spill] sm:$0xff] %v6137_v23  ;;  %7312 = vst [vmem:[#allocation157_spill] sm:$0xff] %v6143_v46  ;;  %v6153_v45 = vpack.c.bf16 %v2020_v1, %v2018_v63  ;;  %v6158_v25 = vpack.c.bf16 %v2233_v34, %v2231_v31  ;;  %v2100_v1 = vld [vmem:[#allocation4 + $0xc30] sm:$0xff]  ;;  %v2234_v63 = vld [vmem:[#allocation4 + $0xe20] sm:$0xff] }
 0x36f   : > { %4316 = vmatpush1.bf16.msra.mxu0 %v6125_v40  ;;  %v2097_v40 = vld [vmem:[#allocation4 + $0xc18] sm:$0xff]  ;;  %v2236_v34 = vld [vmem:[#allocation4 + $0xe30] sm:$0xff] }
 0x370   : > { %4380 = vmatpush1.bf16.msra.mxu1 %v6129_v37  ;;  %4318 = vmatprep.subr.bf16.mxu0 %v6131_v27  ;;  %v6149_v37 = vpack.c.bf16 %v1884_v36, %v1882_v52  ;;  %7315 = vst [vmem:[#allocation160_spill] sm:$0xff] %v6153_v45  ;;  %v6155_v49 = vpack.c.bf16 %v2097_v40, %v2095_v28  ;;  %7317 = vst [vmem:[#allocation162_spill] sm:$0xff] %v6158_v25  ;;  %v2099_v27 = vld [vmem:[#allocation4 + $0xc28] sm:$0xff]  ;;  %v2098_v28 = vld [vmem:[#allocation4 + $0xc20] sm:$0xff] }
 0x371   : > { %4382 = vmatprep.subr.bf16.mxu1 %v6134_v55  ;;  %v2232_v55 = vld [vmem:[#allocation4 + $0xe10] sm:$0xff]  ;;  %v6161_v52 = vpack.c.bf16 %v2096_v2, %v2094_v43  ;;  %v2235_v36 = vld [vmem:[#allocation4 + $0xe28] sm:$0xff] }
 0x372   : > { %7314 = vst [vmem:[#allocation159_spill] sm:$0xff] %v6149_v37  ;;  %7316 = vst [vmem:[#allocation161_spill] sm:$0xff] %v6155_v49  ;;  %v6165_v40 = vpack.c.bf16 %v2232_v55, %v2230_v61  ;;  %v2239_v2 = vld [vmem:[#allocation4 + $0xe48] sm:$0xff]  ;;  %v6175_v55 = vpack.c.bf16 %v2100_v1, %v2098_v28  ;;  %v2102_v61 = vld [vmem:[#allocation4 + $0xc40] sm:$0xff] }
 0x373   : > { %4320 = vmatpush1.bf16.msra.mxu0 %v6137_v23  ;;  %v2101_v23 = vld [vmem:[#allocation4 + $0xc38] sm:$0xff]  ;;  %7318 = vst [vmem:[#allocation163_spill] sm:$0xff] %v6161_v52  ;;  %v2107_v28 = vld [vmem:[#allocation4 + $0xc68] sm:$0xff] }
 0x374   : > { %4384 = vmatpush1.bf16.msra.mxu1 %v6141_v41  ;;  %4322 = vmatprep.subr.bf16.mxu0 %v6143_v46  ;;  %v2237_v46 = vld [vmem:[#allocation4 + $0xe38] sm:$0xff]  ;;  %7319 = vst [vmem:[#allocation164_spill] sm:$0xff] %v6165_v40  ;;  %v6168_v31 = vpack.c.bf16 %v2101_v23, %v2099_v27  ;;  %7322 = vst [vmem:[#allocation167_spill] sm:$0xff] %v6175_v55  ;;  %v6179_v23 = vpack.c.bf16 %v2236_v34, %v2234_v63  ;;  %v2108_v34 = vld [vmem:[#allocation4 + $0xc70] sm:$0xff] }
 0x375   : > { %4386 = vmatprep.subr.bf16.mxu1 %v6146_v9  ;;  %v2103_v9 = vld [vmem:[#allocation4 + $0xc48] sm:$0xff]  ;;  %v6171_v43 = vpack.c.bf16 %v2237_v46, %v2235_v36  ;;  %v2238_v46 = vld [vmem:[#allocation4 + $0xe40] sm:$0xff]  ;;  %v2109_v1 = vld [vmem:[#allocation4 + $0xc78] sm:$0xff] }
 0x376   : > { %7320 = vst [vmem:[#allocation165_spill] sm:$0xff] %v6168_v31  ;;  %7323 = vst [vmem:[#allocation168_spill] sm:$0xff] %v6179_v23  ;;  %v6195_v63 = vpack.c.bf16 %v2109_v1, %v2107_v28  ;;  %v2111_v41 = vld [vmem:[#allocation4 + $0xc88] sm:$0xff]  ;;  %v2110_v28 = vld [vmem:[#allocation4 + $0xc80] sm:$0xff] }
 0x377   : > { %4324 = vmatpush1.bf16.msra.mxu0 %v6149_v37  ;;  %v2105_v37 = vld [vmem:[#allocation4 + $0xc58] sm:$0xff]  ;;  %7321 = vst [vmem:[#allocation166_spill] sm:$0xff] %v6171_v43 }
 0x378   : > { %4388 = vmatpush1.bf16.msra.mxu1 %v6153_v45  ;;  %4390 = vmatprep.subr.bf16.mxu0 %v6155_v49  ;;  %v2241_v45 = vld [vmem:[#allocation4 + $0xe58] sm:$0xff]  ;;  %v6181_v27 = vpack.c.bf16 %v2105_v37, %v2103_v9  ;;  %v2243_v49 = vld [vmem:[#allocation4 + $0xe68] sm:$0xff]  ;;  %7328 = vst [vmem:[#allocation173_spill] sm:$0xff] %v6195_v63 }
 0x379   : > { %4454 = vmatprep.subr.bf16.mxu1 %v6158_v25  ;;  %v2104_v25 = vld [vmem:[#allocation4 + $0xc50] sm:$0xff]  ;;  %v6185_v36 = vpack.c.bf16 %v2241_v45, %v2239_v2  ;;  %v2106_v45 = vld [vmem:[#allocation4 + $0xc60] sm:$0xff] }
 0x37a   : > { %1951 = vmatmul.mubr.f32.vlgmr.msra.gmra.mrb[14].mxu0 %v5766_v18  ;;  %7324 = vst [vmem:[#allocation169_spill] sm:$0xff] %v6181_v27  ;;  %v6189_v37 = vpack.c.bf16 %v2104_v25, %v2102_v61  ;;  %v2242_v2 = vld [vmem:[#allocation4 + $0xe60] sm:$0xff]  ;;  %v2247_v25 = vld [vmem:[#allocation4 + $0xe88] sm:$0xff]  ;;  %v2249_v61 = vld [vmem:[#allocation4 + $0xe98] sm:$0xff] }
 0x37b   : > { %2087 = vmatmul.mubr.f32.vlgmr.msra.gmra.mrb[6].mxu1 %v5766_v18  ;;  %4392 = vmatpush1.bf16.msra.mxu0 %v6161_v52  ;;  %7325 = vst [vmem:[#allocation170_spill] sm:$0xff] %v6185_v36  ;;  %v2240_v52 = vld [vmem:[#allocation4 + $0xe50] sm:$0xff]  ;;  %v6210_v1 = vpack.c.bf16 %v2249_v61, %v2247_v25  ;;  %v2250_v25 = vld [vmem:[#allocation4 + $0xea0] sm:$0xff] }
 0x37c   : > { %2222 = vmatprep.mubr.f32.mxu0 %v5768_v58  ;;  %4456 = vmatpush1.bf16.msra.mxu1 %v6165_v40  ;;  %v2245_v40 = vld [vmem:[#allocation4 + $0xe78] sm:$0xff]  ;;  %7326 = vst [vmem:[#allocation171_spill] sm:$0xff] %v6189_v37  ;;  %v6193_v9 = vpack.c.bf16 %v2240_v52, %v2238_v46 }
 0x37d   : > { %2358 = vmatprep.mubr.f32.mxu1 %v5768_v58  ;;  %4394 = vmatprep.subr.bf16.mxu0 %v6168_v31  ;;  %v2244_v31 = vld [vmem:[#allocation4 + $0xe70] sm:$0xff]  ;;  %7333 = vst [vmem:[#allocation178_spill] sm:$0xff] %v6210_v1 }
 0x37e   : > { %4458 = vmatprep.subr.bf16.mxu1 %v6171_v43  ;;  %7327 = vst [vmem:[#allocation172_spill] sm:$0xff] %v6193_v9  ;;  %v6198_v43 = vpack.c.bf16 %v2245_v40, %v2243_v49  ;;  %v6205_v52 = vpack.c.bf16 %v2244_v31, %v2242_v2  ;;  %v2112_v49 = vld [vmem:[#allocation4 + $0xc90] sm:$0xff]  ;;  %v2246_v40 = vld [vmem:[#allocation4 + $0xe80] sm:$0xff] }
 0x37f   : > { %4396 = vmatpush1.bf16.msra.mxu0 %v6175_v55  ;;  %v2113_v55 = vld [vmem:[#allocation4 + $0xc98] sm:$0xff]  ;;  %v2116_v2 = vld [vmem:[#allocation4 + $0xcb0] sm:$0xff] }
 0x380   : > { %4460 = vmatpush1.bf16.msra.mxu1 %v6179_v23  ;;  %4398 = vmatprep.subr.bf16.mxu0 %v6181_v27  ;;  %7329 = vst [vmem:[#allocation174_spill] sm:$0xff] %v6198_v43  ;;  %v6201_v23 = vpack.c.bf16 %v2108_v34, %v2106_v45  ;;  %7331 = vst [vmem:[#allocation176_spill] sm:$0xff] %v6205_v52  ;;  %v6207_v46 = vpack.c.bf16 %v2113_v55, %v2111_v41  ;;  %v2115_v27 = vld [vmem:[#allocation4 + $0xca8] sm:$0xff]  ;;  %v2253_v34 = vld [vmem:[#allocation4 + $0xeb8] sm:$0xff] }
 0x381   : > { %4462 = vmatprep.subr.bf16.mxu1 %v6185_v36  ;;  %v2248_v36 = vld [vmem:[#allocation4 + $0xe90] sm:$0xff]  ;;  %v2251_v45 = vld [vmem:[#allocation4 + $0xea8] sm:$0xff]  ;;  %v2114_v55 = vld [vmem:[#allocation4 + $0xca0] sm:$0xff] }
 0x382   : > { %7330 = vst [vmem:[#allocation175_spill] sm:$0xff] %v6201_v23  ;;  %7332 = vst [vmem:[#allocation177_spill] sm:$0xff] %v6207_v46  ;;  %v6217_v41 = vpack.c.bf16 %v2248_v36, %v2246_v40  ;;  %v6222_v61 = vpack.c.bf16 %v2253_v34, %v2251_v45  ;;  %v2120_v40 = vld [vmem:[#allocation4 + $0xcd0] sm:$0xff]  ;;  %v2254_v45 = vld [vmem:[#allocation4 + $0xec0] sm:$0xff] }
 0x383   : > { %4400 = vmatpush1.bf16.msra.mxu0 %v6189_v37  ;;  %v2117_v37 = vld [vmem:[#allocation4 + $0xcb8] sm:$0xff] }
 0x384   : > { %4464 = vmatpush1.bf16.msra.mxu1 %v6193_v9  ;;  %4402 = vmatprep.subr.bf16.mxu0 %v6195_v63  ;;  %v6213_v9 = vpack.c.bf16 %v2112_v49, %v2110_v28  ;;  %7335 = vst [vmem:[#allocation180_spill] sm:$0xff] %v6217_v41  ;;  %v6219_v31 = vpack.c.bf16 %v2117_v37, %v2115_v27  ;;  %7337 = vst [vmem:[#allocation182_spill] sm:$0xff] %v6222_v61  ;;  %v2119_v63 = vld [vmem:[#allocation4 + $0xcc8] sm:$0xff]  ;;  %v2257_v49 = vld [vmem:[#allocation4 + $0xed8] sm:$0xff] }
 0x385   : > { %4466 = vmatprep.subr.bf16.mxu1 %v6198_v43  ;;  %v2252_v43 = vld [vmem:[#allocation4 + $0xeb0] sm:$0xff]  ;;  %v2255_v28 = vld [vmem:[#allocation4 + $0xec8] sm:$0xff]  ;;  %v2118_v37 = vld [vmem:[#allocation4 + $0xcc0] sm:$0xff] }
 0x386   : > { %7334 = vst [vmem:[#allocation179_spill] sm:$0xff] %v6213_v9  ;;  %7336 = vst [vmem:[#allocation181_spill] sm:$0xff] %v6219_v31  ;;  %v6229_v27 = vpack.c.bf16 %v2252_v43, %v2250_v25  ;;  %v6234_v34 = vpack.c.bf16 %v2257_v49, %v2255_v28  ;;  %v2124_v25 = vld [vmem:[#allocation4 + $0xcf0] sm:$0xff]  ;;  %v2258_v28 = vld [vmem:[#allocation4 + $0xee0] sm:$0xff] }
 0x387   : > { %4404 = vmatpush1.bf16.msra.mxu0 %v6201_v23  ;;  %v2121_v23 = vld [vmem:[#allocation4 + $0xcd8] sm:$0xff] }
 0x388   : > { %4468 = vmatpush1.bf16.msra.mxu1 %v6205_v52  ;;  %4406 = vmatprep.subr.bf16.mxu0 %v6207_v46  ;;  %v6225_v52 = vpack.c.bf16 %v2116_v2, %v2114_v55  ;;  %7339 = vst [vmem:[#allocation184_spill] sm:$0xff] %v6229_v27  ;;  %v6231_v36 = vpack.c.bf16 %v2121_v23, %v2119_v63  ;;  %7341 = vst [vmem:[#allocation186_spill] sm:$0xff] %v6234_v34  ;;  %v2123_v46 = vld [vmem:[#allocation4 + $0xce8] sm:$0xff]  ;;  %v2261_v2 = vld [vmem:[#allocation4 + $0xef8] sm:$0xff] }
 0x389   : > { %4470 = vmatprep.subr.bf16.mxu1 %v6210_v1  ;;  %v2256_v1 = vld [vmem:[#allocation4 + $0xed0] sm:$0xff]  ;;  %v2259_v55 = vld [vmem:[#allocation4 + $0xee8] sm:$0xff]  ;;  %v2122_v63 = vld [vmem:[#allocation4 + $0xce0] sm:$0xff] }
 0x38a   : > { %7338 = vst [vmem:[#allocation183_spill] sm:$0xff] %v6225_v52  ;;  %7340 = vst [vmem:[#allocation185_spill] sm:$0xff] %v6231_v36  ;;  %v6241_v43 = vpack.c.bf16 %v2256_v1, %v2254_v45  ;;  %v6246_v49 = vpack.c.bf16 %v2261_v2, %v2259_v55  ;;  %v2126_v1 = vld [vmem:[#allocation4 + $0xd00] sm:$0xff]  ;;  %v2128_v45 = vld [vmem:[#allocation4 + $0xd10] sm:$0xff] }
 0x38b   : > { %4408 = vmatpush1.bf16.msra.mxu0 %v6213_v9  ;;  %v2125_v9 = vld [vmem:[#allocation4 + $0xcf8] sm:$0xff]  ;;  %v2262_v55 = vld [vmem:[#allocation4 + $0xf00] sm:$0xff] }
 0x38c   : > { %4472 = vmatpush1.bf16.msra.mxu1 %v6217_v41  ;;  %4410 = vmatprep.subr.bf16.mxu0 %v6219_v31  ;;  %v6237_v41 = vpack.c.bf16 %v2120_v40, %v2118_v37  ;;  %7343 = vst [vmem:[#allocation188_spill] sm:$0xff] %v6241_v43  ;;  %v6243_v23 = vpack.c.bf16 %v2125_v9, %v2123_v46  ;;  %7345 = vst [vmem:[#allocation190_spill] sm:$0xff] %v6246_v49  ;;  %v2127_v31 = vld [vmem:[#allocation4 + $0xd08] sm:$0xff]  ;;  %v2265_v40 = vld [vmem:[#allocation4 + $0xf18] sm:$0xff] }
 0x38d   : > { %4474 = vmatprep.subr.bf16.mxu1 %v6222_v61  ;;  %v2260_v61 = vld [vmem:[#allocation4 + $0xef0] sm:$0xff]  ;;  %v2263_v37 = vld [vmem:[#allocation4 + $0xf08] sm:$0xff] }
 0x38e   : > { %7342 = vst [vmem:[#allocation187_spill] sm:$0xff] %v6237_v41  ;;  %7344 = vst [vmem:[#allocation189_spill] sm:$0xff] %v6243_v23  ;;  %v6253_v9 = vpack.c.bf16 %v2260_v61, %v2258_v28  ;;  %v6258_v2 = vpack.c.bf16 %v2265_v40, %v2263_v37  ;;  %v2130_v61 = vld [vmem:[#allocation4 + $0xd20] sm:$0xff]  ;;  %v2132_v28 = vld [vmem:[#allocation4 + $0xd30] sm:$0xff] }
 0x38f   : > { %4412 = vmatpush1.bf16.msra.mxu0 %v6225_v52  ;;  %v2129_v52 = vld [vmem:[#allocation4 + $0xd18] sm:$0xff]  ;;  %v2266_v37 = vld [vmem:[#allocation4 + $0xf20] sm:$0xff] }
 0x390   : > { %4476 = vmatpush1.bf16.msra.mxu1 %v6229_v27  ;;  %4414 = vmatprep.subr.bf16.mxu0 %v6231_v36  ;;  %v6249_v27 = vpack.c.bf16 %v2124_v25, %v2122_v63  ;;  %7347 = vst [vmem:[#allocation192_spill] sm:$0xff] %v6253_v9  ;;  %v6255_v46 = vpack.c.bf16 %v2129_v52, %v2127_v31  ;;  %7349 = vst [vmem:[#allocation194_spill] sm:$0xff] %v6258_v2  ;;  %v2131_v36 = vld [vmem:[#allocation4 + $0xd28] sm:$0xff]  ;;  %v2269_v25 = vld [vmem:[#allocation4 + $0xf38] sm:$0xff] }
 0x391   : > { %4478 = vmatprep.subr.bf16.mxu1 %v6234_v34  ;;  %v2264_v34 = vld [vmem:[#allocation4 + $0xf10] sm:$0xff]  ;;  %v2267_v63 = vld [vmem:[#allocation4 + $0xf28] sm:$0xff] }
 0x392   : > { %7346 = vst [vmem:[#allocation191_spill] sm:$0xff] %v6249_v27  ;;  %7348 = vst [vmem:[#allocation193_spill] sm:$0xff] %v6255_v46  ;;  %v6265_v52 = vpack.c.bf16 %v2264_v34, %v2262_v55  ;;  %v6270_v40 = vpack.c.bf16 %v2269_v25, %v2267_v63  ;;  %v2134_v34 = vld [vmem:[#allocation4 + $0xd40] sm:$0xff]  ;;  %v2136_v55 = vld [vmem:[#allocation4 + $0xd50] sm:$0xff] }
 0x393   : > { %4416 = vmatpush1.bf16.msra.mxu0 %v6237_v41  ;;  %v2133_v41 = vld [vmem:[#allocation4 + $0xd38] sm:$0xff]  ;;  %v2270_v63 = vld [vmem:[#allocation4 + $0xf40] sm:$0xff] }
 0x394   : > { %4480 = vmatpush1.bf16.msra.mxu1 %v6241_v43  ;;  %4418 = vmatprep.subr.bf16.mxu0 %v6243_v23  ;;  %v6261_v43 = vpack.c.bf16 %v2128_v45, %v2126_v1  ;;  %7351 = vst [vmem:[#allocation196_spill] sm:$0xff] %v6265_v52  ;;  %v6267_v31 = vpack.c.bf16 %v2133_v41, %v2131_v36  ;;  %7353 = vst [vmem:[#allocation198_spill] sm:$0xff] %v6270_v40  ;;  %v2135_v23 = vld [vmem:[#allocation4 + $0xd48] sm:$0xff]  ;;  %v2273_v45 = vld [vmem:[#allocation4 + $0xf58] sm:$0xff] }
 0x395   : > { %4482 = vmatprep.subr.bf16.mxu1 %v6246_v49  ;;  %v2268_v49 = vld [vmem:[#allocation4 + $0xf30] sm:$0xff]  ;;  %v2271_v1 = vld [vmem:[#allocation4 + $0xf48] sm:$0xff] }
 0x396   : > { %7350 = vst [vmem:[#allocation195_spill] sm:$0xff] %v6261_v43  ;;  %7352 = vst [vmem:[#allocation197_spill] sm:$0xff] %v6267_v31  ;;  %v6277_v41 = vpack.c.bf16 %v2268_v49, %v2266_v37  ;;  %v6282_v25 = vpack.c.bf16 %v2273_v45, %v2271_v1  ;;  %v2138_v49 = vld [vmem:[#allocation4 + $0xd60] sm:$0xff]  ;;  %v2140_v37 = vld [vmem:[#allocation4 + $0xd70] sm:$0xff] }
 0x397   : > { %4420 = vmatpush1.bf16.msra.mxu0 %v6249_v27  ;;  %v2137_v27 = vld [vmem:[#allocation4 + $0xd58] sm:$0xff]  ;;  %v2274_v1 = vld [vmem:[#allocation4 + $0xf60] sm:$0xff] }
 0x398   : > { %4484 = vmatpush1.bf16.msra.mxu1 %v6253_v9  ;;  %4422 = vmatprep.subr.bf16.mxu0 %v6255_v46  ;;  %v6273_v9 = vpack.c.bf16 %v2132_v28, %v2130_v61  ;;  %7355 = vst [vmem:[#allocation200_spill] sm:$0xff] %v6277_v41  ;;  %v6279_v36 = vpack.c.bf16 %v2137_v27, %v2135_v23  ;;  %7357 = vst [vmem:[#allocation202_spill] sm:$0xff] %v6282_v25  ;;  %v2139_v46 = vld [vmem:[#allocation4 + $0xd68] sm:$0xff]  ;;  %v2277_v28 = vld [vmem:[#allocation4 + $0xf78] sm:$0xff] }
 0x399   : > { %4486 = vmatprep.subr.bf16.mxu1 %v6258_v2  ;;  %v2272_v2 = vld [vmem:[#allocation4 + $0xf50] sm:$0xff]  ;;  %v2275_v61 = vld [vmem:[#allocation4 + $0xf68] sm:$0xff] }
 0x39a   : > { %7354 = vst [vmem:[#allocation199_spill] sm:$0xff] %v6273_v9  ;;  %7356 = vst [vmem:[#allocation201_spill] sm:$0xff] %v6279_v36  ;;  %v6289_v27 = vpack.c.bf16 %v2272_v2, %v2270_v63  ;;  %v6294_v45 = vpack.c.bf16 %v2277_v28, %v2275_v61  ;;  %v2142_v2 = vld [vmem:[#allocation4 + $0xd80] sm:$0xff]  ;;  %v2144_v63 = vld [vmem:[#allocation4 + $0xd90] sm:$0xff] }
 0x39b   : > { %4424 = vmatpush1.bf16.msra.mxu0 %v6261_v43  ;;  %v2141_v43 = vld [vmem:[#allocation4 + $0xd78] sm:$0xff]  ;;  %v2278_v61 = vld [vmem:[#allocation4 + $0xf80] sm:$0xff] }
 0x39c   : > { %4488 = vmatpush1.bf16.msra.mxu1 %v6265_v52  ;;  %4426 = vmatprep.subr.bf16.mxu0 %v6267_v31  ;;  %v6285_v52 = vpack.c.bf16 %v2136_v55, %v2134_v34  ;;  %7359 = vst [vmem:[#allocation204_spill] sm:$0xff] %v6289_v27  ;;  %v6291_v23 = vpack.c.bf16 %v2141_v43, %v2139_v46  ;;  %7361 = vst [vmem:[#allocation206_spill] sm:$0xff] %v6294_v45  ;;  %v2143_v31 = vld [vmem:[#allocation4 + $0xd88] sm:$0xff]  ;;  %v2281_v55 = vld [vmem:[#allocation4 + $0xf98] sm:$0xff] }
 0x39d   : > { %4490 = vmatprep.subr.bf16.mxu1 %v6270_v40  ;;  %v2276_v40 = vld [vmem:[#allocation4 + $0xf70] sm:$0xff]  ;;  %v2279_v34 = vld [vmem:[#allocation4 + $0xf88] sm:$0xff] }
 0x39e   : > { %7358 = vst [vmem:[#allocation203_spill] sm:$0xff] %v6285_v52  ;;  %7360 = vst [vmem:[#allocation205_spill] sm:$0xff] %v6291_v23  ;;  %v6301_v43 = vpack.c.bf16 %v2276_v40, %v2274_v1  ;;  %v6306_v28 = vpack.c.bf16 %v2281_v55, %v2279_v34  ;;  %v2146_v40 = vld [vmem:[#allocation4 + $0xda0] sm:$0xff]  ;;  %v2148_v1 = vld [vmem:[#allocation4 + $0xdb0] sm:$0xff] }
 0x39f   : > { %4428 = vmatpush1.bf16.msra.mxu0 %v6273_v9  ;;  %v2145_v9 = vld [vmem:[#allocation4 + $0xd98] sm:$0xff]  ;;  %v2282_v34 = vld [vmem:[#allocation4 + $0xfa0] sm:$0xff] }
 0x3a0   : > { %4492 = vmatpush1.bf16.msra.mxu1 %v6277_v41  ;;  %4430 = vmatprep.subr.bf16.mxu0 %v6279_v36  ;;  %v6297_v41 = vpack.c.bf16 %v2140_v37, %v2138_v49  ;;  %7363 = vst [vmem:[#allocation208_spill] sm:$0xff] %v6301_v43  ;;  %v6303_v46 = vpack.c.bf16 %v2145_v9, %v2143_v31  ;;  %7365 = vst [vmem:[#allocation210_spill] sm:$0xff] %v6306_v28  ;;  %v2147_v36 = vld [vmem:[#allocation4 + $0xda8] sm:$0xff]  ;;  %v2285_v37 = vld [vmem:[#allocation4 + $0xfb8] sm:$0xff] }
 0x3a1   : > { %4494 = vmatprep.subr.bf16.mxu1 %v6282_v25  ;;  %v2280_v25 = vld [vmem:[#allocation4 + $0xf90] sm:$0xff]  ;;  %v2283_v49 = vld [vmem:[#allocation4 + $0xfa8] sm:$0xff] }
 0x3a2   : > { %7362 = vst [vmem:[#allocation207_spill] sm:$0xff] %v6297_v41  ;;  %7364 = vst [vmem:[#allocation209_spill] sm:$0xff] %v6303_v46  ;;  %v6313_v9 = vpack.c.bf16 %v2280_v25, %v2278_v61  ;;  %v6318_v55 = vpack.c.bf16 %v2285_v37, %v2283_v49  ;;  %v2150_v25 = vld [vmem:[#allocation4 + $0xdc0] sm:$0xff]  ;;  %v2152_v61 = vld [vmem:[#allocation4 + $0xdd0] sm:$0xff] }
 0x3a3   : > { %4432 = vmatpush1.bf16.msra.mxu0 %v6285_v52  ;;  %v2149_v52 = vld [vmem:[#allocation4 + $0xdb8] sm:$0xff]  ;;  %v2286_v49 = vld [vmem:[#allocation4 + $0xfc0] sm:$0xff] }
 0x3a4   : > { %4496 = vmatpush1.bf16.msra.mxu1 %v6289_v27  ;;  %4434 = vmatprep.subr.bf16.mxu0 %v6291_v23  ;;  %v6309_v27 = vpack.c.bf16 %v2144_v63, %v2142_v2  ;;  %7367 = vst [vmem:[#allocation212_spill] sm:$0xff] %v6313_v9  ;;  %v6315_v31 = vpack.c.bf16 %v2149_v52, %v2147_v36  ;;  %7369 = vst [vmem:[#allocation214_spill] sm:$0xff] %v6318_v55  ;;  %v2151_v23 = vld [vmem:[#allocation4 + $0xdc8] sm:$0xff]  ;;  %v2289_v63 = vld [vmem:[#allocation4 + $0xfd8] sm:$0xff] }
 0x3a5   : > { %4498 = vmatprep.subr.bf16.mxu1 %v6294_v45  ;;  %v2284_v45 = vld [vmem:[#allocation4 + $0xfb0] sm:$0xff]  ;;  %v2287_v2 = vld [vmem:[#allocation4 + $0xfc8] sm:$0xff] }
 0x3a6   : > { %7366 = vst [vmem:[#allocation211_spill] sm:$0xff] %v6309_v27  ;;  %7368 = vst [vmem:[#allocation213_spill] sm:$0xff] %v6315_v31  ;;  %v6325_v52 = vpack.c.bf16 %v2284_v45, %v2282_v34  ;;  %v6330_v37 = vpack.c.bf16 %v2289_v63, %v2287_v2  ;;  %v2154_v45 = vld [vmem:[#allocation4 + $0xde0] sm:$0xff]  ;;  %v2156_v34 = vld [vmem:[#allocation4 + $0xdf0] sm:$0xff] }
 0x3a7   : > { %4436 = vmatpush1.bf16.msra.mxu0 %v6297_v41  ;;  %v2153_v41 = vld [vmem:[#allocation4 + $0xdd8] sm:$0xff]  ;;  %v2290_v2 = vld [vmem:[#allocation4 + $0xfe0] sm:$0xff] }
 0x3a8   : > { %4500 = vmatpush1.bf16.msra.mxu1 %v6301_v43  ;;  %4438 = vmatprep.subr.bf16.mxu0 %v6303_v46  ;;  %v6321_v43 = vpack.c.bf16 %v2148_v1, %v2146_v40  ;;  %v6327_v36 = vpack.c.bf16 %v2153_v41, %v2151_v23  ;;  %v2155_v46 = vld [vmem:[#allocation4 + $0xde8] sm:$0xff]  ;;  %v2293_v1 = vld [vmem:[#allocation4 + $0xff8] sm:$0xff] }
 0x3a9   : > { %4502 = vmatprep.subr.bf16.mxu1 %v6306_v28  ;;  %v2288_v28 = vld [vmem:[#allocation4 + $0xfd0] sm:$0xff]  ;;  %v2291_v40 = vld [vmem:[#allocation4 + $0xfe8] sm:$0xff] }
 0x3aa   : > { %7370 = vst [vmem:[#allocation215_spill] sm:$0xff] %v6321_v43  ;;  %v6337_v41 = vpack.c.bf16 %v2288_v28, %v2286_v49  ;;  %v6342_v63 = vpack.c.bf16 %v2293_v1, %v2291_v40  ;;  %v2366_v28 = vld [vmem:[#allocation4 + $0x1000] sm:$0xff]  ;;  %v2371_v49 = vld [vmem:[#allocation4 + $0x1028] sm:$0xff]  ;;  %v2373_v40 = vld [vmem:[#allocation4 + $0x1038] sm:$0xff] }
 0x3ab   : > { %4440 = vmatpush1.bf16.msra.mxu0 %v6309_v27  ;;  %v2157_v27 = vld [vmem:[#allocation4 + $0xdf8] sm:$0xff] }
 0x3ac   : > { %4504 = vmatpush1.bf16.msra.mxu1 %v6313_v9  ;;  %4442 = vmatprep.subr.bf16.mxu0 %v6315_v31  ;;  %v6333_v9 = vpack.c.bf16 %v2152_v61, %v2150_v25  ;;  %7372 = vst [vmem:[#allocation217_spill] sm:$0xff] %v6337_v41  ;;  %v6339_v23 = vpack.c.bf16 %v2157_v27, %v2155_v46  ;;  %7374 = vst [vmem:[#allocation219_spill] sm:$0xff] %v6342_v63  ;;  %v2367_v31 = vld [vmem:[#allocation4 + $0x1008] sm:$0xff]  ;;  %v2368_v61 = vld [vmem:[#allocation4 + $0x1010] sm:$0xff] }
 0x3ad   : > { %4506 = vmatprep.subr.bf16.mxu1 %v6318_v55  ;;  %v2292_v55 = vld [vmem:[#allocation4 + $0xff0] sm:$0xff]  ;;  %v6345_v25 = vpack.c.bf16 %v2156_v34, %v2154_v45  ;;  %v6355_v1 = vpack.c.bf16 %v2368_v61, %v2366_v28  ;;  %v6359_v45 = vpack.c.bf16 %v2373_v40, %v2371_v49  ;;  %v2374_v61 = vld [vmem:[#allocation4 + $0x1040] sm:$0xff]  ;;  %v2379_v40 = vld [vmem:[#allocation4 + $0x1068] sm:$0xff] }
 0x3ae   : > { %7371 = vst [vmem:[#allocation216_spill] sm:$0xff] %v6333_v9  ;;  %7373 = vst [vmem:[#allocation218_spill] sm:$0xff] %v6339_v23  ;;  %v6349_v27 = vpack.c.bf16 %v2292_v55, %v2290_v2  ;;  %v2370_v55 = vld [vmem:[#allocation4 + $0x1020] sm:$0xff]  ;;  %v2372_v34 = vld [vmem:[#allocation4 + $0x1030] sm:$0xff] }
 0x3af   : > { %4444 = vmatpush1.bf16.msra.mxu0 %v6321_v43  ;;  %v2369_v43 = vld [vmem:[#allocation4 + $0x1018] sm:$0xff]  ;;  %7375 = vst [vmem:[#allocation220_spill] sm:$0xff] %v6345_v25  ;;  %7378 = vst [vmem:[#allocation223_spill] sm:$0xff] %v6355_v1  ;;  %v6364_v2 = vpack.c.bf16 %v2372_v34, %v2370_v55  ;;  %v2376_v49 = vld [vmem:[#allocation4 + $0x1050] sm:$0xff] }
 0x3b0   : > { %4508 = vmatpush1.bf16.msra.mxu1 %v6325_v52  ;;  %4446 = vmatprep.subr.bf16.mxu0 %v6327_v36  ;;  %7376 = vst [vmem:[#allocation221_spill] sm:$0xff] %v6349_v27  ;;  %v6351_v46 = vpack.c.bf16 %v2369_v43, %v2367_v31  ;;  %7379 = vst [vmem:[#allocation224_spill] sm:$0xff] %v6359_v45  ;;  %v2375_v43 = vld [vmem:[#allocation4 + $0x1048] sm:$0xff]  ;;  %v2377_v31 = vld [vmem:[#allocation4 + $0x1058] sm:$0xff] }
 0x3b1   : > { %4510 = vmatprep.subr.bf16.mxu1 %v6330_v37  ;;  %7380 = vst [vmem:[#allocation225_spill] sm:$0xff] %v6364_v2  ;;  %v6368_v28 = vpack.c.bf16 %v2377_v31, %v2375_v43  ;;  %v2378_v34 = vld [vmem:[#allocation4 + $0x1060] sm:$0xff] }
 0x3b2   : > { %7377 = vst [vmem:[#allocation222_spill] sm:$0xff] %v6351_v46 }
 0x3b3   : > { %4448 = vmatpush1.bf16.msra.mxu0 %v6333_v9  ;;  %7381 = vst [vmem:[#allocation226_spill] sm:$0xff] %v6368_v28 }
 0x3b4   : > { %4512 = vmatpush1.bf16.msra.mxu1 %v6337_v41  ;;  %4450 = vmatprep.subr.bf16.mxu0 %v6339_v23 }
 0x3b5   : > { %4514 = vmatprep.subr.bf16.mxu1 %v6342_v63  ;;  %v2395_v63 = vld [vmem:[#allocation4 + $0x10e8] sm:$0xff] }
 0x3b7   : > { %4452 = vmatpush1.bf16.msra.mxu0 %v6345_v25  ;;  %v6372_v25 = vpack.c.bf16 %v2376_v49, %v2374_v61  ;;  %v2387_v61 = vld [vmem:[#allocation4 + $0x10a8] sm:$0xff]  ;;  %v2389_v49 = vld [vmem:[#allocation4 + $0x10b8] sm:$0xff] }
 0x3b8   : > { %4516 = vmatpush1.bf16.msra.mxu1 %v6349_v27  ;;  %4518 = vmatprep.subr.bf16.mxu0 %v6351_v46  ;;  %v2381_v46 = vld [vmem:[#allocation4 + $0x1078] sm:$0xff]  ;;  %v7382_v27 = vmov 0.0  }
 0x3b9   : > { %7383 = vst [vmem:[#allocation227_spill] sm:$0xff] %v6372_v25  ;;  %v6375_v55 = vpack.c.bf16 %v2381_v46, %v2379_v40  ;;  %v6387_v40 = vpack.c.bf16 %v2389_v49, %v2387_v61 }
 0x3ba   : > { %2223 = vmatmul.mubr.f32.vlgmr.msra.gmra.mrb[16].mxu0 %v5766_v18 }
 0x3bb   : > { %2359 = vmatmul.mubr.f32.vlgmr.msra.gmra.mrb[8].mxu1 %v5766_v18  ;;  %4520 = vmatpush1.bf16.msra.mxu0 %v6355_v1  ;;  %7384 = vst [vmem:[#allocation228_spill] sm:$0xff] %v6375_v55  ;;  %v2383_v1 = vld [vmem:[#allocation4 + $0x1088] sm:$0xff]  ;;  %7388 = vst [vmem:[#allocation232_spill] sm:$0xff] %v6387_v40 }
 0x3bc   : > { %2494 = vmatprep.mubr.f32.mxu0 %v5768_v58  ;;  %4522 = vmatprep.subr.bf16.mxu0 %v6359_v45  ;;  %v2380_v58 = vld [vmem:[#allocation4 + $0x1070] sm:$0xff]  ;;  %v2385_v45 = vld [vmem:[#allocation4 + $0x1098] sm:$0xff] }
 0x3bd   : > { %2614 = vmatprep.mubr.f32.mxu1 %v7382_v27  ;;  %v6378_v43 = vpack.c.bf16 %v2380_v58, %v2378_v34  ;;  %v6381_v31 = vpack.c.bf16 %v2385_v45, %v2383_v1  ;;  %v2382_v27 = vld [vmem:[#allocation4 + $0x1080] sm:$0xff]  ;;  %v2391_v58 = vld [vmem:[#allocation4 + $0x10c8] sm:$0xff]  ;;  %v2393_v34 = vld [vmem:[#allocation4 + $0x10d8] sm:$0xff] }
 0x3be   : > { %v6393_v45 = vpack.c.bf16 %v2393_v34, %v2391_v58  ;;  %v2394_v58 = vld [vmem:[#allocation4 + $0x10e0] sm:$0xff]  ;;  %v2396_v34 = vld [vmem:[#allocation4 + $0x10f0] sm:$0xff] }
 0x3bf   : > { %4524 = vmatpush1.bf16.msra.mxu0 %v6364_v2  ;;  %7385 = vst [vmem:[#allocation229_spill] sm:$0xff] %v6378_v43  ;;  %7386 = vst [vmem:[#allocation230_spill] sm:$0xff] %v6381_v31  ;;  %v2384_v2 = vld [vmem:[#allocation4 + $0x1090] sm:$0xff] }
 0x3c0   : > { %4526 = vmatprep.subr.bf16.mxu0 %v6368_v28  ;;  %v6384_v46 = vpack.c.bf16 %v2384_v2, %v2382_v27  ;;  %v2386_v28 = vld [vmem:[#allocation4 + $0x10a0] sm:$0xff] }
 0x3c2   : > { %7387 = vst [vmem:[#allocation231_spill] sm:$0xff] %v6384_v46 }
 0x3c3   : > { %4528 = vmatpush1.bf16.msra.mxu0 %v6372_v25  ;;  %v2388_v25 = vld [vmem:[#allocation4 + $0x10b0] sm:$0xff] }
 0x3c4   : > { %4530 = vmatprep.subr.bf16.mxu0 %v6375_v55  ;;  %v6390_v1 = vpack.c.bf16 %v2388_v25, %v2386_v28  ;;  %v2390_v55 = vld [vmem:[#allocation4 + $0x10c0] sm:$0xff] }
 0x3c7   : > { %4532 = vmatpush1.bf16.msra.mxu0 %v6378_v43  ;;  %v2392_v43 = vld [vmem:[#allocation4 + $0x10d0] sm:$0xff] }
 0x3c8   : > { %4534 = vmatprep.subr.bf16.mxu0 %v6381_v31  ;;  %v2397_v31 = vld [vmem:[#allocation4 + $0x10f8] sm:$0xff]  ;;  %v6396_v9 = vpack.c.bf16 %v2392_v43, %v2390_v55  ;;  %v2398_v43 = vld [vmem:[#allocation4 + $0x1100] sm:$0xff] }
 0x3c9   : > { %v6402_v28 = vpack.c.bf16 %v2397_v31, %v2395_v63  ;;  %v2405_v63 = vld [vmem:[#allocation4 + $0x1138] sm:$0xff] }
 0x3ca   : > { %7389 = vst [vmem:[#allocation233_spill] sm:$0xff] %v6396_v9 }
 0x3cb   : > { %4536 = vmatpush1.bf16.msra.mxu0 %v6384_v46  ;;  %7390 = vst [vmem:[#allocation234_spill] sm:$0xff] %v6402_v28  ;;  %v2401_v46 = vld [vmem:[#allocation4 + $0x1118] sm:$0xff] }
 0x3cc   : > { %4538 = vmatprep.subr.bf16.mxu0 %v6387_v40  ;;  %v2399_v40 = vld [vmem:[#allocation4 + $0x1108] sm:$0xff] }
 0x3cd   : > { %v1408_v27 = vpop.f32.mrb[10].mxu0  ;;  %v1544_v2 = vpop.f32.mrb[2].mxu1  ;;  %v6411_v55 = vpack.c.bf16 %v2401_v46, %v2399_v40 }
 0x3ce   : > { %v2503_v61 = vrot.slane %v1544_v2, 4  ;;  %v1410_v49 = vpop.f32.mrb[11].mxu0  ;;  %v1546_v23 = vpop.f32.mrb[3].mxu1 }
 0x3cf   : > { %v2504_v41 = vrot.slane %v1546_v23, 4  ;;  %4540 = vmatpush1.bf16.msra.mxu0 %v6390_v1  ;;  %v6408_v23 = vpack.c.bf16 %v2396_v34, %v2394_v58  ;;  %7392 = vst [vmem:[#allocation236_spill] sm:$0xff] %v6411_v55  ;;  %v2407_v58 = vld [vmem:[#allocation4 + $0x1148] sm:$0xff]  ;;  %v2409_v34 = vld [vmem:[#allocation4 + $0x1158] sm:$0xff] }
 0x3d0   : > { %v6399_v25 = vsel %vm598_vm1, %v1408_v27, %v2503_v61  ;;  %4542 = vmatprep.subr.bf16.mxu0 %v6393_v45  ;;  %v2400_v27 = vld [vmem:[#allocation4 + $0x1110] sm:$0xff]  ;;  %v2403_v61 = vld [vmem:[#allocation4 + $0x1128] sm:$0xff]  ;;  %v6423_v40 = vpack.c.bf16 %v2409_v34, %v2407_v58 }
 0x3d1   : > { %v6405_v2 = vsel %vm598_vm1, %v1410_v49, %v2504_v41  ;;  %7391 = vst [vmem:[#allocation235_spill] sm:$0xff] %v6408_v23  ;;  %v6414_v31 = vpack.c.bf16 %v2400_v27, %v2398_v43  ;;  %v6417_v41 = vpack.c.bf16 %v2405_v63, %v2403_v61  ;;  %v2402_v49 = vld [vmem:[#allocation4 + $0x1120] sm:$0xff]  ;;  %v2411_v43 = vld [vmem:[#allocation4 + $0x1168] sm:$0xff]  ;;  %v2413_v27 = vld [vmem:[#allocation4 + $0x1178] sm:$0xff] }
 0x3d2   : > { %7396 = vst [vmem:[#allocation240_spill] sm:$0xff] %v6423_v40  ;;  %v6429_v63 = vpack.c.bf16 %v2413_v27, %v2411_v43 }
 0x3d3   : > { %4544 = vmatpush1.bf16.msra.mxu0 %v6396_v9  ;;  %7393 = vst [vmem:[#allocation237_spill] sm:$0xff] %v6414_v31  ;;  %7394 = vst [vmem:[#allocation238_spill] sm:$0xff] %v6417_v41  ;;  %v2404_v9 = vld [vmem:[#allocation4 + $0x1130] sm:$0xff] }
 0x3d4   : > { %4546 = vmatprep.subr.bf16.mxu0 %v6402_v28  ;;  %v6420_v46 = vpack.c.bf16 %v2404_v9, %v2402_v49  ;;  %v2406_v28 = vld [vmem:[#allocation4 + $0x1140] sm:$0xff]  ;;  %7398 = vst [vmem:[#allocation242_spill] sm:$0xff] %v6429_v63  ;;  %v2415_v9 = vld [vmem:[#allocation4 + $0x1188] sm:$0xff]  ;;  %v2417_v49 = vld [vmem:[#allocation4 + $0x1198] sm:$0xff] }
 0x3d5   : > { %v6435_v34 = vpack.c.bf16 %v2417_v49, %v2415_v9 }
 0x3d6   : > { %7395 = vst [vmem:[#allocation239_spill] sm:$0xff] %v6420_v46 }
 0x3d7   : > { %4548 = vmatpush1.bf16.msra.mxu0 %v6408_v23  ;;  %v2408_v23 = vld [vmem:[#allocation4 + $0x1150] sm:$0xff]  ;;  %7400 = vst [vmem:[#allocation244_spill] sm:$0xff] %v6435_v34 }
 0x3d8   : > { %4550 = vmatprep.subr.bf16.mxu0 %v6411_v55  ;;  %v6426_v61 = vpack.c.bf16 %v2408_v23, %v2406_v28  ;;  %v2410_v55 = vld [vmem:[#allocation4 + $0x1160] sm:$0xff]  ;;  %v2419_v28 = vld [vmem:[#allocation4 + $0x11a8] sm:$0xff]  ;;  %v2421_v23 = vld [vmem:[#allocation4 + $0x11b8] sm:$0xff] }
 0x3d9   : > { %v6441_v27 = vpack.c.bf16 %v2421_v23, %v2419_v28 }
 0x3da   : > { %7397 = vst [vmem:[#allocation241_spill] sm:$0xff] %v6426_v61 }
 0x3db   : > { %4552 = vmatpush1.bf16.msra.mxu0 %v6414_v31  ;;  %v2412_v31 = vld [vmem:[#allocation4 + $0x1170] sm:$0xff] }
 0x3dc   : > { %4554 = vmatprep.subr.bf16.mxu0 %v6417_v41  ;;  %v6432_v58 = vpack.c.bf16 %v2412_v31, %v2410_v55  ;;  %v2414_v41 = vld [vmem:[#allocation4 + $0x1180] sm:$0xff]  ;;  %v2423_v55 = vld [vmem:[#allocation4 + $0x11c8] sm:$0xff]  ;;  %v2425_v31 = vld [vmem:[#allocation4 + $0x11d8] sm:$0xff] }
 0x3dd   : > { %v6447_v49 = vpack.c.bf16 %v2425_v31, %v2423_v55  ;;  %v7418_v55 = vld [vmem:[#allocation25_spill] sm:$0xff]  ;;  %v7419_v31 = vld [vmem:[#allocation26_spill] sm:$0xff] }
 0x3de   : > { %7399 = vst [vmem:[#allocation243_spill] sm:$0xff] %v6432_v58 }
 0x3df   : > { %4556 = vmatpush1.bf16.msra.mxu0 %v6420_v46  ;;  %v2416_v46 = vld [vmem:[#allocation4 + $0x1190] sm:$0xff] }
 0x3e0   : > { %4558 = vmatprep.subr.bf16.mxu0 %v6423_v40  ;;  %v6438_v43 = vpack.c.bf16 %v2416_v46, %v2414_v41  ;;  %v2418_v40 = vld [vmem:[#allocation4 + $0x11a0] sm:$0xff]  ;;  %v2427_v41 = vld [vmem:[#allocation4 + $0x11e8] sm:$0xff]  ;;  %v2429_v46 = vld [vmem:[#allocation4 + $0x11f8] sm:$0xff] }
 0x3e1   : > { %v6453_v23 = vpack.c.bf16 %v2429_v46, %v2427_v41  ;;  %v7420_v41 = vld [vmem:[#allocation27_spill] sm:$0xff]  ;;  %v7421_v46 = vld [vmem:[#allocation28_spill] sm:$0xff] }
 0x3e2   : > { %7401 = vst [vmem:[#allocation245_spill] sm:$0xff] %v6438_v43 }
 0x3e3   : > { %4560 = vmatpush1.bf16.msra.mxu0 %v6426_v61  ;;  %v2420_v61 = vld [vmem:[#allocation4 + $0x11b0] sm:$0xff] }
 0x3e4   : > { %4562 = vmatprep.subr.bf16.mxu0 %v6429_v63  ;;  %v6444_v9 = vpack.c.bf16 %v2420_v61, %v2418_v40  ;;  %v2422_v63 = vld [vmem:[#allocation4 + $0x11c0] sm:$0xff] }
 0x3e7   : > { %4564 = vmatpush1.bf16.msra.mxu0 %v6432_v58  ;;  %v2424_v58 = vld [vmem:[#allocation4 + $0x11d0] sm:$0xff] }
 0x3e8   : > { %4566 = vmatprep.subr.bf16.mxu0 %v6435_v34  ;;  %v6450_v28 = vpack.c.bf16 %v2424_v58, %v2422_v63  ;;  %v2426_v34 = vld [vmem:[#allocation4 + $0x11e0] sm:$0xff]  ;;  %v7415_v58 = vld [vmem:[#allocation22_spill] sm:$0xff] }
 0x3eb   : > { %4568 = vmatpush1.bf16.msra.mxu0 %v6438_v43  ;;  %v2428_v43 = vld [vmem:[#allocation4 + $0x11f0] sm:$0xff] }
 0x3ec   : > { %4570 = vmatprep.subr.bf16.mxu0 %v6441_v27  ;;  %v6456_v40 = vpack.c.bf16 %v2428_v43, %v2426_v34  ;;  %v7416_v34 = vld [vmem:[#allocation23_spill] sm:$0xff]  ;;  %v7417_v43 = vld [vmem:[#allocation24_spill] sm:$0xff] }
 0x3ef   : > { %4572 = vmatpush1.bf16.msra.mxu0 %v6444_v9 }
 0x3f0   : > { %4574 = vmatprep.subr.bf16.mxu0 %v6447_v49 }
 0x3f3   : > { %4576 = vmatpush1.bf16.msra.mxu0 %v6450_v28 }
 0x3f4   : > { %4578 = vmatprep.subr.bf16.mxu0 %v6453_v23 }
 0x3f7   : > { %4580 = vmatpush1.bf16.msra.mxu0 %v6456_v40 }
 0x3f8   : > { %4654 = vmatprep.subr.bf16.mxu0 %v5655_v21 }
 0x3fa   : > { %2495 = vmatmul.mubr.f32.vlgmr.msra.gmra.mrb[18].mxu0 %v5766_v18 }
 0x3fb   : > { %4656 = vmatpush1.bf16.msra.mxu0 %v5657_v35 }
 0x3fc   : > { %4658 = vmatprep.subr.bf16.mxu0 %v5660_v38 }
 0x3ff   : > { %4660 = vmatpush1.bf16.msra.mxu0 %v5664_v48 }
 0x400   : > { %4662 = vmatprep.subr.bf16.mxu0 %v5667_v51 }
 0x403   : > { %4664 = vmatpush1.bf16.msra.mxu0 %v5670_v59 }
 0x404   : > { %4666 = vmatprep.subr.bf16.mxu0 %v5673_v60 }
 0x407   : > { %4668 = vmatpush1.bf16.msra.mxu0 %v5676_v3 }
 0x408   : > { %4670 = vmatprep.subr.bf16.mxu0 %v5679_v6 }
 0x40b   : > { %4672 = vmatpush1.bf16.msra.mxu0 %v5682_v20 }
 0x40c   : > { %4674 = vmatprep.subr.bf16.mxu0 %v5685_v12 }
 0x40d   : > { %v1680_v21 = vpop.f32.mrb[12].mxu0  ;;  %v1816_v35 = vpop.f32.mrb[4].mxu1 }
 0x40e   : > { %v2509_v61 = vrot.slane %v1816_v35, 4  ;;  %v1682_v38 = vpop.f32.mrb[13].mxu0  ;;  %v1818_v63 = vpop.f32.mrb[5].mxu1  ;;  %v7423_v35 = vld [vmem:[#allocation30_spill] sm:$0xff] }
 0x40f   : > { %v2510_v48 = vrot.slane %v1818_v63, 4  ;;  %4676 = vmatpush1.bf16.msra.mxu0 %v5688_v39  ;;  %v7426_v63 = vld [vmem:[#allocation33_spill] sm:$0xff] }
 0x410   : > { %v2527_v51 = vsel %vm598_vm1, %v1680_v21, %v2509_v61  ;;  %4678 = vmatprep.subr.bf16.mxu0 %v5691_v42  ;;  %v7422_v21 = vld [vmem:[#allocation29_spill] sm:$0xff]  ;;  %v7424_v61 = vld [vmem:[#allocation31_spill] sm:$0xff] }
 0x411   : > { %v4583_v59 = vpack.c.bf16 %v2527_v51, %v6399_v25  ;;  %v2528_v60 = vsel %vm598_vm1, %v1682_v38, %v2510_v48  ;;  %v7413_v25 = vld [vmem:[#allocation20_spill] sm:$0xff]  ;;  %v7427_v48 = vld [vmem:[#allocation34_spill] sm:$0xff]  ;;  %v2538_v51 = vpop.permute.xlu0 %2537 }
 0x412   : > { %v4581_v3 = vpack.c.bf16 %v2528_v60, %v6405_v2  ;;  %v7414_v2 = vld [vmem:[#allocation21_spill] sm:$0xff]  ;;  %v7425_v38 = vld [vmem:[#allocation32_spill] sm:$0xff] }
 0x413   : > { %4680 = vmatpush1.bf16.msra.mxu0 %v5694_v56 }
 0x414   : > { %4582 = vmatprep.subr.bf16.mxu1 %v4581_v3  ;;  %4682 = vmatprep.subr.bf16.mxu0 %v5697_v57 }
 0x415   : > { %4584 = vmatpush1.bf16.msra.mxu1 %v4583_v59 }
 0x417   : > { %4684 = vmatpush1.bf16.msra.mxu0 %v5700_v8 }
 0x418   : > { %4686 = vmatprep.subr.bf16.mxu0 %v5703_v11 }
 0x41b   : > { %4688 = vmatpush1.bf16.msra.mxu0 %v5706_v29 }
 0x41c   : > { %4690 = vmatprep.subr.bf16.mxu0 %v5709_v33 }
 0x41f   : > { %4692 = vmatpush1.bf16.msra.mxu0 %v5712_v30 }
 0x420   : > { %4694 = vmatprep.subr.bf16.mxu0 %v5715_v62 }
 0x423   : > { %4696 = vmatpush1.bf16.msra.mxu0 %v5718_v24 }
 0x424   : > { %4698 = vmatprep.subr.bf16.mxu0 %v5721_v26 }
 0x427   : > { %4700 = vmatpush1.bf16.msra.mxu0 %v5724_v53 }
 0x428   : > { %4702 = vmatprep.subr.bf16.mxu0 %v5727_v54 }
 0x42b   : > { %4704 = vmatpush1.bf16.msra.mxu0 %v5730_v15 }
 0x42c   : > { %4706 = vmatprep.subr.bf16.mxu0 %v5733_v17 }
 0x42f   : > { %4708 = vmatpush1.bf16.msra.mxu0 %v5736_v44 }
 0x430   : > { %4710 = vmatprep.subr.bf16.mxu0 %v5739_v47  ;;  %v2533_v47 = vld [vmem:[%s6897_s6] sm:$0xf] }
 0x433   : > { %4712 = vmatpush1.bf16.msra.mxu0 %v5742_v32  ;;  %v7402_v32 = vld [vmem:[#allocation9_spill] sm:$0xff] }
 0x434   : > { %4714 = vmatprep.subr.bf16.mxu0 %v5748_v0  ;;  %v7403_v0 = vld [vmem:[#allocation10_spill] sm:$0xff] }
 0x437   : > { %4716 = vmatpush1.bf16.msra.mxu0 %v5753_v14  ;;  %v7404_v14 = vld [vmem:[#allocation11_spill] sm:$0xff] }
 0x438   : > { %4782 = vmatprep.subr.bf16.mxu0 %v5760_v5  ;;  %v7405_v5 = vld [vmem:[#allocation12_spill] sm:$0xff] }
 0x44d   : > { %v1952_v6 = vpop.f32.mrb[14].mxu0 }
 0x44e   : > { %v2088_v20 = vpop.f32.mrb[6].mxu1  ;;  %v1954_v12 = vpop.f32.mrb[15].mxu0 }
 0x44f   : > { %v2515_v39 = vrot.slane %v2088_v20, 4  ;;  %v2090_v42 = vpop.f32.mrb[7].mxu1 }
 0x450   : > { %v2516_v56 = vrot.slane %v2090_v42, 4 }
 0x451   : > { %v2529_v57 = vsel %vm598_vm1, %v1952_v6, %v2515_v39 }
 0x452   : > { %v2530_v8 = vsel %vm598_vm1, %v1954_v12, %v2516_v56 }
 0x48d   : > { %v2224_v11 = vpop.f32.mrb[16].mxu0 }
 0x48e   : > { %v2360_v29 = vpop.f32.mrb[8].mxu1  ;;  %v2226_v33 = vpop.f32.mrb[17].mxu0 }
 0x48f   : > { %v2521_v30 = vrot.slane %v2360_v29, 4  ;;  %v2362_v62 = vpop.f32.mrb[9].mxu1 }
 0x490   : > { %v2522_v24 = vrot.slane %v2362_v62, 4 }
 0x491   : > { %v2531_v26 = vsel %vm598_vm1, %v2224_v11, %v2521_v30 }
 0x492   : > { %v4587_v53 = vpack.c.bf16 %v2531_v26, %v2529_v57  ;;  %v2532_v54 = vsel %vm598_vm1, %v2226_v33, %v2522_v24 }
 0x493   : > { %v4585_v15 = vpack.c.bf16 %v2532_v54, %v2530_v8 }
 0x495   : > { %4586 = vmatprep.subr.bf16.mxu1 %v4585_v15 }
 0x496   : > { %4588 = vmatpush1.bf16.msra.mxu1 %v4587_v53 }
 0x4cd   : > { %v2496_v17 = vpop.f32.mrb[18].mxu0 }
 0x4ce   : > { %v2498_v44 = vpop.f32.mrb[19].mxu0 }
 0x4cf   : > { %3898 = vmatprep.subr.msk.mxu1 %vm598_vm1, %v2498_v44  ;;  %v2711_v44 = vld [vmem:[%s6899_s8] sm:$0xf] }
 0x4d0   : > { %3899 = vmatpush1.msk.msra.mxu1 %vm598_vm1, %v2496_v17 }
 0x4d1   : > { %3900 = vmatmul.mubr.msk.f32.vlgmr.msra.gmra.mrb[10].mxu1 %vm2540_vm4, %v2533_v47  ;;  %4590 = vmatprep.subr.bf16.mxu1 %v5557_v4  ;;  %v7406_v4 = vld [vmem:[#allocation13_spill] sm:$0xff] }
 0x4d2   : > { %4592 = vmatpush1.bf16.msra.mxu1 %v5560_v7  ;;  %v7407_v7 = vld [vmem:[#allocation14_spill] sm:$0xff]  ;;  %v2719_v47 = vld [vmem:[%s6900_s9] sm:$0xf] }
 0x4d3   : > { %4594 = vmatprep.subr.bf16.mxu1 %v5562_v10  ;;  %v7408_v10 = vld [vmem:[#allocation15_spill] sm:$0xff] }
 0x4d6   : > { %4596 = vmatpush1.bf16.msra.mxu1 %v5565_v13  ;;  %v7409_v13 = vld [vmem:[#allocation16_spill] sm:$0xff] }
 0x4d7   : > { %4598 = vmatprep.subr.bf16.mxu1 %v5568_v16  ;;  %v7410_v16 = vld [vmem:[#allocation17_spill] sm:$0xff] }
 0x4da   : > { %4600 = vmatpush1.bf16.msra.mxu1 %v5571_v19  ;;  %v7411_v19 = vld [vmem:[#allocation18_spill] sm:$0xff] }
 0x4db   : > { %4602 = vmatprep.subr.bf16.mxu1 %v5574_v22  ;;  %v7412_v22 = vld [vmem:[#allocation19_spill] sm:$0xff] }
 0x4de   : > { %4604 = vmatpush1.bf16.msra.mxu1 %v7402_v32  ;;  %v3409_v32 = vld [vmem:[%s6902_s11] sm:$0xf] }
 0x4df   : > { %4606 = vmatprep.subr.bf16.mxu1 %v7403_v0 }
 0x4e2   : > { %4608 = vmatpush1.bf16.msra.mxu1 %v7404_v14 }
 0x4e3   : > { %4610 = vmatprep.subr.bf16.mxu1 %v7405_v5 }
 0x4e6   : > { %4612 = vmatpush1.bf16.msra.mxu1 %v7406_v4 }
 0x4e7   : > { %4614 = vmatprep.subr.bf16.mxu1 %v7407_v7 }
 0x4ea   : > { %4616 = vmatpush1.bf16.msra.mxu1 %v7408_v10 }
 0x4eb   : > { %4618 = vmatprep.subr.bf16.mxu1 %v7409_v13 }
 0x4ee   : > { %4620 = vmatpush1.bf16.msra.mxu1 %v7410_v16 }
 0x4ef   : > { %4622 = vmatprep.subr.bf16.mxu1 %v7411_v19 }
 0x4f2   : > { %4624 = vmatpush1.bf16.msra.mxu1 %v7412_v22 }
 0x4f3   : > { %4626 = vmatprep.subr.bf16.mxu1 %v7413_v25 }
 0x4f6   : > { %4628 = vmatpush1.bf16.msra.mxu1 %v7414_v2 }
 0x4f7   : > { %4630 = vmatprep.subr.bf16.mxu1 %v7415_v58 }
 0x4fa   : > { %4632 = vmatpush1.bf16.msra.mxu1 %v7416_v34 }
 0x4fb   : > { %4634 = vmatprep.subr.bf16.mxu1 %v7417_v43 }
 0x4fe   : > { %4636 = vmatpush1.bf16.msra.mxu1 %v7418_v55 }
 0x4ff   : > { %4638 = vmatprep.subr.bf16.mxu1 %v7419_v31 }
 0x502   : > { %4640 = vmatpush1.bf16.msra.mxu1 %v7420_v41 }
 0x503   : > { %4642 = vmatprep.subr.bf16.mxu1 %v7421_v46 }
 0x506   : > { %4644 = vmatpush1.bf16.msra.mxu1 %v7422_v21 }
 0x507   : > { %4646 = vmatprep.subr.bf16.mxu1 %v7423_v35 }
 0x50a   : > { %4648 = vmatpush1.bf16.msra.mxu1 %v7424_v61 }
 0x50b   : > { %4650 = vmatprep.subr.bf16.mxu1 %v7425_v38 }
 0x50e   : > { %4652 = vmatpush1.bf16.msra.mxu1 %v7426_v63 }
 0x50f   : > { %4718 = vmatprep.subr.bf16.mxu1 %v7427_v48 }
 0x5a4   : > { %v2616_v59 = vpop.f32.mrb[10].mxu1 }
 0x5a5   : > { %v6541_v60 = vadd.f32 %v2616_v59, %v2538_v51  ;;  %v2618_v3 = vpop.f32.mrb[11].mxu1 }
 0x5a6   : > { %v6543_v6 = vadd.f32 %v2618_v3, %v2538_v51 }
 0x5a7   : > { %v2622_v20 = vsel %vm2621_vm5, %v6541_v60, 0.0  ;;  %v2663_v12 = vrot.slane %v6541_v60, 2  ;;  %v2637_v39 = vmul.f32 %v6541_v60, %v6541_v60 }
 0x5a8   : > { %v2623_v42 = vsel %vm2621_vm5, %v6543_v6, 0.0  ;;  %v2664_v56 = vrot.slane %v6543_v6, 2  ;;  %v2638_v57 = vmul.f32 %v6543_v6, %v6543_v6 }
 0x5a9   : > { %v2624_v8 = vadd.f32 %v2623_v42, %v2622_v20  ;;  %v2667_v11 = vsel %vm2621_vm5, %v2663_v12, 0.0  ;;  %v2639_v29 = vsel %vm2621_vm5, %v2637_v39, 0.0  ;;  %v2683_v62 = vrot.slane %v2637_v39, 2 }
 0x5aa   : > { %v2668_v33 = vsel %vm2621_vm5, %v2664_v56, 0.0  ;;  %v2640_v30 = vsel %vm2621_vm5, %v2638_v57, 0.0  ;;  %v2684_v24 = vrot.slane %v2638_v57, 2 }
 0x5ab   : > { %2625 = vadd.xlane.f32.xlu1 %v2624_v8  ;;  %v2669_v26 = vadd.f32 %v2668_v33, %v2667_v11  ;;  %v2641_v53 = vadd.f32 %v2640_v30, %v2639_v29  ;;  %v2687_v54 = vsel %vm2621_vm5, %v2683_v62, 0.0 }
 0x5ac   : > { %v2688_v15 = vsel %vm2621_vm5, %v2684_v24, 0.0 }
 0x5ad   : > { %2670 = vadd.xlane.f32.xlu0 %v2669_v26  ;;  %v2689_v17 = vadd.f32 %v2688_v15, %v2687_v54 }
 0x5af   : > { %2642 = vadd.xlane.f32.xlu1 %v2641_v53 }
 0x5b3   : > { %2690 = vadd.xlane.f32.xlu1 %v2689_v17 }
 0x5c4   : > { %2714 = vperm.xlu1 %5234, %v2711_v44  }
 0x5c8   : > { %2722 = vperm.xlu1 %5234, %v2719_v47  }
 0x5cc   : > { %3412 = vperm.xlu1 %5234, %v3409_v32  }
 0x638   : > { %v2626_v0 = vpop.xlane.xlu1 %2625 }
 0x639   : > { %v2627_v14 = vrot.slane %v2626_v0, 4 }
 0x63a   : > { %v2671_v5 = vpop.xlane.xlu0 %2670 }
 0x63b   : > { %v2628_v4 = vadd.f32 %v2627_v14, %v2626_v0  ;;  %v2672_v7 = vrot.slane %v2671_v5, 4 }
 0x63c   : > { %v2643_v10 = vpop.xlane.xlu1 %2642 }
 0x63d   : > { %v2629_v13 = vrot.slane %v2628_v4, 2  ;;  %v2673_v16 = vadd.f32 %v2672_v7, %v2671_v5  ;;  %v2644_v19 = vrot.slane %v2643_v10, 4 }
 0x63f   : > { %v2674_v22 = vrot.slane %v2673_v16, 2  ;;  %v2645_v25 = vadd.f32 %v2644_v19, %v2643_v10  ;;  %v2630_v2 = vadd.f32 %v2629_v13, %v2628_v4 }
 0x640   : > { %v2691_v58 = vpop.xlane.xlu1 %2690 }
 0x641   : > { %v2646_v34 = vrot.slane %v2645_v25, 2  ;;  %v2692_v43 = vrot.slane %v2691_v58, 4  ;;  %v2631_v55 = vrot.slane %v2630_v2, 1  ;;  %v2675_v31 = vadd.f32 %v2674_v22, %v2673_v16 }
 0x643   : > { %v2693_v41 = vadd.f32 %v2692_v43, %v2691_v58  ;;  %v2632_v46 = vadd.f32 %v2631_v55, %v2630_v2  ;;  %v2647_v21 = vadd.f32 %v2646_v34, %v2645_v25  ;;  %v2676_v35 = vrot.slane %v2675_v31, 1 }
 0x644   : > { %v2715_v47 = vpop.permute.xlu1 %2714 }
 0x645   : > { %v2694_v61 = vrot.slane %v2693_v41, 2  ;;  %5183 = vpush %v2632_v46  ;;  %v2648_v38 = vrot.slane %v2647_v21, 1  ;;  %v2677_v51 = vadd.f32 %v2676_v35, %v2675_v31  ;;  %v7429_v35 = vld [vmem:[#allocation37_spill] sm:$0xff] }
 0x647   : > { %v2649_v63 = vadd.f32 %v2648_v38, %v2647_v21  ;;  %v2695_v48 = vadd.f32 %v2694_v61, %v2693_v41  ;;  %v7428_v21 = vld [vmem:[#allocation36_spill] sm:$0xff]  ;;  %v7430_v61 = vld [vmem:[#allocation38_spill] sm:$0xff]  ;;  %v7431_v38 = vld [vmem:[#allocation39_spill] sm:$0xff] }
 0x648   : > { %v2723_v19 = vpop.permute.xlu1 %2722 }
 0x649   : > { %5185 = vpush %v2649_v63  ;;  %v2696_v59 = vrot.slane %v2695_v48, 1  ;;  %v7432_v63 = vld [vmem:[#allocation40_spill] sm:$0xff] }
 0x64a   : > { %5187 = vpush %v2677_v51  ;;  %v7434_v51 = vld [vmem:[#allocation42_spill] sm:$0xff] }
 0x64b   : > { %v2697_v3 = vadd.f32 %v2696_v59, %v2695_v48  ;;  %v7433_v48 = vld [vmem:[#allocation41_spill] sm:$0xff]  ;;  %v7435_v59 = vld [vmem:[#allocation43_spill] sm:$0xff] }
 0x64d   : > { %5189 = vpush %v2697_v3  ;;  %v7436_v3 = vld [vmem:[#allocation44_spill] sm:$0xff] }
 0x676   : > { %s5184_s24 = spop %5183 }
 0x677   : > { %v2634_v20 = vstv %s5184_s24 }
 0x678   : > { %v2636_v12 = vmul.f32 0.001953125, %v2634_v20  ;;  %v7437_v20 = vld [vmem:[#allocation45_spill] sm:$0xff] }
 0x67a   : > { %s5186_s28 = spop %5185  ;;  %v2653_v56 = vmul.f32 %v2636_v12, %v2636_v12  ;;  %v2655_v54 = vsub.f32 %v6541_v60, %v2636_v12  ;;  %v2656_v15 = vsub.f32 %v6543_v6, %v2636_v12  ;;  %v7438_v12 = vld [vmem:[#allocation46_spill] sm:$0xff] }
 0x67b   : > { %v2651_v39 = vstv %s5186_s28  ;;  %s5188_s0 = spop %5187 }
 0x67c   : > { %v2652_v42 = vmul.f32 0.001953125, %v2651_v39  ;;  %v2679_v57 = vstv %s5188_s0  ;;  %v7439_v39 = vld [vmem:[#allocation47_spill] sm:$0xff] }
 0x67d   : > { %v2680_v8 = vmul.f32 0.001953125, %v2679_v57  ;;  %v7442_v57 = vld [vmem:[#allocation50_spill] sm:$0xff] }
 0x67e   : > { %v2654_v11 = vsub.f32 %v2652_v42, %v2653_v56  ;;  %s5190_s30 = spop %5189  ;;  %v7440_v42 = vld [vmem:[#allocation48_spill] sm:$0xff]  ;;  %v7441_v56 = vld [vmem:[#allocation49_spill] sm:$0xff] }
 0x67f   : > { %v2699_v29 = vstv %s5190_s30  ;;  %v2701_v62 = vmul.f32 %v2680_v8, %v2680_v8  ;;  %v2703_v17 = vsub.f32 %v6541_v60, %v2680_v8  ;;  %v2704_v44 = vsub.f32 %v6543_v6, %v2680_v8  ;;  %v7443_v8 = vld [vmem:[#allocation51_spill] sm:$0xff] }
 0x680   : > { %v2657_v33 = vadd.f32 1e-05, %v2654_v11  ;;  %v2700_v30 = vmul.f32 0.001953125, %v2699_v29  ;;  %v7444_v11 = vld [vmem:[#allocation52_spill] sm:$0xff]  ;;  %v7445_v29 = vld [vmem:[#allocation53_spill] sm:$0xff] }
 0x682   : > { %v2702_v24 = vsub.f32 %v2700_v30, %v2701_v62  ;;  %5235 = vrsqrt.f32 %v2657_v33  ;;  %v7446_v33 = vld [vmem:[#allocation54_spill] sm:$0xff]  ;;  %v7447_v30 = vld [vmem:[#allocation55_spill] sm:$0xff]  ;;  %v7448_v62 = vld [vmem:[#allocation56_spill] sm:$0xff] }
 0x684   : > { %v2705_v26 = vadd.f32 1e-05, %v2702_v24  ;;  %v7449_v24 = vld [vmem:[#allocation57_spill] sm:$0xff] }
 0x686   : > { %5237 = vrsqrt.f32 %v2705_v26  ;;  %v7450_v26 = vld [vmem:[#allocation58_spill] sm:$0xff] }
 0x68c   : > { %v5236_v53 = vpop.eup %5235 }
 0x68d   : > { %v2659_v0 = vmul.f32 %v5236_v53, %v2655_v54  ;;  %v2660_v14 = vmul.f32 %v5236_v53, %v2656_v15  ;;  %v7451_v53 = vld [vmem:[#allocation59_spill] sm:$0xff]  ;;  %v7452_v54 = vld [vmem:[#allocation60_spill] sm:$0xff]  ;;  %v7453_v15 = vld [vmem:[#allocation61_spill] sm:$0xff] }
 0x690   : > { %v5238_v32 = vpop.eup %5237 }
 0x691   : > { %v2707_v5 = vmul.f32 %v5238_v32, %v2703_v17  ;;  %v2708_v4 = vmul.f32 %v5238_v32, %v2704_v44  ;;  %v7454_v17 = vld [vmem:[#allocation62_spill] sm:$0xff]  ;;  %v7455_v44 = vld [vmem:[#allocation63_spill] sm:$0xff]  ;;  %v7457_v32 = vld [vmem:[#allocation65_spill] sm:$0xff] }
 0x693   : > { %v2709_v7 = vsel %vm2621_vm5, %v2659_v0, %v2707_v5  ;;  %v2710_v10 = vsel %vm2621_vm5, %v2660_v14, %v2708_v4  ;;  %v7458_v0 = vld [vmem:[#allocation66_spill] sm:$0xff]  ;;  %v7459_v14 = vld [vmem:[#allocation67_spill] sm:$0xff]  ;;  %v7460_v5 = vld [vmem:[#allocation68_spill] sm:$0xff] }
 0x694   : > { %v2717_v13 = vmul.f32 %v2715_v47, %v2709_v7  ;;  %v2718_v16 = vmul.f32 %v2715_v47, %v2710_v10  ;;  %v7456_v47 = vld [vmem:[#allocation64_spill] sm:$0xff]  ;;  %v7461_v4 = vld [vmem:[#allocation69_spill] sm:$0xff]  ;;  %v7462_v7 = vld [vmem:[#allocation70_spill] sm:$0xff] }
 0x695   : > { %v7463_v10 = vld [vmem:[#allocation71_spill] sm:$0xff] }
 0x696   : > { %v2725_v22 = vadd.f32 %v2723_v19, %v2717_v13  ;;  %v2726_v25 = vadd.f32 %v2723_v19, %v2718_v16  ;;  %v7464_v13 = vld [vmem:[#allocation72_spill] sm:$0xff]  ;;  %v7465_v16 = vld [vmem:[#allocation73_spill] sm:$0xff]  ;;  %v7466_v19 = vld [vmem:[#allocation74_spill] sm:$0xff] }
 0x698   : > { %v2727_v2 = vmul.f32 0.5, %v2725_v22  ;;  %v2728_v58 = vmul.f32 0.5, %v2726_v25 }
 0x69a   : > { %5239 = vtanh.f32 %v2727_v2  ;;  %v7469_v2 = vld [vmem:[#allocation77_spill] sm:$0xff] }
 0x69b   : > { %5241 = vtanh.f32 %v2728_v58  ;;  %v7470_v58 = vld [vmem:[#allocation78_spill] sm:$0xff] }
 0x6a4   : > { %v5240_v60 = vpop.eup %5239 }
 0x6a5   : > { %v5242_v6 = vpop.eup %5241  ;;  %v2731_v34 = vadd.f32 1.0, %v5240_v60  ;;  %v7471_v60 = vld [vmem:[#allocation79_spill] sm:$0xff] }
 0x6a6   : > { %v2732_v43 = vadd.f32 1.0, %v5242_v6  ;;  %v7472_v6 = vld [vmem:[#allocation80_spill] sm:$0xff] }
 0x6a7   : > { %v2733_v55 = vmul.f32 0.5, %v2731_v34  ;;  %v7473_v34 = vld [vmem:[#allocation81_spill] sm:$0xff] }
 0x6a8   : > { %v2734_v31 = vmul.f32 0.5, %v2732_v43  ;;  %v7474_v43 = vld [vmem:[#allocation82_spill] sm:$0xff] }
 0x6a9   : > { %v6576_v41 = vmul.f32 %v2733_v55, %v2725_v22  ;;  %v7467_v22 = vld [vmem:[#allocation75_spill] sm:$0xff] }
 0x6aa   : > { %v6578_v46 = vmul.f32 %v2734_v31, %v2726_v25  ;;  %v7468_v25 = vld [vmem:[#allocation76_spill] sm:$0xff]  ;;  %v7475_v55 = vld [vmem:[#allocation83_spill] sm:$0xff] }
 0x6ab   : > { %v7476_v31 = vld [vmem:[#allocation84_spill] sm:$0xff] }
 0x6ac   : > { %2801 = vmatprep.mubr.f32.mxu1 %v6578_v46  ;;  %2872 = vmatprep.mubr.f32.mxu0 %v6578_v46 }
 0x6ad   : > { %2802 = vmatmul.mubr.f32.vlgmr.msra.gmra.mrb[12].mxu1 %v6576_v41  ;;  %2873 = vmatmul.mubr.f32.vlgmr.msra.gmra.mrb[20].mxu0 %v6576_v41 }
 0x6ae   : > { %4720 = vmatpush1.bf16.msra.mxu1 %v7428_v21  ;;  %4784 = vmatpush1.bf16.msra.mxu0 %v7429_v35  ;;  %v7477_v21 = vld [vmem:[#allocation85_spill] sm:$0xff]  ;;  %v7478_v35 = vld [vmem:[#allocation86_spill] sm:$0xff] }
 0x6af   : > { %2943 = vmatprep.mubr.f32.mxu1 %v6578_v46  ;;  %3014 = vmatprep.mubr.f32.mxu0 %v6578_v46 }
 0x6b0   : > { %4722 = vmatprep.subr.bf16.mxu1 %v7430_v61  ;;  %4786 = vmatprep.subr.bf16.mxu0 %v7431_v38  ;;  %v7479_v61 = vld [vmem:[#allocation87_spill] sm:$0xff]  ;;  %v7480_v38 = vld [vmem:[#allocation88_spill] sm:$0xff] }
 0x6b2   : > { %4724 = vmatpush1.bf16.msra.mxu1 %v7432_v63  ;;  %4788 = vmatpush1.bf16.msra.mxu0 %v7433_v48  ;;  %v7481_v63 = vld [vmem:[#allocation89_spill] sm:$0xff]  ;;  %v7482_v48 = vld [vmem:[#allocation90_spill] sm:$0xff] }
 0x6b3   : > { %4726 = vmatprep.subr.bf16.mxu1 %v7434_v51  ;;  %4790 = vmatprep.subr.bf16.mxu0 %v7435_v59  ;;  %v7483_v51 = vld [vmem:[#allocation91_spill] sm:$0xff]  ;;  %v7484_v59 = vld [vmem:[#allocation92_spill] sm:$0xff] }
 0x6b6   : > { %4728 = vmatpush1.bf16.msra.mxu1 %v7436_v3  ;;  %4792 = vmatpush1.bf16.msra.mxu0 %v7437_v20  ;;  %v7485_v3 = vld [vmem:[#allocation93_spill] sm:$0xff]  ;;  %v7486_v20 = vld [vmem:[#allocation94_spill] sm:$0xff] }
 0x6b7   : > { %4730 = vmatprep.subr.bf16.mxu1 %v7438_v12  ;;  %4794 = vmatprep.subr.bf16.mxu0 %v7439_v39  ;;  %v7487_v12 = vld [vmem:[#allocation95_spill] sm:$0xff]  ;;  %v7488_v39 = vld [vmem:[#allocation96_spill] sm:$0xff] }
 0x6ba   : > { %4732 = vmatpush1.bf16.msra.mxu1 %v7440_v42  ;;  %4796 = vmatpush1.bf16.msra.mxu0 %v7441_v56  ;;  %v7489_v42 = vld [vmem:[#allocation97_spill] sm:$0xff]  ;;  %v7490_v56 = vld [vmem:[#allocation98_spill] sm:$0xff] }
 0x6bb   : > { %4734 = vmatprep.subr.bf16.mxu1 %v7442_v57  ;;  %4798 = vmatprep.subr.bf16.mxu0 %v7443_v8  ;;  %v7491_v57 = vld [vmem:[#allocation99_spill] sm:$0xff]  ;;  %v7492_v8 = vld [vmem:[#allocation100_spill] sm:$0xff] }
 0x6be   : > { %4736 = vmatpush1.bf16.msra.mxu1 %v7444_v11  ;;  %4800 = vmatpush1.bf16.msra.mxu0 %v7445_v29  ;;  %v7494_v11 = vld [vmem:[#allocation102_spill] sm:$0xff]  ;;  %v7495_v29 = vld [vmem:[#allocation103_spill] sm:$0xff] }
 0x6bf   : > { %4738 = vmatprep.subr.bf16.mxu1 %v7446_v33  ;;  %4802 = vmatprep.subr.bf16.mxu0 %v7447_v30  ;;  %v7496_v33 = vld [vmem:[#allocation104_spill] sm:$0xff]  ;;  %v7497_v30 = vld [vmem:[#allocation105_spill] sm:$0xff] }
 0x6c2   : > { %4740 = vmatpush1.bf16.msra.mxu1 %v7448_v62  ;;  %4804 = vmatpush1.bf16.msra.mxu0 %v7449_v24  ;;  %v7498_v62 = vld [vmem:[#allocation106_spill] sm:$0xff]  ;;  %v7499_v24 = vld [vmem:[#allocation107_spill] sm:$0xff] }
 0x6c3   : > { %4742 = vmatprep.subr.bf16.mxu1 %v7450_v26  ;;  %4806 = vmatprep.subr.bf16.mxu0 %v7451_v53  ;;  %v7500_v26 = vld [vmem:[#allocation108_spill] sm:$0xff]  ;;  %v7501_v53 = vld [vmem:[#allocation109_spill] sm:$0xff] }
 0x6c6   : > { %4744 = vmatpush1.bf16.msra.mxu1 %v7452_v54  ;;  %4808 = vmatpush1.bf16.msra.mxu0 %v7453_v15  ;;  %v7502_v54 = vld [vmem:[#allocation110_spill] sm:$0xff]  ;;  %v7503_v15 = vld [vmem:[#allocation111_spill] sm:$0xff] }
 0x6c7   : > { %4746 = vmatprep.subr.bf16.mxu1 %v7454_v17  ;;  %4810 = vmatprep.subr.bf16.mxu0 %v7455_v44  ;;  %v7504_v17 = vld [vmem:[#allocation112_spill] sm:$0xff]  ;;  %v7505_v44 = vld [vmem:[#allocation113_spill] sm:$0xff] }
 0x6ca   : > { %4748 = vmatpush1.bf16.msra.mxu1 %v7456_v47  ;;  %4812 = vmatpush1.bf16.msra.mxu0 %v7457_v32  ;;  %v7506_v47 = vld [vmem:[#allocation114_spill] sm:$0xff]  ;;  %v7507_v32 = vld [vmem:[#allocation115_spill] sm:$0xff] }
 0x6cb   : > { %4750 = vmatprep.subr.bf16.mxu1 %v7458_v0  ;;  %4814 = vmatprep.subr.bf16.mxu0 %v7459_v14  ;;  %v7508_v0 = vld [vmem:[#allocation116_spill] sm:$0xff]  ;;  %v7509_v14 = vld [vmem:[#allocation117_spill] sm:$0xff] }
 0x6ce   : > { %4752 = vmatpush1.bf16.msra.mxu1 %v7460_v5  ;;  %4816 = vmatpush1.bf16.msra.mxu0 %v7461_v4  ;;  %v7510_v5 = vld [vmem:[#allocation118_spill] sm:$0xff]  ;;  %v7511_v4 = vld [vmem:[#allocation119_spill] sm:$0xff] }
 0x6cf   : > { %4754 = vmatprep.subr.bf16.mxu1 %v7462_v7  ;;  %4818 = vmatprep.subr.bf16.mxu0 %v7463_v10  ;;  %v7512_v7 = vld [vmem:[#allocation120_spill] sm:$0xff]  ;;  %v7513_v10 = vld [vmem:[#allocation121_spill] sm:$0xff] }
 0x6d2   : > { %4756 = vmatpush1.bf16.msra.mxu1 %v7464_v13  ;;  %4820 = vmatpush1.bf16.msra.mxu0 %v7465_v16  ;;  %v7514_v13 = vld [vmem:[#allocation122_spill] sm:$0xff]  ;;  %v7515_v16 = vld [vmem:[#allocation123_spill] sm:$0xff] }
 0x6d3   : > { %4758 = vmatprep.subr.bf16.mxu1 %v7466_v19  ;;  %4822 = vmatprep.subr.bf16.mxu0 %v7467_v22  ;;  %v7516_v19 = vld [vmem:[#allocation124_spill] sm:$0xff]  ;;  %v7517_v22 = vld [vmem:[#allocation125_spill] sm:$0xff] }
 0x6d6   : > { %4760 = vmatpush1.bf16.msra.mxu1 %v7468_v25  ;;  %4824 = vmatpush1.bf16.msra.mxu0 %v7469_v2  ;;  %v7518_v25 = vld [vmem:[#allocation126_spill] sm:$0xff]  ;;  %v7519_v2 = vld [vmem:[#allocation127_spill] sm:$0xff] }
 0x6d7   : > { %4762 = vmatprep.subr.bf16.mxu1 %v7470_v58  ;;  %4826 = vmatprep.subr.bf16.mxu0 %v7471_v60  ;;  %v7520_v58 = vld [vmem:[#allocation128_spill] sm:$0xff]  ;;  %v7521_v60 = vld [vmem:[#allocation129_spill] sm:$0xff] }
 0x6da   : > { %4764 = vmatpush1.bf16.msra.mxu1 %v7472_v6  ;;  %4828 = vmatpush1.bf16.msra.mxu0 %v7473_v34  ;;  %v7522_v6 = vld [vmem:[#allocation130_spill] sm:$0xff]  ;;  %v7523_v34 = vld [vmem:[#allocation131_spill] sm:$0xff] }
 0x6db   : > { %4766 = vmatprep.subr.bf16.mxu1 %v7474_v43  ;;  %4830 = vmatprep.subr.bf16.mxu0 %v7475_v55  ;;  %v7524_v43 = vld [vmem:[#allocation132_spill] sm:$0xff]  ;;  %v7525_v55 = vld [vmem:[#allocation133_spill] sm:$0xff] }
 0x6de   : > { %4768 = vmatpush1.bf16.msra.mxu1 %v7476_v31  ;;  %4832 = vmatpush1.bf16.msra.mxu0 %v7477_v21  ;;  %v7526_v31 = vld [vmem:[#allocation134_spill] sm:$0xff]  ;;  %v7527_v21 = vld [vmem:[#allocation135_spill] sm:$0xff] }
 0x6df   : > { %4770 = vmatprep.subr.bf16.mxu1 %v7478_v35  ;;  %4834 = vmatprep.subr.bf16.mxu0 %v7479_v61  ;;  %v7528_v35 = vld [vmem:[#allocation136_spill] sm:$0xff]  ;;  %v7529_v61 = vld [vmem:[#allocation137_spill] sm:$0xff] }
 0x6e2   : > { %4772 = vmatpush1.bf16.msra.mxu1 %v7480_v38  ;;  %4836 = vmatpush1.bf16.msra.mxu0 %v7481_v63  ;;  %v7530_v38 = vld [vmem:[#allocation138_spill] sm:$0xff]  ;;  %v7531_v63 = vld [vmem:[#allocation139_spill] sm:$0xff] }
 0x6e3   : > { %4774 = vmatprep.subr.bf16.mxu1 %v7482_v48  ;;  %4838 = vmatprep.subr.bf16.mxu0 %v7483_v51  ;;  %v7532_v48 = vld [vmem:[#allocation140_spill] sm:$0xff]  ;;  %v7533_v51 = vld [vmem:[#allocation141_spill] sm:$0xff] }
 0x6e6   : > { %4776 = vmatpush1.bf16.msra.mxu1 %v7484_v59  ;;  %4840 = vmatpush1.bf16.msra.mxu0 %v7485_v3  ;;  %v7534_v59 = vld [vmem:[#allocation142_spill] sm:$0xff]  ;;  %v7535_v3 = vld [vmem:[#allocation143_spill] sm:$0xff] }
 0x6e7   : > { %4778 = vmatprep.subr.bf16.mxu1 %v5948_v50  ;;  %4842 = vmatprep.subr.bf16.mxu0 %v7486_v20  ;;  %v7493_v50 = vld [vmem:[#allocation101_spill] sm:$0xff]  ;;  %v7536_v20 = vld [vmem:[#allocation144_spill] sm:$0xff] }
 0x6ea   : > { %4780 = vmatpush1.bf16.msra.mxu1 %v7487_v12  ;;  %4844 = vmatpush1.bf16.msra.mxu0 %v7488_v39  ;;  %v7537_v12 = vld [vmem:[#allocation145_spill] sm:$0xff]  ;;  %v7538_v39 = vld [vmem:[#allocation146_spill] sm:$0xff] }
 0x6eb   : > { %4846 = vmatprep.subr.bf16.mxu1 %v7489_v42  ;;  %4910 = vmatprep.subr.bf16.mxu0 %v7490_v56  ;;  %v7539_v42 = vld [vmem:[#allocation147_spill] sm:$0xff]  ;;  %v7540_v56 = vld [vmem:[#allocation148_spill] sm:$0xff] }
 0x6ed   : > { %2944 = vmatmul.mubr.f32.vlgmr.msra.gmra.mrb[14].mxu1 %v6576_v41  ;;  %3015 = vmatmul.mubr.f32.vlgmr.msra.gmra.mrb[22].mxu0 %v6576_v41 }
 0x6ee   : > { %4848 = vmatpush1.bf16.msra.mxu1 %v7491_v57  ;;  %3085 = vmatprep.mubr.f32.mxu1 %v6578_v46  ;;  %v7541_v57 = vld [vmem:[#allocation149_spill] sm:$0xff] }
 0x6ef   : > { %4912 = vmatpush1.bf16.msra.mxu0 %v7492_v8  ;;  %3156 = vmatprep.mubr.f32.mxu0 %v6578_v46  ;;  %v7542_v8 = vld [vmem:[#allocation150_spill] sm:$0xff] }
 0x6f0   : > { %4850 = vmatprep.subr.bf16.mxu1 %v7493_v50  ;;  %4914 = vmatprep.subr.bf16.mxu0 %v7494_v11  ;;  %v7543_v50 = vld [vmem:[#allocation151_spill] sm:$0xff]  ;;  %v7544_v11 = vld [vmem:[#allocation152_spill] sm:$0xff] }
 0x6f2   : > { %4852 = vmatpush1.bf16.msra.mxu1 %v7495_v29  ;;  %v7545_v29 = vld [vmem:[#allocation153_spill] sm:$0xff] }
 0x6f3   : > { %4916 = vmatpush1.bf16.msra.mxu0 %v7496_v33  ;;  %4854 = vmatprep.subr.bf16.mxu1 %v7497_v30  ;;  %v7546_v33 = vld [vmem:[#allocation154_spill] sm:$0xff]  ;;  %v7547_v30 = vld [vmem:[#allocation155_spill] sm:$0xff] }
 0x6f4   : > { %4918 = vmatprep.subr.bf16.mxu0 %v7498_v62  ;;  %v7548_v62 = vld [vmem:[#allocation156_spill] sm:$0xff] }
 0x6f6   : > { %4856 = vmatpush1.bf16.msra.mxu1 %v7499_v24  ;;  %v7549_v24 = vld [vmem:[#allocation157_spill] sm:$0xff] }
 0x6f7   : > { %4920 = vmatpush1.bf16.msra.mxu0 %v7500_v26  ;;  %4858 = vmatprep.subr.bf16.mxu1 %v7501_v53  ;;  %v7550_v26 = vld [vmem:[#allocation158_spill] sm:$0xff]  ;;  %v7551_v53 = vld [vmem:[#allocation159_spill] sm:$0xff] }
 0x6f8   : > { %4922 = vmatprep.subr.bf16.mxu0 %v7502_v54  ;;  %v7552_v54 = vld [vmem:[#allocation160_spill] sm:$0xff] }
 0x6fa   : > { %4860 = vmatpush1.bf16.msra.mxu1 %v7503_v15  ;;  %v7553_v15 = vld [vmem:[#allocation161_spill] sm:$0xff] }
 0x6fb   : > { %4924 = vmatpush1.bf16.msra.mxu0 %v7504_v17  ;;  %4862 = vmatprep.subr.bf16.mxu1 %v7505_v44  ;;  %v7554_v17 = vld [vmem:[#allocation162_spill] sm:$0xff]  ;;  %v7555_v44 = vld [vmem:[#allocation163_spill] sm:$0xff] }
 0x6fc   : > { %4926 = vmatprep.subr.bf16.mxu0 %v7506_v47  ;;  %v7556_v47 = vld [vmem:[#allocation164_spill] sm:$0xff] }
 0x6fe   : > { %4864 = vmatpush1.bf16.msra.mxu1 %v7507_v32  ;;  %v7557_v32 = vld [vmem:[#allocation165_spill] sm:$0xff] }
 0x6ff   : > { %4928 = vmatpush1.bf16.msra.mxu0 %v7508_v0  ;;  %4866 = vmatprep.subr.bf16.mxu1 %v7509_v14  ;;  %v7558_v0 = vld [vmem:[#allocation166_spill] sm:$0xff]  ;;  %v7559_v14 = vld [vmem:[#allocation167_spill] sm:$0xff] }
 0x700   : > { %4930 = vmatprep.subr.bf16.mxu0 %v7510_v5  ;;  %v7560_v5 = vld [vmem:[#allocation168_spill] sm:$0xff] }
 0x702   : > { %4868 = vmatpush1.bf16.msra.mxu1 %v7511_v4  ;;  %v7561_v4 = vld [vmem:[#allocation169_spill] sm:$0xff] }
 0x703   : > { %4932 = vmatpush1.bf16.msra.mxu0 %v7512_v7  ;;  %4870 = vmatprep.subr.bf16.mxu1 %v7513_v10  ;;  %v7562_v7 = vld [vmem:[#allocation170_spill] sm:$0xff]  ;;  %v7563_v10 = vld [vmem:[#allocation171_spill] sm:$0xff] }
 0x704   : > { %4934 = vmatprep.subr.bf16.mxu0 %v7514_v13  ;;  %v7564_v13 = vld [vmem:[#allocation172_spill] sm:$0xff] }
 0x706   : > { %4872 = vmatpush1.bf16.msra.mxu1 %v7515_v16  ;;  %v7565_v16 = vld [vmem:[#allocation173_spill] sm:$0xff] }
 0x707   : > { %4936 = vmatpush1.bf16.msra.mxu0 %v7516_v19  ;;  %4874 = vmatprep.subr.bf16.mxu1 %v7517_v22  ;;  %v7566_v19 = vld [vmem:[#allocation174_spill] sm:$0xff]  ;;  %v7567_v22 = vld [vmem:[#allocation175_spill] sm:$0xff] }
 0x708   : > { %4938 = vmatprep.subr.bf16.mxu0 %v7518_v25  ;;  %v7568_v25 = vld [vmem:[#allocation176_spill] sm:$0xff] }
 0x70a   : > { %4876 = vmatpush1.bf16.msra.mxu1 %v7519_v2  ;;  %v7569_v2 = vld [vmem:[#allocation177_spill] sm:$0xff] }
 0x70b   : > { %4940 = vmatpush1.bf16.msra.mxu0 %v7520_v58  ;;  %4878 = vmatprep.subr.bf16.mxu1 %v7521_v60  ;;  %v7570_v58 = vld [vmem:[#allocation178_spill] sm:$0xff]  ;;  %v7571_v60 = vld [vmem:[#allocation179_spill] sm:$0xff] }
 0x70c   : > { %4942 = vmatprep.subr.bf16.mxu0 %v7522_v6  ;;  %v7572_v6 = vld [vmem:[#allocation180_spill] sm:$0xff] }
 0x70e   : > { %4880 = vmatpush1.bf16.msra.mxu1 %v7523_v34  ;;  %v7573_v34 = vld [vmem:[#allocation181_spill] sm:$0xff] }
 0x70f   : > { %4944 = vmatpush1.bf16.msra.mxu0 %v7524_v43  ;;  %4882 = vmatprep.subr.bf16.mxu1 %v7525_v55  ;;  %v7574_v43 = vld [vmem:[#allocation182_spill] sm:$0xff]  ;;  %v7575_v55 = vld [vmem:[#allocation183_spill] sm:$0xff] }
 0x710   : > { %4946 = vmatprep.subr.bf16.mxu0 %v7526_v31  ;;  %v7576_v31 = vld [vmem:[#allocation184_spill] sm:$0xff] }
 0x712   : > { %4884 = vmatpush1.bf16.msra.mxu1 %v7527_v21  ;;  %v7577_v21 = vld [vmem:[#allocation185_spill] sm:$0xff] }
 0x713   : > { %4948 = vmatpush1.bf16.msra.mxu0 %v7528_v35  ;;  %4886 = vmatprep.subr.bf16.mxu1 %v7529_v61  ;;  %v7578_v35 = vld [vmem:[#allocation186_spill] sm:$0xff]  ;;  %v7579_v61 = vld [vmem:[#allocation187_spill] sm:$0xff] }
 0x714   : > { %4950 = vmatprep.subr.bf16.mxu0 %v7530_v38  ;;  %v7580_v38 = vld [vmem:[#allocation188_spill] sm:$0xff] }
 0x716   : > { %4888 = vmatpush1.bf16.msra.mxu1 %v7531_v63  ;;  %v7581_v63 = vld [vmem:[#allocation189_spill] sm:$0xff] }
 0x717   : > { %4952 = vmatpush1.bf16.msra.mxu0 %v7532_v48  ;;  %4890 = vmatprep.subr.bf16.mxu1 %v7533_v51  ;;  %v7582_v48 = vld [vmem:[#allocation190_spill] sm:$0xff]  ;;  %v7583_v51 = vld [vmem:[#allocation191_spill] sm:$0xff] }
 0x718   : > { %4954 = vmatprep.subr.bf16.mxu0 %v7534_v59  ;;  %v7584_v59 = vld [vmem:[#allocation192_spill] sm:$0xff] }
 0x71a   : > { %4892 = vmatpush1.bf16.msra.mxu1 %v7535_v3  ;;  %v7585_v3 = vld [vmem:[#allocation193_spill] sm:$0xff] }
 0x71b   : > { %4956 = vmatpush1.bf16.msra.mxu0 %v7536_v20  ;;  %4894 = vmatprep.subr.bf16.mxu1 %v7537_v12  ;;  %v7586_v20 = vld [vmem:[#allocation194_spill] sm:$0xff]  ;;  %v7587_v12 = vld [vmem:[#allocation195_spill] sm:$0xff] }
 0x71c   : > { %4958 = vmatprep.subr.bf16.mxu0 %v7538_v39  ;;  %v7588_v39 = vld [vmem:[#allocation196_spill] sm:$0xff] }
 0x71e   : > { %4896 = vmatpush1.bf16.msra.mxu1 %v7539_v42  ;;  %v7589_v42 = vld [vmem:[#allocation197_spill] sm:$0xff] }
 0x71f   : > { %4960 = vmatpush1.bf16.msra.mxu0 %v7540_v56  ;;  %4898 = vmatprep.subr.bf16.mxu1 %v7541_v57  ;;  %v7590_v56 = vld [vmem:[#allocation198_spill] sm:$0xff]  ;;  %v7591_v57 = vld [vmem:[#allocation199_spill] sm:$0xff] }
 0x720   : > { %4962 = vmatprep.subr.bf16.mxu0 %v7542_v8  ;;  %v7592_v8 = vld [vmem:[#allocation200_spill] sm:$0xff] }
 0x722   : > { %4900 = vmatpush1.bf16.msra.mxu1 %v7543_v50  ;;  %v7593_v50 = vld [vmem:[#allocation201_spill] sm:$0xff] }
 0x723   : > { %4964 = vmatpush1.bf16.msra.mxu0 %v7544_v11  ;;  %4902 = vmatprep.subr.bf16.mxu1 %v7545_v29  ;;  %v7594_v11 = vld [vmem:[#allocation202_spill] sm:$0xff]  ;;  %v7595_v29 = vld [vmem:[#allocation203_spill] sm:$0xff] }
 0x724   : > { %4966 = vmatprep.subr.bf16.mxu0 %v7546_v33  ;;  %v7596_v33 = vld [vmem:[#allocation204_spill] sm:$0xff] }
 0x726   : > { %4904 = vmatpush1.bf16.msra.mxu1 %v7547_v30  ;;  %v7597_v30 = vld [vmem:[#allocation205_spill] sm:$0xff] }
 0x727   : > { %4968 = vmatpush1.bf16.msra.mxu0 %v7548_v62  ;;  %4906 = vmatprep.subr.bf16.mxu1 %v7549_v24  ;;  %v7598_v62 = vld [vmem:[#allocation206_spill] sm:$0xff]  ;;  %v7599_v24 = vld [vmem:[#allocation207_spill] sm:$0xff] }
 0x728   : > { %4970 = vmatprep.subr.bf16.mxu0 %v7550_v26  ;;  %v7600_v26 = vld [vmem:[#allocation208_spill] sm:$0xff] }
 0x72a   : > { %4908 = vmatpush1.bf16.msra.mxu1 %v7551_v53  ;;  %v7601_v53 = vld [vmem:[#allocation209_spill] sm:$0xff] }
 0x72b   : > { %4972 = vmatpush1.bf16.msra.mxu0 %v7552_v54  ;;  %4974 = vmatprep.subr.bf16.mxu1 %v7553_v15  ;;  %v7602_v54 = vld [vmem:[#allocation210_spill] sm:$0xff]  ;;  %v7603_v15 = vld [vmem:[#allocation211_spill] sm:$0xff] }
 0x72c   : > { %5038 = vmatprep.subr.bf16.mxu0 %v7554_v17  ;;  %v7604_v17 = vld [vmem:[#allocation212_spill] sm:$0xff] }
 0x72d   : > { %3086 = vmatmul.mubr.f32.vlgmr.msra.gmra.mrb[16].mxu1 %v6576_v41 }
 0x72e   : > { %3157 = vmatmul.mubr.f32.vlgmr.msra.gmra.mrb[24].mxu0 %v6576_v41  ;;  %4976 = vmatpush1.bf16.msra.mxu1 %v7555_v44  ;;  %v7605_v44 = vld [vmem:[#allocation213_spill] sm:$0xff] }
 0x72f   : > { %3227 = vmatprep.mubr.f32.mxu1 %v6578_v46  ;;  %5040 = vmatpush1.bf16.msra.mxu0 %v7556_v47  ;;  %v7606_v47 = vld [vmem:[#allocation214_spill] sm:$0xff] }
 0x730   : > { %3298 = vmatprep.mubr.f32.mxu0 %v6578_v46  ;;  %4978 = vmatprep.subr.bf16.mxu1 %v7557_v32  ;;  %v7607_v32 = vld [vmem:[#allocation215_spill] sm:$0xff] }
 0x731   : > { %5042 = vmatprep.subr.bf16.mxu0 %v7558_v0  ;;  %v7608_v0 = vld [vmem:[#allocation216_spill] sm:$0xff] }
 0x732   : > { %4980 = vmatpush1.bf16.msra.mxu1 %v7559_v14  ;;  %v7609_v14 = vld [vmem:[#allocation217_spill] sm:$0xff] }
 0x733   : > { %5044 = vmatpush1.bf16.msra.mxu0 %v7560_v5  ;;  %4982 = vmatprep.subr.bf16.mxu1 %v7561_v4  ;;  %v7610_v5 = vld [vmem:[#allocation218_spill] sm:$0xff]  ;;  %v7611_v4 = vld [vmem:[#allocation219_spill] sm:$0xff] }
 0x734   : > { %5046 = vmatprep.subr.bf16.mxu0 %v7562_v7  ;;  %v7612_v7 = vld [vmem:[#allocation220_spill] sm:$0xff] }
 0x736   : > { %4984 = vmatpush1.bf16.msra.mxu1 %v7563_v10  ;;  %v7613_v10 = vld [vmem:[#allocation221_spill] sm:$0xff] }
 0x737   : > { %5048 = vmatpush1.bf16.msra.mxu0 %v7564_v13  ;;  %4986 = vmatprep.subr.bf16.mxu1 %v7565_v16  ;;  %v7614_v13 = vld [vmem:[#allocation222_spill] sm:$0xff]  ;;  %v7618_v16 = vld [vmem:[#allocation225_spill] sm:$0xff] }
 0x738   : > { %5050 = vmatprep.subr.bf16.mxu0 %v7566_v19  ;;  %v7619_v19 = vld [vmem:[#allocation226_spill] sm:$0xff] }
 0x73a   : > { %4988 = vmatpush1.bf16.msra.mxu1 %v7567_v22  ;;  %v7620_v22 = vld [vmem:[#allocation227_spill] sm:$0xff] }
 0x73b   : > { %5052 = vmatpush1.bf16.msra.mxu0 %v7568_v25  ;;  %4990 = vmatprep.subr.bf16.mxu1 %v7569_v2  ;;  %v7621_v25 = vld [vmem:[#allocation228_spill] sm:$0xff]  ;;  %v7622_v2 = vld [vmem:[#allocation229_spill] sm:$0xff] }
 0x73c   : > { %5054 = vmatprep.subr.bf16.mxu0 %v7570_v58  ;;  %v7623_v58 = vld [vmem:[#allocation230_spill] sm:$0xff] }
 0x73e   : > { %4992 = vmatpush1.bf16.msra.mxu1 %v7571_v60  ;;  %v7624_v60 = vld [vmem:[#allocation231_spill] sm:$0xff] }
 0x73f   : > { %5056 = vmatpush1.bf16.msra.mxu0 %v7572_v6  ;;  %4994 = vmatprep.subr.bf16.mxu1 %v7573_v34  ;;  %v7625_v6 = vld [vmem:[#allocation232_spill] sm:$0xff] }
 0x740   : > { %5058 = vmatprep.subr.bf16.mxu0 %v7574_v43 }
 0x742   : > { %4996 = vmatpush1.bf16.msra.mxu1 %v7575_v55 }
 0x743   : > { %5060 = vmatpush1.bf16.msra.mxu0 %v7576_v31  ;;  %4998 = vmatprep.subr.bf16.mxu1 %v7577_v21 }
 0x744   : > { %5062 = vmatprep.subr.bf16.mxu0 %v7578_v35 }
 0x746   : > { %5000 = vmatpush1.bf16.msra.mxu1 %v7579_v61 }
 0x747   : > { %5064 = vmatpush1.bf16.msra.mxu0 %v7580_v38  ;;  %5002 = vmatprep.subr.bf16.mxu1 %v7581_v63  ;;  %v7626_v38 = vld [vmem:[#allocation233_spill] sm:$0xff]  ;;  %v7627_v63 = vld [vmem:[#allocation234_spill] sm:$0xff] }
 0x748   : > { %5066 = vmatprep.subr.bf16.mxu0 %v7582_v48  ;;  %v7628_v48 = vld [vmem:[#allocation235_spill] sm:$0xff] }
 0x74a   : > { %5004 = vmatpush1.bf16.msra.mxu1 %v7583_v51  ;;  %v7629_v51 = vld [vmem:[#allocation236_spill] sm:$0xff] }
 0x74b   : > { %5068 = vmatpush1.bf16.msra.mxu0 %v7584_v59  ;;  %5006 = vmatprep.subr.bf16.mxu1 %v7585_v3  ;;  %v7630_v59 = vld [vmem:[#allocation237_spill] sm:$0xff]  ;;  %v7631_v3 = vld [vmem:[#allocation238_spill] sm:$0xff] }
 0x74c   : > { %5070 = vmatprep.subr.bf16.mxu0 %v7586_v20  ;;  %v7632_v20 = vld [vmem:[#allocation239_spill] sm:$0xff] }
 0x74e   : > { %5008 = vmatpush1.bf16.msra.mxu1 %v7587_v12  ;;  %v7634_v12 = vld [vmem:[#allocation241_spill] sm:$0xff] }
 0x74f   : > { %5072 = vmatpush1.bf16.msra.mxu0 %v7588_v39  ;;  %5010 = vmatprep.subr.bf16.mxu1 %v7589_v42  ;;  %v7636_v39 = vld [vmem:[#allocation243_spill] sm:$0xff]  ;;  %v7637_v42 = vld [vmem:[#allocation244_spill] sm:$0xff] }
 0x750   : > { %5074 = vmatprep.subr.bf16.mxu0 %v7590_v56  ;;  %v7638_v56 = vld [vmem:[#allocation245_spill] sm:$0xff] }
 0x752   : > { %5012 = vmatpush1.bf16.msra.mxu1 %v7591_v57 }
 0x753   : > { %5076 = vmatpush1.bf16.msra.mxu0 %v7592_v8  ;;  %5014 = vmatprep.subr.bf16.mxu1 %v7593_v50 }
 0x754   : > { %5078 = vmatprep.subr.bf16.mxu0 %v7594_v11 }
 0x756   : > { %5016 = vmatpush1.bf16.msra.mxu1 %v7595_v29 }
 0x757   : > { %5080 = vmatpush1.bf16.msra.mxu0 %v7596_v33  ;;  %5018 = vmatprep.subr.bf16.mxu1 %v7597_v30 }
 0x758   : > { %5082 = vmatprep.subr.bf16.mxu0 %v7598_v62 }
 0x75a   : > { %5020 = vmatpush1.bf16.msra.mxu1 %v7599_v24 }
 0x75b   : > { %5084 = vmatpush1.bf16.msra.mxu0 %v7600_v26  ;;  %5022 = vmatprep.subr.bf16.mxu1 %v7601_v53 }
 0x75c   : > { %5086 = vmatprep.subr.bf16.mxu0 %v7602_v54 }
 0x75e   : > { %5024 = vmatpush1.bf16.msra.mxu1 %v7603_v15 }
 0x75f   : > { %5088 = vmatpush1.bf16.msra.mxu0 %v7604_v17  ;;  %5026 = vmatprep.subr.bf16.mxu1 %v7605_v44 }
 0x760   : > { %5090 = vmatprep.subr.bf16.mxu0 %v7606_v47 }
 0x762   : > { %5028 = vmatpush1.bf16.msra.mxu1 %v7607_v32 }
 0x763   : > { %5092 = vmatpush1.bf16.msra.mxu0 %v6325_v52  ;;  %5030 = vmatprep.subr.bf16.mxu1 %v6327_v36  ;;  %v7615_v52 = vld [vmem:[#allocation223_spill] sm:$0xff]  ;;  %v7616_v36 = vld [vmem:[#allocation224_spill] sm:$0xff] }
 0x764   : > { %5094 = vmatprep.subr.bf16.mxu0 %v6330_v37  ;;  %v7617_v37 = vmov 0.0  }
 0x766   : > { %5032 = vmatpush1.bf16.msra.mxu1 %v7608_v0 }
 0x767   : > { %5096 = vmatpush1.bf16.msra.mxu0 %v7609_v14  ;;  %5034 = vmatprep.subr.bf16.mxu1 %v7610_v5 }
 0x768   : > { %5098 = vmatprep.subr.bf16.mxu0 %v7611_v4 }
 0x76a   : > { %5036 = vmatpush1.bf16.msra.mxu1 %v7612_v7 }
 0x76b   : > { %5100 = vmatpush1.bf16.msra.mxu0 %v7613_v10  ;;  %5102 = vmatprep.subr.bf16.mxu1 %v7614_v13  ;;  %v3408_v13 = vld [vmem:[%s6901_s10] sm:$0xf] }
 0x76d   : > { %3228 = vmatmul.mubr.f32.vlgmr.msra.gmra.mrb[18].mxu1 %v6576_v41 }
 0x76e   : > { %3299 = vmatmul.mubr.f32.vlgmr.msra.gmra.mrb[26].mxu0 %v6576_v41  ;;  %5104 = vmatpush1.bf16.msra.mxu1 %v7615_v52  ;;  %v3413_v52 = vpop.permute.xlu1 %3412 }
 0x76f   : > { %3369 = vmatprep.mubr.f32.mxu1 %v6578_v46  ;;  %5106 = vmatprep.subr.bf16.mxu1 %v7616_v36 }
 0x770   : > { %3488 = vmatprep.mubr.f32.mxu0 %v7617_v37 }
 0x772   : > { %5108 = vmatpush1.bf16.msra.mxu1 %v7618_v16 }
 0x773   : > { %5110 = vmatprep.subr.bf16.mxu1 %v7619_v19 }
 0x776   : > { %5112 = vmatpush1.bf16.msra.mxu1 %v7620_v22 }
 0x777   : > { %5114 = vmatprep.subr.bf16.mxu1 %v7621_v25 }
 0x77a   : > { %5116 = vmatpush1.bf16.msra.mxu1 %v7622_v2 }
 0x77b   : > { %5118 = vmatprep.subr.bf16.mxu1 %v7623_v58 }
 0x77e   : > { %5120 = vmatpush1.bf16.msra.mxu1 %v7624_v60 }
 0x77f   : > { %5122 = vmatprep.subr.bf16.mxu1 %v7625_v6 }
 0x780   : > { %v2803_v46 = vpop.f32.mrb[12].mxu1  ;;  %v2874_v34 = vpop.f32.mrb[20].mxu0 }
 0x781   : > { %v3378_v43 = vrot.slane %v2874_v34, 4  ;;  %v2805_v55 = vpop.f32.mrb[13].mxu1  ;;  %v2876_v31 = vpop.f32.mrb[21].mxu0 }
 0x782   : > { %v3379_v21 = vrot.slane %v2876_v31, 4  ;;  %5124 = vmatpush1.bf16.msra.mxu1 %v6390_v1  ;;  %v7633_v1 = vld [vmem:[#allocation240_spill] sm:$0xff] }
 0x783   : > { %v3400_v35 = vsel %vm598_vm1, %v2803_v46, %v3378_v43  ;;  %5126 = vmatprep.subr.bf16.mxu1 %v6393_v45  ;;  %v7635_v45 = vld [vmem:[#allocation242_spill] sm:$0xff] }
 0x784   : > { %v3401_v61 = vsel %vm598_vm1, %v2805_v55, %v3379_v21 }
 0x786   : > { %5128 = vmatpush1.bf16.msra.mxu1 %v7626_v38 }
 0x787   : > { %5130 = vmatprep.subr.bf16.mxu1 %v7627_v63 }
 0x78a   : > { %5132 = vmatpush1.bf16.msra.mxu1 %v7628_v48 }
 0x78b   : > { %5134 = vmatprep.subr.bf16.mxu1 %v7629_v51 }
 0x78e   : > { %5136 = vmatpush1.bf16.msra.mxu1 %v7630_v59 }
 0x78f   : > { %5138 = vmatprep.subr.bf16.mxu1 %v7631_v3  ;;  %v3772_v3 = vld [vmem:[%s6907_s16] sm:$0xf] }
 0x792   : > { %5140 = vmatpush1.bf16.msra.mxu1 %v7632_v20  ;;  %v3583_v20 = vld [vmem:[%s6903_s12] sm:$0xf] }
 0x793   : > { %5142 = vmatprep.subr.bf16.mxu1 %v7633_v1  ;;  %v3591_v1 = vld [vmem:[%s6904_s13] sm:$0xf] }
 0x796   : > { %5144 = vmatpush1.bf16.msra.mxu1 %v7634_v12 }
 0x797   : > { %5146 = vmatprep.subr.bf16.mxu1 %v7635_v45 }
 0x79a   : > { %5148 = vmatpush1.bf16.msra.mxu1 %v7636_v39 }
 0x79b   : > { %5150 = vmatprep.subr.bf16.mxu1 %v7637_v42 }
 0x79e   : > { %5152 = vmatpush1.bf16.msra.mxu1 %v7638_v56 }
 0x79f   : > { %5154 = vmatprep.subr.bf16.mxu1 %v6441_v27 }
 0x7a2   : > { %5156 = vmatpush1.bf16.msra.mxu1 %v6444_v9 }
 0x7a3   : > { %5158 = vmatprep.subr.bf16.mxu1 %v6447_v49 }
 0x7a6   : > { %5160 = vmatpush1.bf16.msra.mxu1 %v6450_v28 }
 0x7a7   : > { %5162 = vmatprep.subr.bf16.mxu1 %v6453_v23 }
 0x7aa   : > { %5164 = vmatpush1.bf16.msra.mxu1 %v6456_v40 }
 0x7ad   : > { %3370 = vmatmul.mubr.f32.vlgmr.msra.gmra.mrb[20].mxu1 %v6576_v41 }
 0x7c0   : > { %v2945_v57 = vpop.f32.mrb[14].mxu1  ;;  %v3016_v8 = vpop.f32.mrb[22].mxu0 }
 0x7c1   : > { %v3384_v50 = vrot.slane %v3016_v8, 4  ;;  %v2947_v11 = vpop.f32.mrb[15].mxu1  ;;  %v3018_v29 = vpop.f32.mrb[23].mxu0 }
 0x7c2   : > { %v3385_v33 = vrot.slane %v3018_v29, 4 }
 0x7c3   : > { %v3402_v27 = vsel %vm598_vm1, %v2945_v57, %v3384_v50 }
 0x7c4   : > { %v5167_v30 = vpack.c.bf16 %v3402_v27, %v3400_v35  ;;  %v3403_v9 = vsel %vm598_vm1, %v2947_v11, %v3385_v33 }
 0x7c5   : > { %v5165_v49 = vpack.c.bf16 %v3403_v9, %v3401_v61 }
 0x7c7   : > { %5166 = vmatprep.subr.bf16.mxu0 %v5165_v49 }
 0x7c8   : > { %5168 = vmatpush1.bf16.msra.mxu0 %v5167_v30 }
 0x800   : > { %v3087_v28 = vpop.f32.mrb[16].mxu1 }
 0x801   : > { %v3158_v23 = vpop.f32.mrb[24].mxu0  ;;  %v3089_v62 = vpop.f32.mrb[17].mxu1 }
 0x802   : > { %v3390_v40 = vrot.slane %v3158_v23, 4  ;;  %v3160_v24 = vpop.f32.mrb[25].mxu0 }
 0x803   : > { %v3391_v41 = vrot.slane %v3160_v24, 4 }
 0x804   : > { %v3404_v26 = vsel %vm598_vm1, %v3087_v28, %v3390_v40 }
 0x805   : > { %v3405_v53 = vsel %vm598_vm1, %v3089_v62, %v3391_v41 }
 0x840   : > { %v3229_v54 = vpop.f32.mrb[18].mxu1 }
 0x841   : > { %v3300_v15 = vpop.f32.mrb[26].mxu0  ;;  %v3231_v17 = vpop.f32.mrb[19].mxu1 }
 0x842   : > { %v3396_v44 = vrot.slane %v3300_v15, 4  ;;  %v3302_v47 = vpop.f32.mrb[27].mxu0 }
 0x843   : > { %v3397_v32 = vrot.slane %v3302_v47, 4 }
 0x844   : > { %v3406_v0 = vsel %vm598_vm1, %v3229_v54, %v3396_v44 }
 0x845   : > { %v5171_v14 = vpack.c.bf16 %v3406_v0, %v3404_v26  ;;  %v3407_v5 = vsel %vm598_vm1, %v3231_v17, %v3397_v32 }
 0x846   : > { %v5169_v4 = vpack.c.bf16 %v3407_v5, %v3405_v53 }
 0x848   : > { %5170 = vmatprep.subr.bf16.mxu0 %v5169_v4 }
 0x849   : > { %5172 = vmatpush1.bf16.msra.mxu0 %v5171_v14 }
 0x880   : > { %v3371_v7 = vpop.f32.mrb[20].mxu1 }
 0x881   : > { %v3373_v10 = vpop.f32.mrb[21].mxu1 }
 0x882   : > { %3901 = vmatprep.subr.msk.mxu0 %vm598_vm1, %v3373_v10 }
 0x883   : > { %3902 = vmatpush1.msk.msra.mxu0 %vm598_vm1, %v3371_v7 }
 0x884   : > { %3903 = vmatmul.mubr.msk.f32.vlgmr.msra.gmra.mrb[28].mxu0 %vm2540_vm4, %v3408_v13 }
 0x885   : > { %3685 = vmatprep.mubr.f32.mxu0 %v7617_v37 }
 0x957   : > { %v3490_v36 = vpop.f32.mrb[28].mxu0 }
 0x958   : > { %v6836_v16 = vadd.f32 %v3490_v36, %v3413_v52  ;;  %v3492_v19 = vpop.f32.mrb[29].mxu0 }
 0x959   : > { %v6838_v22 = vadd.f32 %v3492_v19, %v3413_v52 }
 0x95a   : > { %v3495_v25 = vsel %vm2621_vm5, %v6836_v16, 0.0  ;;  %v3509_v2 = vmul.f32 %v6836_v16, %v6836_v16  ;;  %v3535_v6 = vrot.slane %v6836_v16, 2 }
 0x95b   : > { %v3496_v58 = vsel %vm2621_vm5, %v6838_v22, 0.0  ;;  %v3510_v60 = vmul.f32 %v6838_v22, %v6838_v22  ;;  %v3536_v46 = vrot.slane %v6838_v22, 2 }
 0x95c   : > { %v3497_v34 = vadd.f32 %v3496_v58, %v3495_v25  ;;  %v3511_v43 = vsel %vm2621_vm5, %v3509_v2, 0.0  ;;  %v3539_v21 = vsel %vm2621_vm5, %v3535_v6, 0.0  ;;  %v3555_v61 = vrot.slane %v3509_v2, 2 }
 0x95d   : > { %v3512_v55 = vsel %vm2621_vm5, %v3510_v60, 0.0  ;;  %v3540_v35 = vsel %vm2621_vm5, %v3536_v46, 0.0  ;;  %v3556_v38 = vrot.slane %v3510_v60, 2 }
 0x95e   : > { %3498 = vadd.xlane.f32.xlu1 %v3497_v34  ;;  %v3513_v31 = vadd.f32 %v3512_v55, %v3511_v43  ;;  %v3541_v63 = vadd.f32 %v3540_v35, %v3539_v21  ;;  %v3559_v48 = vsel %vm2621_vm5, %v3555_v61, 0.0 }
 0x95f   : > { %v3560_v51 = vsel %vm2621_vm5, %v3556_v38, 0.0 }
 0x960   : > { %3514 = vadd.xlane.f32.xlu0 %v3513_v31  ;;  %v3561_v59 = vadd.f32 %v3560_v51, %v3559_v48 }
 0x964   : > { %3542 = vadd.xlane.f32.xlu0 %v3541_v63 }
 0x968   : > { %3562 = vadd.xlane.f32.xlu0 %v3561_v59 }
 0x96f   : > { %3775 = vperm.xlu1 %5234, %v3772_v3  }
 0x97e   : > { %3586 = vperm.xlu0 %5233, %v3583_v20  }
 0x982   : > { %3594 = vperm.xlu0 %5233, %v3591_v1  }
 0x9eb   : > { %v3499_v12 = vpop.xlane.xlu1 %3498 }
 0x9ec   : > { %v3500_v45 = vrot.slane %v3499_v12, 4 }
 0x9ed   : > { %v3515_v39 = vpop.xlane.xlu0 %3514 }
 0x9ee   : > { %v3501_v42 = vadd.f32 %v3500_v45, %v3499_v12  ;;  %v3516_v56 = vrot.slane %v3515_v39, 4 }
 0x9f0   : > { %v3502_v57 = vrot.slane %v3501_v42, 2  ;;  %v3517_v8 = vadd.f32 %v3516_v56, %v3515_v39 }
 0x9f1   : > { %v3543_v50 = vpop.xlane.xlu0 %3542 }
 0x9f2   : > { %v3518_v11 = vrot.slane %v3517_v8, 2  ;;  %v3544_v29 = vrot.slane %v3543_v50, 4  ;;  %v3503_v33 = vadd.f32 %v3502_v57, %v3501_v42 }
 0x9f4   : > { %v3545_v27 = vadd.f32 %v3544_v29, %v3543_v50  ;;  %v3504_v30 = vrot.slane %v3503_v33, 1  ;;  %v3519_v9 = vadd.f32 %v3518_v11, %v3517_v8  ;;  %v3610_v11 = vld [vmem:[%s6906_s15] sm:$0xf]  ;;  %v7639_v29 = vld [vmem:[#allocation35_spill] sm:$0xff] }
 0x9f5   : > { %v3563_v49 = vpop.xlane.xlu0 %3562 }
 0x9f6   : > { %v3546_v28 = vrot.slane %v3545_v27, 2  ;;  %v3564_v23 = vrot.slane %v3563_v49, 4  ;;  %v3505_v62 = vadd.f32 %v3504_v30, %v3503_v33  ;;  %v3520_v40 = vrot.slane %v3519_v9, 1  ;;  %v3609_v33 = vld [vmem:[%s6905_s14] sm:$0xf] }
 0x9f8   : > { %v3565_v24 = vadd.f32 %v3564_v23, %v3563_v49  ;;  %5191 = vpush %v3505_v62  ;;  %v3521_v41 = vadd.f32 %v3520_v40, %v3519_v9  ;;  %v3547_v26 = vadd.f32 %v3546_v28, %v3545_v27  ;;  %v3776_v27 = vpop.permute.xlu1 %3775 }
 0x9fa   : > { %v3566_v53 = vrot.slane %v3565_v24, 2  ;;  %5193 = vpush %v3521_v41  ;;  %v3548_v54 = vrot.slane %v3547_v26, 1 }
 0x9fc   : > { %v3549_v15 = vadd.f32 %v3548_v54, %v3547_v26  ;;  %v3567_v17 = vadd.f32 %v3566_v53, %v3565_v24 }
 0x9fd   : > { %v3587_v6 = vpop.permute.xlu0 %3586 }
 0x9fe   : > { %5195 = vpush %v3549_v15  ;;  %v3568_v44 = vrot.slane %v3567_v17, 1 }
 0xa00   : > { %v3569_v47 = vadd.f32 %v3568_v44, %v3567_v17 }
 0xa01   : > { %v3595_v3 = vpop.permute.xlu0 %3594 }
 0xa02   : > { %5197 = vpush %v3569_v47 }
 0xa29   : > { %s5192_s26 = spop %5191 }
 0xa2a   : > { %v3507_v32 = vstv %s5192_s26 }
 0xa2b   : > { %v3508_v0 = vmul.f32 0.001953125, %v3507_v32  ;;  %s5194_s27 = spop %5193 }
 0xa2c   : > { %v3523_v14 = vstv %s5194_s27 }
 0xa2d   : > { %v3524_v5 = vmul.f32 0.001953125, %v3523_v14  ;;  %v3525_v4 = vmul.f32 %v3508_v0, %v3508_v0  ;;  %v3527_v46 = vsub.f32 %v6836_v16, %v3508_v0  ;;  %v3528_v34 = vsub.f32 %v6838_v22, %v3508_v0 }
 0xa2f   : > { %s5196_s17 = spop %5195  ;;  %v3526_v10 = vsub.f32 %v3524_v5, %v3525_v4 }
 0xa30   : > { %v3551_v7 = vstv %s5196_s17 }
 0xa31   : > { %v3552_v13 = vmul.f32 0.001953125, %v3551_v7  ;;  %v3529_v36 = vadd.f32 1e-05, %v3526_v10 }
 0xa33   : > { %s5198_s24 = spop %5197  ;;  %v3573_v25 = vmul.f32 %v3552_v13, %v3552_v13  ;;  %5243 = vrsqrt.f32 %v3529_v36  ;;  %v3575_v43 = vsub.f32 %v6836_v16, %v3552_v13  ;;  %v3576_v55 = vsub.f32 %v6838_v22, %v3552_v13 }
 0xa34   : > { %v3571_v52 = vstv %s5198_s24 }
 0xa35   : > { %v3572_v19 = vmul.f32 0.001953125, %v3571_v52 }
 0xa37   : > { %v3574_v2 = vsub.f32 %v3572_v19, %v3573_v25 }
 0xa39   : > { %v3577_v58 = vadd.f32 1e-05, %v3574_v2 }
 0xa3b   : > { %5245 = vrsqrt.f32 %v3577_v58 }
 0xa3d   : > { %v5244_v60 = vpop.eup %5243 }
 0xa3e   : > { %v3531_v21 = vmul.f32 %v5244_v60, %v3527_v46  ;;  %v3532_v35 = vmul.f32 %v5244_v60, %v3528_v34 }
 0xa45   : > { %v5246_v31 = vpop.eup %5245 }
 0xa46   : > { %v3579_v61 = vmul.f32 %v5246_v31, %v3575_v43  ;;  %v3580_v38 = vmul.f32 %v5246_v31, %v3576_v55 }
 0xa48   : > { %v3582_v63 = vsel %vm2621_vm5, %v3532_v35, %v3580_v38  ;;  %v3581_v48 = vsel %vm2621_vm5, %v3531_v21, %v3579_v61 }
 0xa49   : > { %v3590_v51 = vmul.f32 %v3587_v6, %v3582_v63  ;;  %v3589_v59 = vmul.f32 %v3587_v6, %v3581_v48 }
 0xa4b   : > { %v3598_v20 = vadd.f32 %v3595_v3, %v3590_v51  ;;  %v3597_v1 = vadd.f32 %v3595_v3, %v3589_v59 }
 0xa4d   : > { %v3600_v12 = vmul.f32 0.5, %v3598_v20  ;;  %v3599_v45 = vmul.f32 0.5, %v3597_v1 }
 0xa4f   : > { %5247 = vtanh.f32 %v3600_v12 }
 0xa50   : > { %5249 = vtanh.f32 %v3599_v45 }
 0xa59   : > { %v5248_v16 = vpop.eup %5247 }
 0xa5a   : > { %v5250_v22 = vpop.eup %5249  ;;  %v3604_v39 = vadd.f32 1.0, %v5248_v16 }
 0xa5b   : > { %v3603_v42 = vadd.f32 1.0, %v5250_v22 }
 0xa5c   : > { %v3606_v56 = vmul.f32 0.5, %v3604_v39 }
 0xa5d   : > { %v3605_v57 = vmul.f32 0.5, %v3603_v42 }
 0xa5e   : > { %v3608_v8 = vmul.f32 %v3606_v56, %v3598_v20 }
 0xa5f   : > { %v3607_v50 = vmul.f32 %v3605_v57, %v3597_v1 }
 0xa60   : > { %3904 = vmatprep.subr.msk.mxu0 %vm598_vm1, %v3608_v8 }
 0xa61   : > { %3905 = vmatpush1.msk.msra.mxu0 %vm598_vm1, %v3607_v50 }
 0xa62   : > { %3906 = vmatmul.mubr.msk.f32.vlgmr.msra.gmra.mrb[30].mxu0 %vm3611_vm6, %v3610_v11  ;;  %3907 = vmatprep.subr.msk.mxu0 %vm598_vm1, %v7639_v29 }
 0xa63   : > { %3908 = vmatpush1.msk.msra.mxu0 %vm598_vm1, %v5766_v18  ;;  %3765 = vmatprep.mubr.f32.mxu0 %v7617_v37 }
 0xa6a   : > { %3909 = vmatmul.mubr.msk.f32.vlgmr.msra.gmra.mrb[30].mxu0 %vm3611_vm6, %v3609_v33 }
 0xb3d   : > { %v3767_v30 = vpop.f32.mrb[30].mxu0 }
 0xb3e   : > { %v3778_v9 = vadd.f32 %v3776_v27, %v3767_v30  ;;  %v3769_v49 = vpop.f32.mrb[31].mxu0 }
 0xb3f   : > { %v3779_v28 = vadd.f32 %v3776_v27, %v3769_v49 }
 0xb41   : > { %v3782_v23 = vcombine.low %v3778_v9, %v3779_v28 }
 0xb43   : > { %3784 = vst [vmem:[%s592_s21] sm:$0xff] %v3782_v23 }
 0xb44 PF: > { %s7641_s22 = sld [smem:[#allocation8_spill]] }
 0xb4a   : > { %s29_s24 = sadd.s32 1, %s7641_s22  }
 0xb4b   : > { %p26_p5 = scmp.ge.s32.totalorder %s29_s24, 4  }
 0xb4d   :  { %28 = sbr.rel (!%p26_p5) target bundleno = 6 (0x6), region = 144 }
 0xb54   :  { %3806 = vsyncpa [#allocation3], 1 }
 0xb55   :  { %3808 = vsyncpa [#allocation3 + $0x1], 1 }
 0xb56   :  { %3809 = vsyncpa [#allocation5], 1 }

</bundles_post_ra>
